<compile_context>
chip_gen: v6e
topology: v6e:2x2x1
jax: 0.10.0
libtpu: 0.0.40
codegen_flags: <defaults>
</compile_context>

<pallas_src>
import numpy as np
import jax
import jax.numpy as jnp
from jax import lax
from jax.experimental import pallas as pl
from jax.experimental.pallas import tpu as pltpu


# ---------------------------------------------------------------------------
# Fused whole-net Pallas kernel (one image per grid step)
# ---------------------------------------------------------------------------

def _lenet_fused_kernel(x_ref, t1_ref, t2_ref, g1_ref, w2_ref, w3_ref,
                        b1_ref, b2_ref, bf1_ref, bf2_ref, bf3_ref, o_ref):
    """Whole forward pass for one image.

    x_ref : (1, 4, 8, 96)   row-phase planes of the 32x32x3 image:
                            x_ref[0, m, u, w*3+ci] = image[4*u + m, w, ci]
    t1_ref: (5, 2, 96, 84)  conv1 pooled-Toeplitz matrices T1[ki, q]
    t2_ref: (5, 2, 84, 80)  conv2 pooled-Toeplitz matrices T2[ki, q]
    g1_ref: (5, 80, 120)    fc1 weight split per pooled row y (NCHW flatten permutation folded in)
    w2_ref: (120, 84), w3_ref: (84, 10)    fc2 / fc3 weights, (in, out) layout
    b1_ref: (1, 84), b2_ref: (1, 80)       conv biases tiled over the pooled width
    bf1_ref/bf2_ref/bf3_ref: (1,120)/(1,84)/(1,10)  fc biases
    o_ref : (1, 1, 10)      logits
    """
    f32 = jnp.float32
    cdt = t1_ref.dtype            # matmul-input dtype (bf16 by default), f32 accumulation

    def dot(a, b):
        return jnp.dot(a.astype(cdt), b, preferred_element_type=f32)

    # ---- conv1 + bias + ReLU + 2x2 maxpool, as even/odd pooled-row planes -----------------
    # pooled row i needs conv rows 2i+p (p=0,1), i.e. image rows 4u + row_shift + p + ki with
    # row_shift = 0 (even plane, i = 2u) or 2 (odd plane, i = 2u+1).
    def conv1_plane(row_shift):
        taps = []
        for p in range(2):
            for q in range(2):
                acc = None
                for ki in range(5):
                    r = row_shift + p + ki                      # image row = 4u + r
                    m, a = r % 4, r // 4
                    prod = dot(x_ref[0, m], t1_ref[ki, q])      # (8, 84) f32
                    contrib = prod[a:a + 7, :]                  # rows u = 0..6
                    acc = contrib if acc is None else acc + contrib
                taps.append(acc)
        mx = jnp.maximum(jnp.maximum(taps[0], taps[1]),
                         jnp.maximum(taps[2], taps[3]))         # 2x2 maxpool over the 4 taps
        return jnp.maximum(mx + b1_ref[...], 0.0)               # bias+ReLU hoisted after max

    p1e = conv1_plane(0)   # (7, 84): pooled rows 0,2,...,12 ; cols = w*6 + c
    p1o = conv1_plane(2)   # (7, 84): pooled rows 1,3,...,13

    # ---- conv2 + bias + ReLU + 2x2 maxpool -------------------------------------------------
    def conv2_tap(p, q):
        acc = None
        for ki in range(5):
            r = p + ki                                          # pool1 row = 2y + r
            src = p1e if r % 2 == 0 else p1o
            a = r // 2
            prod = dot(src, t2_ref[ki, q])                      # (7, 80) f32
            contrib = prod[a:a + 5, :]                          # rows y = 0..4
            acc = contrib if acc is None else acc + contrib
        return acc

    mx = jnp.maximum(jnp.maximum(conv2_tap(0, 0), conv2_tap(0, 1)),
                     jnp.maximum(conv2_tap(1, 0), conv2_tap(1, 1)))
    p2 = jnp.maximum(mx + b2_ref[...], 0.0)                     # (5, 80): [y, z*16 + co]

    # ---- fc1 + ReLU -> fc2 + ReLU -> fc3 ---------------------------------------------------
    h = bf1_ref[...]                                            # (1, 120), start from the bias
    for y in range(5):
        h = h + dot(p2[y:y + 1, :], g1_ref[y])                  # (1, 80) @ (80, 120)
    h = jnp.maximum(h, 0.0)
    h = jnp.maximum(dot(h, w2_ref[...]) + bf2_ref[...], 0.0)    # (1, 84)
    o_ref[0] = dot(h, w3_ref[...]) + bf3_ref[...]               # (1, 10)


# ---------------------------------------------------------------------------
# One-time (outside jit) weight re-layouts
# ---------------------------------------------------------------------------

def _pooled_toeplitz(w_oihw, in_width):
    """(Cout, Cin, KH, KW) torch conv weight -> (KH, 2, in_width*Cin, OW2*Cout) with
    T[ki, q, w*Cin+ci, j*Cout+co] = w[co, ci, ki, w - 2j - q]  (zero where w-2j-q not in [0,KW)).
    A row-band matmul `x_rows @ T[ki, q]` then yields conv row-contributions directly at the
    pooled (stride-2, column phase q) output positions."""
    w_oihw = np.asarray(w_oihw, np.float32)
    cout, cin, kh, kw = w_oihw.shape
    ow2 = (in_width - kw + 1) // 2
    t = np.zeros((kh, 2, in_width * cin, ow2 * cout), np.float32)
    for ki in range(kh):
        for q in range(2):
            for j in range(ow2):
                for kj in range(kw):
                    w = 2 * j + q + kj
                    t[ki, q, w * cin:(w + 1) * cin,
                      j * cout:(j + 1) * cout] = w_oihw[:, :, ki, kj].T
    return t


def _fc1_blocks(fc1_w):
    """torch fc1 weight (120, 400), input index = co*25 + y*5 + z  ->  (5, 80, 120) blocks
    G[y][z*16+co, o], so the kernel consumes the pooled conv2 activation in its native
    (y, z*16+co) layout (the old NCHW transpose+flatten is folded in here, once, outside jit)."""
    fc1_w = np.asarray(fc1_w, np.float32)
    g = np.zeros((5, 80, 120), np.float32)
    for y in range(5):
        for z in range(5):
            for co in range(16):
                g[y, z * 16 + co, :] = fc1_w[:, co * 25 + y * 5 + z]
    return g


def init_params(key):
    """torch-layout parameters (as nn.Conv2d / nn.Linear would hold them)."""
    ks = jax.random.split(key, 10)
    s = 0.1
    return {
        "conv1_w": jax.random.normal(ks[0], (6, 3, 5, 5), jnp.float32) * s,
        "conv1_b": jax.random.normal(ks[1], (6,), jnp.float32) * s,
        "conv2_w": jax.random.normal(ks[2], (16, 6, 5, 5), jnp.float32) * s,
        "conv2_b": jax.random.normal(ks[3], (16,), jnp.float32) * s,
        "fc1_w": jax.random.normal(ks[4], (120, 400), jnp.float32) * s,   # torch (out, in)
        "fc1_b": jax.random.normal(ks[5], (120,), jnp.float32) * s,
        "fc2_w": jax.random.normal(ks[6], (84, 120), jnp.float32) * s,
        "fc2_b": jax.random.normal(ks[7], (84,), jnp.float32) * s,
        "fc3_w": jax.random.normal(ks[8], (10, 84), jnp.float32) * s,
        "fc3_b": jax.random.normal(ks[9], (10,), jnp.float32) * s,
    }


def prepare_params(p, compute_dtype=jnp.bfloat16):
    """One-time conversion of torch-layout params to kernel weights.  compute_dtype=bf16 gives
    bf16 MXU inputs with f32 accumulation (review item for v6e/v7x); pass jnp.float32 for
    exact-f32 numerics."""
    f32 = jnp.float32
    return {
        "t1": jnp.asarray(_pooled_toeplitz(p["conv1_w"], in_width=32), compute_dtype),
        "t2": jnp.asarray(_pooled_toeplitz(p["conv2_w"], in_width=14), compute_dtype),
        "g1": jnp.asarray(_fc1_blocks(p["fc1_w"]), compute_dtype),
        "w2": jnp.asarray(p["fc2_w"]).T.astype(compute_dtype),            # (120, 84)
        "w3": jnp.asarray(p["fc3_w"]).T.astype(compute_dtype),            # (84, 10)
        "b1row": jnp.tile(jnp.asarray(p["conv1_b"], f32), 14).reshape(1, 84),
        "b2row": jnp.tile(jnp.asarray(p["conv2_b"], f32), 5).reshape(1, 80),
        "bf1": jnp.asarray(p["fc1_b"], f32).reshape(1, 120),
        "bf2": jnp.asarray(p["fc2_b"], f32).reshape(1, 84),
        "bf3": jnp.asarray(p["fc3_b"], f32).reshape(1, 10),
    }


# ---------------------------------------------------------------------------
# Forward pass (matches PyTorch Net.forward semantics)
# ---------------------------------------------------------------------------

def lenet_forward_pallas(x_nchw, kp):
    n, c, h, w = x_nchw.shape
    assert (c, h, w) == (3, 32, 32), "Net requires 3x32x32 inputs (fc1 expects 16*5*5 = 400)"
    cdt = kp["t1"].dtype

    # NCHW -> row-phase planes (N, 4, 8, 96): plane m holds image rows h = 4u + m laid out as
    # (u, w*3 + ci).  Pure layout prep on the 12 KB/image raw input; no 25x im2col inflation.
    x = jnp.transpose(x_nchw, (0, 2, 3, 1)).reshape(n, 8, 4, 96)
    xplanes = jnp.transpose(x, (0, 2, 1, 3)).astype(cdt)

    out = pl.pallas_call(
        _lenet_fused_kernel,
        out_shape=jax.ShapeDtypeStruct((n, 1, 10), jnp.float32),
        grid=(n,),
        in_specs=[
            pl.BlockSpec((1, 4, 8, 96), lambda i: (i, 0, 0, 0)),    # per-image pixels
            pl.BlockSpec((5, 2, 96, 84), lambda i: (0, 0, 0, 0)),   # conv1 Toeplitz (const)
            pl.BlockSpec((5, 2, 84, 80), lambda i: (0, 0, 0, 0)),   # conv2 Toeplitz (const)
            pl.BlockSpec((5, 80, 120), lambda i: (0, 0, 0)),        # fc1 blocks     (const)
            pl.BlockSpec((120, 84), lambda i: (0, 0)),              # fc2            (const)
            pl.BlockSpec((84, 10), lambda i: (0, 0)),               # fc3            (const)
            pl.BlockSpec((1, 84), lambda i: (0, 0)),                # conv1 bias row
            pl.BlockSpec((1, 80), lambda i: (0, 0)),                # conv2 bias row
            pl.BlockSpec((1, 120), lambda i: (0, 0)),               # fc1 bias
            pl.BlockSpec((1, 84), lambda i: (0, 0)),                # fc2 bias
            pl.BlockSpec((1, 10), lambda i: (0, 0)),                # fc3 bias
        ],
        out_specs=pl.BlockSpec((1, 1, 10), lambda i: (i, 0, 0)),
        compiler_params=pltpu.CompilerParams(
            dimension_semantics=("parallel",),       # >= 2 grid steps -> both v7x TCs busy
            vmem_limit_bytes=32 * 1024 * 1024,       # actual use ~1 MB; safe on v5e/v6e/v7x
        ),
    )(xplanes, kp["t1"], kp["t2"], kp["g1"], kp["w2"], kp["w3"],
      kp["b1row"], kp["b2row"], kp["bf1"], kp["bf2"], kp["bf3"])
    return out.reshape(n, 10)


net_forward = jax.jit(lenet_forward_pallas)


# ---------------------------------------------------------------------------
# Pure-JAX f32 reference (for the self-check only)
# ---------------------------------------------------------------------------

def _maxpool2x2(y):  # NCHW, even H/W (floor mode like nn.MaxPool2d(2, 2) for these sizes)
    n, c, h, w = y.shape
    return y.reshape(n, c, h // 2, 2, w // 2, 2).max(axis=(3, 5))


def lenet_forward_reference(x_nchw, p):
    dn = ("NCHW", "OIHW", "NCHW")
    y = lax.conv_general_dilated(x_nchw, p["conv1_w"], (1, 1), "VALID", dimension_numbers=dn)
    y = _maxpool2x2(jax.nn.relu(y + p["conv1_b"][None, :, None, None]))
    y = lax.conv_general_dilated(y, p["conv2_w"], (1, 1), "VALID", dimension_numbers=dn)
    y = _maxpool2x2(jax.nn.relu(y + p["conv2_b"][None, :, None, None]))
    y = y.reshape(y.shape[0], -1)
    y = jax.nn.relu(y @ p["fc1_w"].T + p["fc1_b"])
    y = jax.nn.relu(y @ p["fc2_w"].T + p["fc2_b"])
    return y @ p["fc3_w"].T + p["fc3_b"]


# ---------------------------------------------------------------------------
# Main
# ---------------------------------------------------------------------------

if __name__ == "__main__":
    key = jax.random.PRNGKey(0)
    k_params, k_x = jax.random.split(key)
    torch_params = init_params(k_params)
    kparams = prepare_params(torch_params)            # one-time layout prep, outside jit

    # Input must be 3x32x32 (fc1 expects 16*5*5 = 400 features); small batch of 2.
    x = jax.random.normal(k_x, (2, 3, 32, 32), jnp.float32)

    out = jax.block_until_ready(net_forward(x, kparams))
    assert out.shape == (2, 10), out.shape
    assert bool(jnp.isfinite(out).all()), "non-finite output"

    # Self-check vs. pure-JAX f32 reference (loose tol: kernel matmul inputs are bf16).
    ref = jax.block_until_ready(jax.jit(lenet_forward_reference)(x, torch_params))
    err = float(jnp.max(jnp.abs(out - ref)))
    assert err < 0.1, f"kernel/reference mismatch: max|err| = {err}"
    print("KERNEL_OK")
</pallas_src>

<mosaic_0001>
module attributes {stable_mosaic.version = 11 : i64} {
  func.func @_lenet_fused_kernel(%arg0: i32, %arg1: memref<1x4x8x96xbf16, #tpu.memory_space<vmem>>, %arg2: memref<5x2x96x84xbf16, #tpu.memory_space<vmem>>, %arg3: memref<5x2x84x80xbf16, #tpu.memory_space<vmem>>, %arg4: memref<5x80x120xbf16, #tpu.memory_space<vmem>>, %arg5: memref<120x84xbf16, #tpu.memory_space<vmem>>, %arg6: memref<84x10xbf16, #tpu.memory_space<vmem>>, %arg7: memref<1x84xf32, #tpu.memory_space<vmem>>, %arg8: memref<1x80xf32, #tpu.memory_space<vmem>>, %arg9: memref<1x120xf32, #tpu.memory_space<vmem>>, %arg10: memref<1x84xf32, #tpu.memory_space<vmem>>, %arg11: memref<1x10xf32, #tpu.memory_space<vmem>>, %arg12: memref<1x1x10xf32, #tpu.memory_space<vmem>>) attributes {dimension_semantics = [#tpu.dimension_semantics<parallel>], iteration_bounds = array<i64: 2>, scalar_prefetch = 0 : i64, scratch_operands = 0 : i64, tpu.core_type = #tpu.core_type<tc>, window_params = [{transform_indices = @transform_0, window_bounds = array<i64: 1, 4, 8, 96>}, {pipeline_mode = #tpu.pipeline_mode<synchronous>, transform_indices = @transform_1, window_bounds = array<i64: 5, 2, 96, 84>}, {pipeline_mode = #tpu.pipeline_mode<synchronous>, transform_indices = @transform_2, window_bounds = array<i64: 5, 2, 84, 80>}, {pipeline_mode = #tpu.pipeline_mode<synchronous>, transform_indices = @transform_3, window_bounds = array<i64: 5, 80, 120>}, {pipeline_mode = #tpu.pipeline_mode<synchronous>, transform_indices = @transform_4, window_bounds = array<i64: 120, 84>}, {pipeline_mode = #tpu.pipeline_mode<synchronous>, transform_indices = @transform_5, window_bounds = array<i64: 84, 10>}, {pipeline_mode = #tpu.pipeline_mode<synchronous>, transform_indices = @transform_6, window_bounds = array<i64: 1, 84>}, {pipeline_mode = #tpu.pipeline_mode<synchronous>, transform_indices = @transform_7, window_bounds = array<i64: 1, 80>}, {pipeline_mode = #tpu.pipeline_mode<synchronous>, transform_indices = @transform_8, window_bounds = array<i64: 1, 120>}, {pipeline_mode = #tpu.pipeline_mode<synchronous>, transform_indices = @transform_9, window_bounds = array<i64: 1, 84>}, {pipeline_mode = #tpu.pipeline_mode<synchronous>, transform_indices = @transform_10, window_bounds = array<i64: 1, 10>}, {transform_indices = @transform_11, window_bounds = array<i64: 1, 1, 10>}]} {
    %c0 = arith.constant 0 : index
    %c0_0 = arith.constant 0 : index
    %c0_1 = arith.constant 0 : index
    %c0_2 = arith.constant 0 : index
    %0 = vector.load %arg1[%c0, %c0_0, %c0_1, %c0_2] : memref<1x4x8x96xbf16, #tpu.memory_space<vmem>>, vector<1x1x8x96xbf16>
    %1 = vector.shape_cast %0 : vector<1x1x8x96xbf16> to vector<8x96xbf16>
    %c0_3 = arith.constant 0 : index
    %c0_4 = arith.constant 0 : index
    %c0_5 = arith.constant 0 : index
    %c0_6 = arith.constant 0 : index
    %2 = vector.load %arg2[%c0_3, %c0_4, %c0_5, %c0_6] : memref<5x2x96x84xbf16, #tpu.memory_space<vmem>>, vector<1x1x96x84xbf16>
    %3 = vector.shape_cast %2 : vector<1x1x96x84xbf16> to vector<96x84xbf16>
    %cst = arith.constant dense<0.000000e+00> : vector<8x84xf32>
    %4 = tpu.matmul %1, %3, %cst {dimension_numbers = #tpu.dot_dimension_numbers<[1], [0], [0], [1], [0, 0, 1, 1], [], []>} : vector<8x96xbf16>, vector<96x84xbf16>, vector<8x84xf32> -> vector<8x84xf32>
    %5 = vector.extract_strided_slice %4 {offsets = [0, 0], sizes = [7, 84], strides = [1, 1]} : vector<8x84xf32> to vector<7x84xf32>
    %c0_7 = arith.constant 0 : index
    %c1 = arith.constant 1 : index
    %c0_8 = arith.constant 0 : index
    %c0_9 = arith.constant 0 : index
    %6 = vector.load %arg1[%c0_7, %c1, %c0_8, %c0_9] : memref<1x4x8x96xbf16, #tpu.memory_space<vmem>>, vector<1x1x8x96xbf16>
    %7 = vector.shape_cast %6 : vector<1x1x8x96xbf16> to vector<8x96xbf16>
    %c1_10 = arith.constant 1 : index
    %c0_11 = arith.constant 0 : index
    %c0_12 = arith.constant 0 : index
    %c0_13 = arith.constant 0 : index
    %8 = vector.load %arg2[%c1_10, %c0_11, %c0_12, %c0_13] : memref<5x2x96x84xbf16, #tpu.memory_space<vmem>>, vector<1x1x96x84xbf16>
    %9 = vector.shape_cast %8 : vector<1x1x96x84xbf16> to vector<96x84xbf16>
    %cst_14 = arith.constant dense<0.000000e+00> : vector<8x84xf32>
    %10 = tpu.matmul %7, %9, %cst_14 {dimension_numbers = #tpu.dot_dimension_numbers<[1], [0], [0], [1], [0, 0, 1, 1], [], []>} : vector<8x96xbf16>, vector<96x84xbf16>, vector<8x84xf32> -> vector<8x84xf32>
    %11 = vector.extract_strided_slice %10 {offsets = [0, 0], sizes = [7, 84], strides = [1, 1]} : vector<8x84xf32> to vector<7x84xf32>
    %12 = arith.addf %5, %11 : vector<7x84xf32>
    %c0_15 = arith.constant 0 : index
    %c2 = arith.constant 2 : index
    %c0_16 = arith.constant 0 : index
    %c0_17 = arith.constant 0 : index
    %13 = vector.load %arg1[%c0_15, %c2, %c0_16, %c0_17] : memref<1x4x8x96xbf16, #tpu.memory_space<vmem>>, vector<1x1x8x96xbf16>
    %14 = vector.shape_cast %13 : vector<1x1x8x96xbf16> to vector<8x96xbf16>
    %c2_18 = arith.constant 2 : index
    %c0_19 = arith.constant 0 : index
    %c0_20 = arith.constant 0 : index
    %c0_21 = arith.constant 0 : index
    %15 = vector.load %arg2[%c2_18, %c0_19, %c0_20, %c0_21] : memref<5x2x96x84xbf16, #tpu.memory_space<vmem>>, vector<1x1x96x84xbf16>
    %16 = vector.shape_cast %15 : vector<1x1x96x84xbf16> to vector<96x84xbf16>
    %cst_22 = arith.constant dense<0.000000e+00> : vector<8x84xf32>
    %17 = tpu.matmul %14, %16, %cst_22 {dimension_numbers = #tpu.dot_dimension_numbers<[1], [0], [0], [1], [0, 0, 1, 1], [], []>} : vector<8x96xbf16>, vector<96x84xbf16>, vector<8x84xf32> -> vector<8x84xf32>
    %18 = vector.extract_strided_slice %17 {offsets = [0, 0], sizes = [7, 84], strides = [1, 1]} : vector<8x84xf32> to vector<7x84xf32>
    %19 = arith.addf %12, %18 : vector<7x84xf32>
    %c0_23 = arith.constant 0 : index
    %c3 = arith.constant 3 : index
    %c0_24 = arith.constant 0 : index
    %c0_25 = arith.constant 0 : index
    %20 = vector.load %arg1[%c0_23, %c3, %c0_24, %c0_25] : memref<1x4x8x96xbf16, #tpu.memory_space<vmem>>, vector<1x1x8x96xbf16>
    %21 = vector.shape_cast %20 : vector<1x1x8x96xbf16> to vector<8x96xbf16>
    %c3_26 = arith.constant 3 : index
    %c0_27 = arith.constant 0 : index
    %c0_28 = arith.constant 0 : index
    %c0_29 = arith.constant 0 : index
    %22 = vector.load %arg2[%c3_26, %c0_27, %c0_28, %c0_29] : memref<5x2x96x84xbf16, #tpu.memory_space<vmem>>, vector<1x1x96x84xbf16>
    %23 = vector.shape_cast %22 : vector<1x1x96x84xbf16> to vector<96x84xbf16>
    %cst_30 = arith.constant dense<0.000000e+00> : vector<8x84xf32>
    %24 = tpu.matmul %21, %23, %cst_30 {dimension_numbers = #tpu.dot_dimension_numbers<[1], [0], [0], [1], [0, 0, 1, 1], [], []>} : vector<8x96xbf16>, vector<96x84xbf16>, vector<8x84xf32> -> vector<8x84xf32>
    %25 = vector.extract_strided_slice %24 {offsets = [0, 0], sizes = [7, 84], strides = [1, 1]} : vector<8x84xf32> to vector<7x84xf32>
    %26 = arith.addf %19, %25 : vector<7x84xf32>
    %c0_31 = arith.constant 0 : index
    %c0_32 = arith.constant 0 : index
    %c0_33 = arith.constant 0 : index
    %c0_34 = arith.constant 0 : index
    %27 = vector.load %arg1[%c0_31, %c0_32, %c0_33, %c0_34] : memref<1x4x8x96xbf16, #tpu.memory_space<vmem>>, vector<1x1x8x96xbf16>
    %28 = vector.shape_cast %27 : vector<1x1x8x96xbf16> to vector<8x96xbf16>
    %c4 = arith.constant 4 : index
    %c0_35 = arith.constant 0 : index
    %c0_36 = arith.constant 0 : index
    %c0_37 = arith.constant 0 : index
    %29 = vector.load %arg2[%c4, %c0_35, %c0_36, %c0_37] : memref<5x2x96x84xbf16, #tpu.memory_space<vmem>>, vector<1x1x96x84xbf16>
    %30 = vector.shape_cast %29 : vector<1x1x96x84xbf16> to vector<96x84xbf16>
    %cst_38 = arith.constant dense<0.000000e+00> : vector<8x84xf32>
    %31 = tpu.matmul %28, %30, %cst_38 {dimension_numbers = #tpu.dot_dimension_numbers<[1], [0], [0], [1], [0, 0, 1, 1], [], []>} : vector<8x96xbf16>, vector<96x84xbf16>, vector<8x84xf32> -> vector<8x84xf32>
    %32 = vector.extract_strided_slice %31 {offsets = [1, 0], sizes = [7, 84], strides = [1, 1]} : vector<8x84xf32> to vector<7x84xf32>
    %33 = arith.addf %26, %32 : vector<7x84xf32>
    %c0_39 = arith.constant 0 : index
    %c0_40 = arith.constant 0 : index
    %c0_41 = arith.constant 0 : index
    %c0_42 = arith.constant 0 : index
    %34 = vector.load %arg1[%c0_39, %c0_40, %c0_41, %c0_42] : memref<1x4x8x96xbf16, #tpu.memory_space<vmem>>, vector<1x1x8x96xbf16>
    %35 = vector.shape_cast %34 : vector<1x1x8x96xbf16> to vector<8x96xbf16>
    %c0_43 = arith.constant 0 : index
    %c1_44 = arith.constant 1 : index
    %c0_45 = arith.constant 0 : index
    %c0_46 = arith.constant 0 : index
    %36 = vector.load %arg2[%c0_43, %c1_44, %c0_45, %c0_46] : memref<5x2x96x84xbf16, #tpu.memory_space<vmem>>, vector<1x1x96x84xbf16>
    %37 = vector.shape_cast %36 : vector<1x1x96x84xbf16> to vector<96x84xbf16>
    %cst_47 = arith.constant dense<0.000000e+00> : vector<8x84xf32>
    %38 = tpu.matmul %35, %37, %cst_47 {dimension_numbers = #tpu.dot_dimension_numbers<[1], [0], [0], [1], [0, 0, 1, 1], [], []>} : vector<8x96xbf16>, vector<96x84xbf16>, vector<8x84xf32> -> vector<8x84xf32>
    %39 = vector.extract_strided_slice %38 {offsets = [0, 0], sizes = [7, 84], strides = [1, 1]} : vector<8x84xf32> to vector<7x84xf32>
    %c0_48 = arith.constant 0 : index
    %c1_49 = arith.constant 1 : index
    %c0_50 = arith.constant 0 : index
    %c0_51 = arith.constant 0 : index
    %40 = vector.load %arg1[%c0_48, %c1_49, %c0_50, %c0_51] : memref<1x4x8x96xbf16, #tpu.memory_space<vmem>>, vector<1x1x8x96xbf16>
    %41 = vector.shape_cast %40 : vector<1x1x8x96xbf16> to vector<8x96xbf16>
    %c1_52 = arith.constant 1 : index
    %c1_53 = arith.constant 1 : index
    %c0_54 = arith.constant 0 : index
    %c0_55 = arith.constant 0 : index
    %42 = vector.load %arg2[%c1_52, %c1_53, %c0_54, %c0_55] : memref<5x2x96x84xbf16, #tpu.memory_space<vmem>>, vector<1x1x96x84xbf16>
    %43 = vector.shape_cast %42 : vector<1x1x96x84xbf16> to vector<96x84xbf16>
    %cst_56 = arith.constant dense<0.000000e+00> : vector<8x84xf32>
    %44 = tpu.matmul %41, %43, %cst_56 {dimension_numbers = #tpu.dot_dimension_numbers<[1], [0], [0], [1], [0, 0, 1, 1], [], []>} : vector<8x96xbf16>, vector<96x84xbf16>, vector<8x84xf32> -> vector<8x84xf32>
    %45 = vector.extract_strided_slice %44 {offsets = [0, 0], sizes = [7, 84], strides = [1, 1]} : vector<8x84xf32> to vector<7x84xf32>
    %46 = arith.addf %39, %45 : vector<7x84xf32>
    %c0_57 = arith.constant 0 : index
    %c2_58 = arith.constant 2 : index
    %c0_59 = arith.constant 0 : index
    %c0_60 = arith.constant 0 : index
    %47 = vector.load %arg1[%c0_57, %c2_58, %c0_59, %c0_60] : memref<1x4x8x96xbf16, #tpu.memory_space<vmem>>, vector<1x1x8x96xbf16>
    %48 = vector.shape_cast %47 : vector<1x1x8x96xbf16> to vector<8x96xbf16>
    %c2_61 = arith.constant 2 : index
    %c1_62 = arith.constant 1 : index
    %c0_63 = arith.constant 0 : index
    %c0_64 = arith.constant 0 : index
    %49 = vector.load %arg2[%c2_61, %c1_62, %c0_63, %c0_64] : memref<5x2x96x84xbf16, #tpu.memory_space<vmem>>, vector<1x1x96x84xbf16>
    %50 = vector.shape_cast %49 : vector<1x1x96x84xbf16> to vector<96x84xbf16>
    %cst_65 = arith.constant dense<0.000000e+00> : vector<8x84xf32>
    %51 = tpu.matmul %48, %50, %cst_65 {dimension_numbers = #tpu.dot_dimension_numbers<[1], [0], [0], [1], [0, 0, 1, 1], [], []>} : vector<8x96xbf16>, vector<96x84xbf16>, vector<8x84xf32> -> vector<8x84xf32>
    %52 = vector.extract_strided_slice %51 {offsets = [0, 0], sizes = [7, 84], strides = [1, 1]} : vector<8x84xf32> to vector<7x84xf32>
    %53 = arith.addf %46, %52 : vector<7x84xf32>
    %c0_66 = arith.constant 0 : index
    %c3_67 = arith.constant 3 : index
    %c0_68 = arith.constant 0 : index
    %c0_69 = arith.constant 0 : index
    %54 = vector.load %arg1[%c0_66, %c3_67, %c0_68, %c0_69] : memref<1x4x8x96xbf16, #tpu.memory_space<vmem>>, vector<1x1x8x96xbf16>
    %55 = vector.shape_cast %54 : vector<1x1x8x96xbf16> to vector<8x96xbf16>
    %c3_70 = arith.constant 3 : index
    %c1_71 = arith.constant 1 : index
    %c0_72 = arith.constant 0 : index
    %c0_73 = arith.constant 0 : index
    %56 = vector.load %arg2[%c3_70, %c1_71, %c0_72, %c0_73] : memref<5x2x96x84xbf16, #tpu.memory_space<vmem>>, vector<1x1x96x84xbf16>
    %57 = vector.shape_cast %56 : vector<1x1x96x84xbf16> to vector<96x84xbf16>
    %cst_74 = arith.constant dense<0.000000e+00> : vector<8x84xf32>
    %58 = tpu.matmul %55, %57, %cst_74 {dimension_numbers = #tpu.dot_dimension_numbers<[1], [0], [0], [1], [0, 0, 1, 1], [], []>} : vector<8x96xbf16>, vector<96x84xbf16>, vector<8x84xf32> -> vector<8x84xf32>
    %59 = vector.extract_strided_slice %58 {offsets = [0, 0], sizes = [7, 84], strides = [1, 1]} : vector<8x84xf32> to vector<7x84xf32>
    %60 = arith.addf %53, %59 : vector<7x84xf32>
    %c0_75 = arith.constant 0 : index
    %c0_76 = arith.constant 0 : index
    %c0_77 = arith.constant 0 : index
    %c0_78 = arith.constant 0 : index
    %61 = vector.load %arg1[%c0_75, %c0_76, %c0_77, %c0_78] : memref<1x4x8x96xbf16, #tpu.memory_space<vmem>>, vector<1x1x8x96xbf16>
    %62 = vector.shape_cast %61 : vector<1x1x8x96xbf16> to vector<8x96xbf16>
    %c4_79 = arith.constant 4 : index
    %c1_80 = arith.constant 1 : index
    %c0_81 = arith.constant 0 : index
    %c0_82 = arith.constant 0 : index
    %63 = vector.load %arg2[%c4_79, %c1_80, %c0_81, %c0_82] : memref<5x2x96x84xbf16, #tpu.memory_space<vmem>>, vector<1x1x96x84xbf16>
    %64 = vector.shape_cast %63 : vector<1x1x96x84xbf16> to vector<96x84xbf16>
    %cst_83 = arith.constant dense<0.000000e+00> : vector<8x84xf32>
    %65 = tpu.matmul %62, %64, %cst_83 {dimension_numbers = #tpu.dot_dimension_numbers<[1], [0], [0], [1], [0, 0, 1, 1], [], []>} : vector<8x96xbf16>, vector<96x84xbf16>, vector<8x84xf32> -> vector<8x84xf32>
    %66 = vector.extract_strided_slice %65 {offsets = [1, 0], sizes = [7, 84], strides = [1, 1]} : vector<8x84xf32> to vector<7x84xf32>
    %67 = arith.addf %60, %66 : vector<7x84xf32>
    %c0_84 = arith.constant 0 : index
    %c1_85 = arith.constant 1 : index
    %c0_86 = arith.constant 0 : index
    %c0_87 = arith.constant 0 : index
    %68 = vector.load %arg1[%c0_84, %c1_85, %c0_86, %c0_87] : memref<1x4x8x96xbf16, #tpu.memory_space<vmem>>, vector<1x1x8x96xbf16>
    %69 = vector.shape_cast %68 : vector<1x1x8x96xbf16> to vector<8x96xbf16>
    %c0_88 = arith.constant 0 : index
    %c0_89 = arith.constant 0 : index
    %c0_90 = arith.constant 0 : index
    %c0_91 = arith.constant 0 : index
    %70 = vector.load %arg2[%c0_88, %c0_89, %c0_90, %c0_91] : memref<5x2x96x84xbf16, #tpu.memory_space<vmem>>, vector<1x1x96x84xbf16>
    %71 = vector.shape_cast %70 : vector<1x1x96x84xbf16> to vector<96x84xbf16>
    %cst_92 = arith.constant dense<0.000000e+00> : vector<8x84xf32>
    %72 = tpu.matmul %69, %71, %cst_92 {dimension_numbers = #tpu.dot_dimension_numbers<[1], [0], [0], [1], [0, 0, 1, 1], [], []>} : vector<8x96xbf16>, vector<96x84xbf16>, vector<8x84xf32> -> vector<8x84xf32>
    %73 = vector.extract_strided_slice %72 {offsets = [0, 0], sizes = [7, 84], strides = [1, 1]} : vector<8x84xf32> to vector<7x84xf32>
    %c0_93 = arith.constant 0 : index
    %c2_94 = arith.constant 2 : index
    %c0_95 = arith.constant 0 : index
    %c0_96 = arith.constant 0 : index
    %74 = vector.load %arg1[%c0_93, %c2_94, %c0_95, %c0_96] : memref<1x4x8x96xbf16, #tpu.memory_space<vmem>>, vector<1x1x8x96xbf16>
    %75 = vector.shape_cast %74 : vector<1x1x8x96xbf16> to vector<8x96xbf16>
    %c1_97 = arith.constant 1 : index
    %c0_98 = arith.constant 0 : index
    %c0_99 = arith.constant 0 : index
    %c0_100 = arith.constant 0 : index
    %76 = vector.load %arg2[%c1_97, %c0_98, %c0_99, %c0_100] : memref<5x2x96x84xbf16, #tpu.memory_space<vmem>>, vector<1x1x96x84xbf16>
    %77 = vector.shape_cast %76 : vector<1x1x96x84xbf16> to vector<96x84xbf16>
    %cst_101 = arith.constant dense<0.000000e+00> : vector<8x84xf32>
    %78 = tpu.matmul %75, %77, %cst_101 {dimension_numbers = #tpu.dot_dimension_numbers<[1], [0], [0], [1], [0, 0, 1, 1], [], []>} : vector<8x96xbf16>, vector<96x84xbf16>, vector<8x84xf32> -> vector<8x84xf32>
    %79 = vector.extract_strided_slice %78 {offsets = [0, 0], sizes = [7, 84], strides = [1, 1]} : vector<8x84xf32> to vector<7x84xf32>
    %80 = arith.addf %73, %79 : vector<7x84xf32>
    %c0_102 = arith.constant 0 : index
    %c3_103 = arith.constant 3 : index
    %c0_104 = arith.constant 0 : index
    %c0_105 = arith.constant 0 : index
    %81 = vector.load %arg1[%c0_102, %c3_103, %c0_104, %c0_105] : memref<1x4x8x96xbf16, #tpu.memory_space<vmem>>, vector<1x1x8x96xbf16>
    %82 = vector.shape_cast %81 : vector<1x1x8x96xbf16> to vector<8x96xbf16>
    %c2_106 = arith.constant 2 : index
    %c0_107 = arith.constant 0 : index
    %c0_108 = arith.constant 0 : index
    %c0_109 = arith.constant 0 : index
    %83 = vector.load %arg2[%c2_106, %c0_107, %c0_108, %c0_109] : memref<5x2x96x84xbf16, #tpu.memory_space<vmem>>, vector<1x1x96x84xbf16>
    %84 = vector.shape_cast %83 : vector<1x1x96x84xbf16> to vector<96x84xbf16>
    %cst_110 = arith.constant dense<0.000000e+00> : vector<8x84xf32>
    %85 = tpu.matmul %82, %84, %cst_110 {dimension_numbers = #tpu.dot_dimension_numbers<[1], [0], [0], [1], [0, 0, 1, 1], [], []>} : vector<8x96xbf16>, vector<96x84xbf16>, vector<8x84xf32> -> vector<8x84xf32>
    %86 = vector.extract_strided_slice %85 {offsets = [0, 0], sizes = [7, 84], strides = [1, 1]} : vector<8x84xf32> to vector<7x84xf32>
    %87 = arith.addf %80, %86 : vector<7x84xf32>
    %c0_111 = arith.constant 0 : index
    %c0_112 = arith.constant 0 : index
    %c0_113 = arith.constant 0 : index
    %c0_114 = arith.constant 0 : index
    %88 = vector.load %arg1[%c0_111, %c0_112, %c0_113, %c0_114] : memref<1x4x8x96xbf16, #tpu.memory_space<vmem>>, vector<1x1x8x96xbf16>
    %89 = vector.shape_cast %88 : vector<1x1x8x96xbf16> to vector<8x96xbf16>
    %c3_115 = arith.constant 3 : index
    %c0_116 = arith.constant 0 : index
    %c0_117 = arith.constant 0 : index
    %c0_118 = arith.constant 0 : index
    %90 = vector.load %arg2[%c3_115, %c0_116, %c0_117, %c0_118] : memref<5x2x96x84xbf16, #tpu.memory_space<vmem>>, vector<1x1x96x84xbf16>
    %91 = vector.shape_cast %90 : vector<1x1x96x84xbf16> to vector<96x84xbf16>
    %cst_119 = arith.constant dense<0.000000e+00> : vector<8x84xf32>
    %92 = tpu.matmul %89, %91, %cst_119 {dimension_numbers = #tpu.dot_dimension_numbers<[1], [0], [0], [1], [0, 0, 1, 1], [], []>} : vector<8x96xbf16>, vector<96x84xbf16>, vector<8x84xf32> -> vector<8x84xf32>
    %93 = vector.extract_strided_slice %92 {offsets = [1, 0], sizes = [7, 84], strides = [1, 1]} : vector<8x84xf32> to vector<7x84xf32>
    %94 = arith.addf %87, %93 : vector<7x84xf32>
    %c0_120 = arith.constant 0 : index
    %c1_121 = arith.constant 1 : index
    %c0_122 = arith.constant 0 : index
    %c0_123 = arith.constant 0 : index
    %95 = vector.load %arg1[%c0_120, %c1_121, %c0_122, %c0_123] : memref<1x4x8x96xbf16, #tpu.memory_space<vmem>>, vector<1x1x8x96xbf16>
    %96 = vector.shape_cast %95 : vector<1x1x8x96xbf16> to vector<8x96xbf16>
    %c4_124 = arith.constant 4 : index
    %c0_125 = arith.constant 0 : index
    %c0_126 = arith.constant 0 : index
    %c0_127 = arith.constant 0 : index
    %97 = vector.load %arg2[%c4_124, %c0_125, %c0_126, %c0_127] : memref<5x2x96x84xbf16, #tpu.memory_space<vmem>>, vector<1x1x96x84xbf16>
    %98 = vector.shape_cast %97 : vector<1x1x96x84xbf16> to vector<96x84xbf16>
    %cst_128 = arith.constant dense<0.000000e+00> : vector<8x84xf32>
    %99 = tpu.matmul %96, %98, %cst_128 {dimension_numbers = #tpu.dot_dimension_numbers<[1], [0], [0], [1], [0, 0, 1, 1], [], []>} : vector<8x96xbf16>, vector<96x84xbf16>, vector<8x84xf32> -> vector<8x84xf32>
    %100 = vector.extract_strided_slice %99 {offsets = [1, 0], sizes = [7, 84], strides = [1, 1]} : vector<8x84xf32> to vector<7x84xf32>
    %101 = arith.addf %94, %100 : vector<7x84xf32>
    %c0_129 = arith.constant 0 : index
    %c1_130 = arith.constant 1 : index
    %c0_131 = arith.constant 0 : index
    %c0_132 = arith.constant 0 : index
    %102 = vector.load %arg1[%c0_129, %c1_130, %c0_131, %c0_132] : memref<1x4x8x96xbf16, #tpu.memory_space<vmem>>, vector<1x1x8x96xbf16>
    %103 = vector.shape_cast %102 : vector<1x1x8x96xbf16> to vector<8x96xbf16>
    %c0_133 = arith.constant 0 : index
    %c1_134 = arith.constant 1 : index
    %c0_135 = arith.constant 0 : index
    %c0_136 = arith.constant 0 : index
    %104 = vector.load %arg2[%c0_133, %c1_134, %c0_135, %c0_136] : memref<5x2x96x84xbf16, #tpu.memory_space<vmem>>, vector<1x1x96x84xbf16>
    %105 = vector.shape_cast %104 : vector<1x1x96x84xbf16> to vector<96x84xbf16>
    %cst_137 = arith.constant dense<0.000000e+00> : vector<8x84xf32>
    %106 = tpu.matmul %103, %105, %cst_137 {dimension_numbers = #tpu.dot_dimension_numbers<[1], [0], [0], [1], [0, 0, 1, 1], [], []>} : vector<8x96xbf16>, vector<96x84xbf16>, vector<8x84xf32> -> vector<8x84xf32>
    %107 = vector.extract_strided_slice %106 {offsets = [0, 0], sizes = [7, 84], strides = [1, 1]} : vector<8x84xf32> to vector<7x84xf32>
    %c0_138 = arith.constant 0 : index
    %c2_139 = arith.constant 2 : index
    %c0_140 = arith.constant 0 : index
    %c0_141 = arith.constant 0 : index
    %108 = vector.load %arg1[%c0_138, %c2_139, %c0_140, %c0_141] : memref<1x4x8x96xbf16, #tpu.memory_space<vmem>>, vector<1x1x8x96xbf16>
    %109 = vector.shape_cast %108 : vector<1x1x8x96xbf16> to vector<8x96xbf16>
    %c1_142 = arith.constant 1 : index
    %c1_143 = arith.constant 1 : index
    %c0_144 = arith.constant 0 : index
    %c0_145 = arith.constant 0 : index
    %110 = vector.load %arg2[%c1_142, %c1_143, %c0_144, %c0_145] : memref<5x2x96x84xbf16, #tpu.memory_space<vmem>>, vector<1x1x96x84xbf16>
    %111 = vector.shape_cast %110 : vector<1x1x96x84xbf16> to vector<96x84xbf16>
    %cst_146 = arith.constant dense<0.000000e+00> : vector<8x84xf32>
    %112 = tpu.matmul %109, %111, %cst_146 {dimension_numbers = #tpu.dot_dimension_numbers<[1], [0], [0], [1], [0, 0, 1, 1], [], []>} : vector<8x96xbf16>, vector<96x84xbf16>, vector<8x84xf32> -> vector<8x84xf32>
    %113 = vector.extract_strided_slice %112 {offsets = [0, 0], sizes = [7, 84], strides = [1, 1]} : vector<8x84xf32> to vector<7x84xf32>
    %114 = arith.addf %107, %113 : vector<7x84xf32>
    %c0_147 = arith.constant 0 : index
    %c3_148 = arith.constant 3 : index
    %c0_149 = arith.constant 0 : index
    %c0_150 = arith.constant 0 : index
    %115 = vector.load %arg1[%c0_147, %c3_148, %c0_149, %c0_150] : memref<1x4x8x96xbf16, #tpu.memory_space<vmem>>, vector<1x1x8x96xbf16>
    %116 = vector.shape_cast %115 : vector<1x1x8x96xbf16> to vector<8x96xbf16>
    %c2_151 = arith.constant 2 : index
    %c1_152 = arith.constant 1 : index
    %c0_153 = arith.constant 0 : index
    %c0_154 = arith.constant 0 : index
    %117 = vector.load %arg2[%c2_151, %c1_152, %c0_153, %c0_154] : memref<5x2x96x84xbf16, #tpu.memory_space<vmem>>, vector<1x1x96x84xbf16>
    %118 = vector.shape_cast %117 : vector<1x1x96x84xbf16> to vector<96x84xbf16>
    %cst_155 = arith.constant dense<0.000000e+00> : vector<8x84xf32>
    %119 = tpu.matmul %116, %118, %cst_155 {dimension_numbers = #tpu.dot_dimension_numbers<[1], [0], [0], [1], [0, 0, 1, 1], [], []>} : vector<8x96xbf16>, vector<96x84xbf16>, vector<8x84xf32> -> vector<8x84xf32>
    %120 = vector.extract_strided_slice %119 {offsets = [0, 0], sizes = [7, 84], strides = [1, 1]} : vector<8x84xf32> to vector<7x84xf32>
    %121 = arith.addf %114, %120 : vector<7x84xf32>
    %c0_156 = arith.constant 0 : index
    %c0_157 = arith.constant 0 : index
    %c0_158 = arith.constant 0 : index
    %c0_159 = arith.constant 0 : index
    %122 = vector.load %arg1[%c0_156, %c0_157, %c0_158, %c0_159] : memref<1x4x8x96xbf16, #tpu.memory_space<vmem>>, vector<1x1x8x96xbf16>
    %123 = vector.shape_cast %122 : vector<1x1x8x96xbf16> to vector<8x96xbf16>
    %c3_160 = arith.constant 3 : index
    %c1_161 = arith.constant 1 : index
    %c0_162 = arith.constant 0 : index
    %c0_163 = arith.constant 0 : index
    %124 = vector.load %arg2[%c3_160, %c1_161, %c0_162, %c0_163] : memref<5x2x96x84xbf16, #tpu.memory_space<vmem>>, vector<1x1x96x84xbf16>
    %125 = vector.shape_cast %124 : vector<1x1x96x84xbf16> to vector<96x84xbf16>
    %cst_164 = arith.constant dense<0.000000e+00> : vector<8x84xf32>
    %126 = tpu.matmul %123, %125, %cst_164 {dimension_numbers = #tpu.dot_dimension_numbers<[1], [0], [0], [1], [0, 0, 1, 1], [], []>} : vector<8x96xbf16>, vector<96x84xbf16>, vector<8x84xf32> -> vector<8x84xf32>
    %127 = vector.extract_strided_slice %126 {offsets = [1, 0], sizes = [7, 84], strides = [1, 1]} : vector<8x84xf32> to vector<7x84xf32>
    %128 = arith.addf %121, %127 : vector<7x84xf32>
    %c0_165 = arith.constant 0 : index
    %c1_166 = arith.constant 1 : index
    %c0_167 = arith.constant 0 : index
    %c0_168 = arith.constant 0 : index
    %129 = vector.load %arg1[%c0_165, %c1_166, %c0_167, %c0_168] : memref<1x4x8x96xbf16, #tpu.memory_space<vmem>>, vector<1x1x8x96xbf16>
    %130 = vector.shape_cast %129 : vector<1x1x8x96xbf16> to vector<8x96xbf16>
    %c4_169 = arith.constant 4 : index
    %c1_170 = arith.constant 1 : index
    %c0_171 = arith.constant 0 : index
    %c0_172 = arith.constant 0 : index
    %131 = vector.load %arg2[%c4_169, %c1_170, %c0_171, %c0_172] : memref<5x2x96x84xbf16, #tpu.memory_space<vmem>>, vector<1x1x96x84xbf16>
    %132 = vector.shape_cast %131 : vector<1x1x96x84xbf16> to vector<96x84xbf16>
    %cst_173 = arith.constant dense<0.000000e+00> : vector<8x84xf32>
    %133 = tpu.matmul %130, %132, %cst_173 {dimension_numbers = #tpu.dot_dimension_numbers<[1], [0], [0], [1], [0, 0, 1, 1], [], []>} : vector<8x96xbf16>, vector<96x84xbf16>, vector<8x84xf32> -> vector<8x84xf32>
    %134 = vector.extract_strided_slice %133 {offsets = [1, 0], sizes = [7, 84], strides = [1, 1]} : vector<8x84xf32> to vector<7x84xf32>
    %135 = arith.addf %128, %134 : vector<7x84xf32>
    %136 = arith.maximumf %33, %67 : vector<7x84xf32>
    %137 = arith.maximumf %101, %135 : vector<7x84xf32>
    %138 = arith.maximumf %136, %137 : vector<7x84xf32>
    %c0_174 = arith.constant 0 : index
    %c0_175 = arith.constant 0 : index
    %139 = vector.load %arg7[%c0_174, %c0_175] : memref<1x84xf32, #tpu.memory_space<vmem>>, vector<1x84xf32>
    %140 = vector.broadcast %139 : vector<1x84xf32> to vector<7x84xf32>
    %141 = arith.addf %138, %140 : vector<7x84xf32>
    %cst_176 = arith.constant 0.000000e+00 : f32
    %142 = vector.broadcast %cst_176 : f32 to vector<7x84xf32>
    %143 = arith.maximumf %141, %142 : vector<7x84xf32>
    %c0_177 = arith.constant 0 : index
    %c2_178 = arith.constant 2 : index
    %c0_179 = arith.constant 0 : index
    %c0_180 = arith.constant 0 : index
    %144 = vector.load %arg1[%c0_177, %c2_178, %c0_179, %c0_180] : memref<1x4x8x96xbf16, #tpu.memory_space<vmem>>, vector<1x1x8x96xbf16>
    %145 = vector.shape_cast %144 : vector<1x1x8x96xbf16> to vector<8x96xbf16>
    %c0_181 = arith.constant 0 : index
    %c0_182 = arith.constant 0 : index
    %c0_183 = arith.constant 0 : index
    %c0_184 = arith.constant 0 : index
    %146 = vector.load %arg2[%c0_181, %c0_182, %c0_183, %c0_184] : memref<5x2x96x84xbf16, #tpu.memory_space<vmem>>, vector<1x1x96x84xbf16>
    %147 = vector.shape_cast %146 : vector<1x1x96x84xbf16> to vector<96x84xbf16>
    %cst_185 = arith.constant dense<0.000000e+00> : vector<8x84xf32>
    %148 = tpu.matmul %145, %147, %cst_185 {dimension_numbers = #tpu.dot_dimension_numbers<[1], [0], [0], [1], [0, 0, 1, 1], [], []>} : vector<8x96xbf16>, vector<96x84xbf16>, vector<8x84xf32> -> vector<8x84xf32>
    %149 = vector.extract_strided_slice %148 {offsets = [0, 0], sizes = [7, 84], strides = [1, 1]} : vector<8x84xf32> to vector<7x84xf32>
    %c0_186 = arith.constant 0 : index
    %c3_187 = arith.constant 3 : index
    %c0_188 = arith.constant 0 : index
    %c0_189 = arith.constant 0 : index
    %150 = vector.load %arg1[%c0_186, %c3_187, %c0_188, %c0_189] : memref<1x4x8x96xbf16, #tpu.memory_space<vmem>>, vector<1x1x8x96xbf16>
    %151 = vector.shape_cast %150 : vector<1x1x8x96xbf16> to vector<8x96xbf16>
    %c1_190 = arith.constant 1 : index
    %c0_191 = arith.constant 0 : index
    %c0_192 = arith.constant 0 : index
    %c0_193 = arith.constant 0 : index
    %152 = vector.load %arg2[%c1_190, %c0_191, %c0_192, %c0_193] : memref<5x2x96x84xbf16, #tpu.memory_space<vmem>>, vector<1x1x96x84xbf16>
    %153 = vector.shape_cast %152 : vector<1x1x96x84xbf16> to vector<96x84xbf16>
    %cst_194 = arith.constant dense<0.000000e+00> : vector<8x84xf32>
    %154 = tpu.matmul %151, %153, %cst_194 {dimension_numbers = #tpu.dot_dimension_numbers<[1], [0], [0], [1], [0, 0, 1, 1], [], []>} : vector<8x96xbf16>, vector<96x84xbf16>, vector<8x84xf32> -> vector<8x84xf32>
    %155 = vector.extract_strided_slice %154 {offsets = [0, 0], sizes = [7, 84], strides = [1, 1]} : vector<8x84xf32> to vector<7x84xf32>
    %156 = arith.addf %149, %155 : vector<7x84xf32>
    %c0_195 = arith.constant 0 : index
    %c0_196 = arith.constant 0 : index
    %c0_197 = arith.constant 0 : index
    %c0_198 = arith.constant 0 : index
    %157 = vector.load %arg1[%c0_195, %c0_196, %c0_197, %c0_198] : memref<1x4x8x96xbf16, #tpu.memory_space<vmem>>, vector<1x1x8x96xbf16>
    %158 = vector.shape_cast %157 : vector<1x1x8x96xbf16> to vector<8x96xbf16>
    %c2_199 = arith.constant 2 : index
    %c0_200 = arith.constant 0 : index
    %c0_201 = arith.constant 0 : index
    %c0_202 = arith.constant 0 : index
    %159 = vector.load %arg2[%c2_199, %c0_200, %c0_201, %c0_202] : memref<5x2x96x84xbf16, #tpu.memory_space<vmem>>, vector<1x1x96x84xbf16>
    %160 = vector.shape_cast %159 : vector<1x1x96x84xbf16> to vector<96x84xbf16>
    %cst_203 = arith.constant dense<0.000000e+00> : vector<8x84xf32>
    %161 = tpu.matmul %158, %160, %cst_203 {dimension_numbers = #tpu.dot_dimension_numbers<[1], [0], [0], [1], [0, 0, 1, 1], [], []>} : vector<8x96xbf16>, vector<96x84xbf16>, vector<8x84xf32> -> vector<8x84xf32>
    %162 = vector.extract_strided_slice %161 {offsets = [1, 0], sizes = [7, 84], strides = [1, 1]} : vector<8x84xf32> to vector<7x84xf32>
    %163 = arith.addf %156, %162 : vector<7x84xf32>
    %c0_204 = arith.constant 0 : index
    %c1_205 = arith.constant 1 : index
    %c0_206 = arith.constant 0 : index
    %c0_207 = arith.constant 0 : index
    %164 = vector.load %arg1[%c0_204, %c1_205, %c0_206, %c0_207] : memref<1x4x8x96xbf16, #tpu.memory_space<vmem>>, vector<1x1x8x96xbf16>
    %165 = vector.shape_cast %164 : vector<1x1x8x96xbf16> to vector<8x96xbf16>
    %c3_208 = arith.constant 3 : index
    %c0_209 = arith.constant 0 : index
    %c0_210 = arith.constant 0 : index
    %c0_211 = arith.constant 0 : index
    %166 = vector.load %arg2[%c3_208, %c0_209, %c0_210, %c0_211] : memref<5x2x96x84xbf16, #tpu.memory_space<vmem>>, vector<1x1x96x84xbf16>
    %167 = vector.shape_cast %166 : vector<1x1x96x84xbf16> to vector<96x84xbf16>
    %cst_212 = arith.constant dense<0.000000e+00> : vector<8x84xf32>
    %168 = tpu.matmul %165, %167, %cst_212 {dimension_numbers = #tpu.dot_dimension_numbers<[1], [0], [0], [1], [0, 0, 1, 1], [], []>} : vector<8x96xbf16>, vector<96x84xbf16>, vector<8x84xf32> -> vector<8x84xf32>
    %169 = vector.extract_strided_slice %168 {offsets = [1, 0], sizes = [7, 84], strides = [1, 1]} : vector<8x84xf32> to vector<7x84xf32>
    %170 = arith.addf %163, %169 : vector<7x84xf32>
    %c0_213 = arith.constant 0 : index
    %c2_214 = arith.constant 2 : index
    %c0_215 = arith.constant 0 : index
    %c0_216 = arith.constant 0 : index
    %171 = vector.load %arg1[%c0_213, %c2_214, %c0_215, %c0_216] : memref<1x4x8x96xbf16, #tpu.memory_space<vmem>>, vector<1x1x8x96xbf16>
    %172 = vector.shape_cast %171 : vector<1x1x8x96xbf16> to vector<8x96xbf16>
    %c4_217 = arith.constant 4 : index
    %c0_218 = arith.constant 0 : index
    %c0_219 = arith.constant 0 : index
    %c0_220 = arith.constant 0 : index
    %173 = vector.load %arg2[%c4_217, %c0_218, %c0_219, %c0_220] : memref<5x2x96x84xbf16, #tpu.memory_space<vmem>>, vector<1x1x96x84xbf16>
    %174 = vector.shape_cast %173 : vector<1x1x96x84xbf16> to vector<96x84xbf16>
    %cst_221 = arith.constant dense<0.000000e+00> : vector<8x84xf32>
    %175 = tpu.matmul %172, %174, %cst_221 {dimension_numbers = #tpu.dot_dimension_numbers<[1], [0], [0], [1], [0, 0, 1, 1], [], []>} : vector<8x96xbf16>, vector<96x84xbf16>, vector<8x84xf32> -> vector<8x84xf32>
    %176 = vector.extract_strided_slice %175 {offsets = [1, 0], sizes = [7, 84], strides = [1, 1]} : vector<8x84xf32> to vector<7x84xf32>
    %177 = arith.addf %170, %176 : vector<7x84xf32>
    %c0_222 = arith.constant 0 : index
    %c2_223 = arith.constant 2 : index
    %c0_224 = arith.constant 0 : index
    %c0_225 = arith.constant 0 : index
    %178 = vector.load %arg1[%c0_222, %c2_223, %c0_224, %c0_225] : memref<1x4x8x96xbf16, #tpu.memory_space<vmem>>, vector<1x1x8x96xbf16>
    %179 = vector.shape_cast %178 : vector<1x1x8x96xbf16> to vector<8x96xbf16>
    %c0_226 = arith.constant 0 : index
    %c1_227 = arith.constant 1 : index
    %c0_228 = arith.constant 0 : index
    %c0_229 = arith.constant 0 : index
    %180 = vector.load %arg2[%c0_226, %c1_227, %c0_228, %c0_229] : memref<5x2x96x84xbf16, #tpu.memory_space<vmem>>, vector<1x1x96x84xbf16>
    %181 = vector.shape_cast %180 : vector<1x1x96x84xbf16> to vector<96x84xbf16>
    %cst_230 = arith.constant dense<0.000000e+00> : vector<8x84xf32>
    %182 = tpu.matmul %179, %181, %cst_230 {dimension_numbers = #tpu.dot_dimension_numbers<[1], [0], [0], [1], [0, 0, 1, 1], [], []>} : vector<8x96xbf16>, vector<96x84xbf16>, vector<8x84xf32> -> vector<8x84xf32>
    %183 = vector.extract_strided_slice %182 {offsets = [0, 0], sizes = [7, 84], strides = [1, 1]} : vector<8x84xf32> to vector<7x84xf32>
    %c0_231 = arith.constant 0 : index
    %c3_232 = arith.constant 3 : index
    %c0_233 = arith.constant 0 : index
    %c0_234 = arith.constant 0 : index
    %184 = vector.load %arg1[%c0_231, %c3_232, %c0_233, %c0_234] : memref<1x4x8x96xbf16, #tpu.memory_space<vmem>>, vector<1x1x8x96xbf16>
    %185 = vector.shape_cast %184 : vector<1x1x8x96xbf16> to vector<8x96xbf16>
    %c1_235 = arith.constant 1 : index
    %c1_236 = arith.constant 1 : index
    %c0_237 = arith.constant 0 : index
    %c0_238 = arith.constant 0 : index
    %186 = vector.load %arg2[%c1_235, %c1_236, %c0_237, %c0_238] : memref<5x2x96x84xbf16, #tpu.memory_space<vmem>>, vector<1x1x96x84xbf16>
    %187 = vector.shape_cast %186 : vector<1x1x96x84xbf16> to vector<96x84xbf16>
    %cst_239 = arith.constant dense<0.000000e+00> : vector<8x84xf32>
    %188 = tpu.matmul %185, %187, %cst_239 {dimension_numbers = #tpu.dot_dimension_numbers<[1], [0], [0], [1], [0, 0, 1, 1], [], []>} : vector<8x96xbf16>, vector<96x84xbf16>, vector<8x84xf32> -> vector<8x84xf32>
    %189 = vector.extract_strided_slice %188 {offsets = [0, 0], sizes = [7, 84], strides = [1, 1]} : vector<8x84xf32> to vector<7x84xf32>
    %190 = arith.addf %183, %189 : vector<7x84xf32>
    %c0_240 = arith.constant 0 : index
    %c0_241 = arith.constant 0 : index
    %c0_242 = arith.constant 0 : index
    %c0_243 = arith.constant 0 : index
    %191 = vector.load %arg1[%c0_240, %c0_241, %c0_242, %c0_243] : memref<1x4x8x96xbf16, #tpu.memory_space<vmem>>, vector<1x1x8x96xbf16>
    %192 = vector.shape_cast %191 : vector<1x1x8x96xbf16> to vector<8x96xbf16>
    %c2_244 = arith.constant 2 : index
    %c1_245 = arith.constant 1 : index
    %c0_246 = arith.constant 0 : index
    %c0_247 = arith.constant 0 : index
    %193 = vector.load %arg2[%c2_244, %c1_245, %c0_246, %c0_247] : memref<5x2x96x84xbf16, #tpu.memory_space<vmem>>, vector<1x1x96x84xbf16>
    %194 = vector.shape_cast %193 : vector<1x1x96x84xbf16> to vector<96x84xbf16>
    %cst_248 = arith.constant dense<0.000000e+00> : vector<8x84xf32>
    %195 = tpu.matmul %192, %194, %cst_248 {dimension_numbers = #tpu.dot_dimension_numbers<[1], [0], [0], [1], [0, 0, 1, 1], [], []>} : vector<8x96xbf16>, vector<96x84xbf16>, vector<8x84xf32> -> vector<8x84xf32>
    %196 = vector.extract_strided_slice %195 {offsets = [1, 0], sizes = [7, 84], strides = [1, 1]} : vector<8x84xf32> to vector<7x84xf32>
    %197 = arith.addf %190, %196 : vector<7x84xf32>
    %c0_249 = arith.constant 0 : index
    %c1_250 = arith.constant 1 : index
    %c0_251 = arith.constant 0 : index
    %c0_252 = arith.constant 0 : index
    %198 = vector.load %arg1[%c0_249, %c1_250, %c0_251, %c0_252] : memref<1x4x8x96xbf16, #tpu.memory_space<vmem>>, vector<1x1x8x96xbf16>
    %199 = vector.shape_cast %198 : vector<1x1x8x96xbf16> to vector<8x96xbf16>
    %c3_253 = arith.constant 3 : index
    %c1_254 = arith.constant 1 : index
    %c0_255 = arith.constant 0 : index
    %c0_256 = arith.constant 0 : index
    %200 = vector.load %arg2[%c3_253, %c1_254, %c0_255, %c0_256] : memref<5x2x96x84xbf16, #tpu.memory_space<vmem>>, vector<1x1x96x84xbf16>
    %201 = vector.shape_cast %200 : vector<1x1x96x84xbf16> to vector<96x84xbf16>
    %cst_257 = arith.constant dense<0.000000e+00> : vector<8x84xf32>
    %202 = tpu.matmul %199, %201, %cst_257 {dimension_numbers = #tpu.dot_dimension_numbers<[1], [0], [0], [1], [0, 0, 1, 1], [], []>} : vector<8x96xbf16>, vector<96x84xbf16>, vector<8x84xf32> -> vector<8x84xf32>
    %203 = vector.extract_strided_slice %202 {offsets = [1, 0], sizes = [7, 84], strides = [1, 1]} : vector<8x84xf32> to vector<7x84xf32>
    %204 = arith.addf %197, %203 : vector<7x84xf32>
    %c0_258 = arith.constant 0 : index
    %c2_259 = arith.constant 2 : index
    %c0_260 = arith.constant 0 : index
    %c0_261 = arith.constant 0 : index
    %205 = vector.load %arg1[%c0_258, %c2_259, %c0_260, %c0_261] : memref<1x4x8x96xbf16, #tpu.memory_space<vmem>>, vector<1x1x8x96xbf16>
    %206 = vector.shape_cast %205 : vector<1x1x8x96xbf16> to vector<8x96xbf16>
    %c4_262 = arith.constant 4 : index
    %c1_263 = arith.constant 1 : index
    %c0_264 = arith.constant 0 : index
    %c0_265 = arith.constant 0 : index
    %207 = vector.load %arg2[%c4_262, %c1_263, %c0_264, %c0_265] : memref<5x2x96x84xbf16, #tpu.memory_space<vmem>>, vector<1x1x96x84xbf16>
    %208 = vector.shape_cast %207 : vector<1x1x96x84xbf16> to vector<96x84xbf16>
    %cst_266 = arith.constant dense<0.000000e+00> : vector<8x84xf32>
    %209 = tpu.matmul %206, %208, %cst_266 {dimension_numbers = #tpu.dot_dimension_numbers<[1], [0], [0], [1], [0, 0, 1, 1], [], []>} : vector<8x96xbf16>, vector<96x84xbf16>, vector<8x84xf32> -> vector<8x84xf32>
    %210 = vector.extract_strided_slice %209 {offsets = [1, 0], sizes = [7, 84], strides = [1, 1]} : vector<8x84xf32> to vector<7x84xf32>
    %211 = arith.addf %204, %210 : vector<7x84xf32>
    %c0_267 = arith.constant 0 : index
    %c3_268 = arith.constant 3 : index
    %c0_269 = arith.constant 0 : index
    %c0_270 = arith.constant 0 : index
    %212 = vector.load %arg1[%c0_267, %c3_268, %c0_269, %c0_270] : memref<1x4x8x96xbf16, #tpu.memory_space<vmem>>, vector<1x1x8x96xbf16>
    %213 = vector.shape_cast %212 : vector<1x1x8x96xbf16> to vector<8x96xbf16>
    %c0_271 = arith.constant 0 : index
    %c0_272 = arith.constant 0 : index
    %c0_273 = arith.constant 0 : index
    %c0_274 = arith.constant 0 : index
    %214 = vector.load %arg2[%c0_271, %c0_272, %c0_273, %c0_274] : memref<5x2x96x84xbf16, #tpu.memory_space<vmem>>, vector<1x1x96x84xbf16>
    %215 = vector.shape_cast %214 : vector<1x1x96x84xbf16> to vector<96x84xbf16>
    %cst_275 = arith.constant dense<0.000000e+00> : vector<8x84xf32>
    %216 = tpu.matmul %213, %215, %cst_275 {dimension_numbers = #tpu.dot_dimension_numbers<[1], [0], [0], [1], [0, 0, 1, 1], [], []>} : vector<8x96xbf16>, vector<96x84xbf16>, vector<8x84xf32> -> vector<8x84xf32>
    %217 = vector.extract_strided_slice %216 {offsets = [0, 0], sizes = [7, 84], strides = [1, 1]} : vector<8x84xf32> to vector<7x84xf32>
    %c0_276 = arith.constant 0 : index
    %c0_277 = arith.constant 0 : index
    %c0_278 = arith.constant 0 : index
    %c0_279 = arith.constant 0 : index
    %218 = vector.load %arg1[%c0_276, %c0_277, %c0_278, %c0_279] : memref<1x4x8x96xbf16, #tpu.memory_space<vmem>>, vector<1x1x8x96xbf16>
    %219 = vector.shape_cast %218 : vector<1x1x8x96xbf16> to vector<8x96xbf16>
    %c1_280 = arith.constant 1 : index
    %c0_281 = arith.constant 0 : index
    %c0_282 = arith.constant 0 : index
    %c0_283 = arith.constant 0 : index
    %220 = vector.load %arg2[%c1_280, %c0_281, %c0_282, %c0_283] : memref<5x2x96x84xbf16, #tpu.memory_space<vmem>>, vector<1x1x96x84xbf16>
    %221 = vector.shape_cast %220 : vector<1x1x96x84xbf16> to vector<96x84xbf16>
    %cst_284 = arith.constant dense<0.000000e+00> : vector<8x84xf32>
    %222 = tpu.matmul %219, %221, %cst_284 {dimension_numbers = #tpu.dot_dimension_numbers<[1], [0], [0], [1], [0, 0, 1, 1], [], []>} : vector<8x96xbf16>, vector<96x84xbf16>, vector<8x84xf32> -> vector<8x84xf32>
    %223 = vector.extract_strided_slice %222 {offsets = [1, 0], sizes = [7, 84], strides = [1, 1]} : vector<8x84xf32> to vector<7x84xf32>
    %224 = arith.addf %217, %223 : vector<7x84xf32>
    %c0_285 = arith.constant 0 : index
    %c1_286 = arith.constant 1 : index
    %c0_287 = arith.constant 0 : index
    %c0_288 = arith.constant 0 : index
    %225 = vector.load %arg1[%c0_285, %c1_286, %c0_287, %c0_288] : memref<1x4x8x96xbf16, #tpu.memory_space<vmem>>, vector<1x1x8x96xbf16>
    %226 = vector.shape_cast %225 : vector<1x1x8x96xbf16> to vector<8x96xbf16>
    %c2_289 = arith.constant 2 : index
    %c0_290 = arith.constant 0 : index
    %c0_291 = arith.constant 0 : index
    %c0_292 = arith.constant 0 : index
    %227 = vector.load %arg2[%c2_289, %c0_290, %c0_291, %c0_292] : memref<5x2x96x84xbf16, #tpu.memory_space<vmem>>, vector<1x1x96x84xbf16>
    %228 = vector.shape_cast %227 : vector<1x1x96x84xbf16> to vector<96x84xbf16>
    %cst_293 = arith.constant dense<0.000000e+00> : vector<8x84xf32>
    %229 = tpu.matmul %226, %228, %cst_293 {dimension_numbers = #tpu.dot_dimension_numbers<[1], [0], [0], [1], [0, 0, 1, 1], [], []>} : vector<8x96xbf16>, vector<96x84xbf16>, vector<8x84xf32> -> vector<8x84xf32>
    %230 = vector.extract_strided_slice %229 {offsets = [1, 0], sizes = [7, 84], strides = [1, 1]} : vector<8x84xf32> to vector<7x84xf32>
    %231 = arith.addf %224, %230 : vector<7x84xf32>
    %c0_294 = arith.constant 0 : index
    %c2_295 = arith.constant 2 : index
    %c0_296 = arith.constant 0 : index
    %c0_297 = arith.constant 0 : index
    %232 = vector.load %arg1[%c0_294, %c2_295, %c0_296, %c0_297] : memref<1x4x8x96xbf16, #tpu.memory_space<vmem>>, vector<1x1x8x96xbf16>
    %233 = vector.shape_cast %232 : vector<1x1x8x96xbf16> to vector<8x96xbf16>
    %c3_298 = arith.constant 3 : index
    %c0_299 = arith.constant 0 : index
    %c0_300 = arith.constant 0 : index
    %c0_301 = arith.constant 0 : index
    %234 = vector.load %arg2[%c3_298, %c0_299, %c0_300, %c0_301] : memref<5x2x96x84xbf16, #tpu.memory_space<vmem>>, vector<1x1x96x84xbf16>
    %235 = vector.shape_cast %234 : vector<1x1x96x84xbf16> to vector<96x84xbf16>
    %cst_302 = arith.constant dense<0.000000e+00> : vector<8x84xf32>
    %236 = tpu.matmul %233, %235, %cst_302 {dimension_numbers = #tpu.dot_dimension_numbers<[1], [0], [0], [1], [0, 0, 1, 1], [], []>} : vector<8x96xbf16>, vector<96x84xbf16>, vector<8x84xf32> -> vector<8x84xf32>
    %237 = vector.extract_strided_slice %236 {offsets = [1, 0], sizes = [7, 84], strides = [1, 1]} : vector<8x84xf32> to vector<7x84xf32>
    %238 = arith.addf %231, %237 : vector<7x84xf32>
    %c0_303 = arith.constant 0 : index
    %c3_304 = arith.constant 3 : index
    %c0_305 = arith.constant 0 : index
    %c0_306 = arith.constant 0 : index
    %239 = vector.load %arg1[%c0_303, %c3_304, %c0_305, %c0_306] : memref<1x4x8x96xbf16, #tpu.memory_space<vmem>>, vector<1x1x8x96xbf16>
    %240 = vector.shape_cast %239 : vector<1x1x8x96xbf16> to vector<8x96xbf16>
    %c4_307 = arith.constant 4 : index
    %c0_308 = arith.constant 0 : index
    %c0_309 = arith.constant 0 : index
    %c0_310 = arith.constant 0 : index
    %241 = vector.load %arg2[%c4_307, %c0_308, %c0_309, %c0_310] : memref<5x2x96x84xbf16, #tpu.memory_space<vmem>>, vector<1x1x96x84xbf16>
    %242 = vector.shape_cast %241 : vector<1x1x96x84xbf16> to vector<96x84xbf16>
    %cst_311 = arith.constant dense<0.000000e+00> : vector<8x84xf32>
    %243 = tpu.matmul %240, %242, %cst_311 {dimension_numbers = #tpu.dot_dimension_numbers<[1], [0], [0], [1], [0, 0, 1, 1], [], []>} : vector<8x96xbf16>, vector<96x84xbf16>, vector<8x84xf32> -> vector<8x84xf32>
    %244 = vector.extract_strided_slice %243 {offsets = [1, 0], sizes = [7, 84], strides = [1, 1]} : vector<8x84xf32> to vector<7x84xf32>
    %245 = arith.addf %238, %244 : vector<7x84xf32>
    %c0_312 = arith.constant 0 : index
    %c3_313 = arith.constant 3 : index
    %c0_314 = arith.constant 0 : index
    %c0_315 = arith.constant 0 : index
    %246 = vector.load %arg1[%c0_312, %c3_313, %c0_314, %c0_315] : memref<1x4x8x96xbf16, #tpu.memory_space<vmem>>, vector<1x1x8x96xbf16>
    %247 = vector.shape_cast %246 : vector<1x1x8x96xbf16> to vector<8x96xbf16>
    %c0_316 = arith.constant 0 : index
    %c1_317 = arith.constant 1 : index
    %c0_318 = arith.constant 0 : index
    %c0_319 = arith.constant 0 : index
    %248 = vector.load %arg2[%c0_316, %c1_317, %c0_318, %c0_319] : memref<5x2x96x84xbf16, #tpu.memory_space<vmem>>, vector<1x1x96x84xbf16>
    %249 = vector.shape_cast %248 : vector<1x1x96x84xbf16> to vector<96x84xbf16>
    %cst_320 = arith.constant dense<0.000000e+00> : vector<8x84xf32>
    %250 = tpu.matmul %247, %249, %cst_320 {dimension_numbers = #tpu.dot_dimension_numbers<[1], [0], [0], [1], [0, 0, 1, 1], [], []>} : vector<8x96xbf16>, vector<96x84xbf16>, vector<8x84xf32> -> vector<8x84xf32>
    %251 = vector.extract_strided_slice %250 {offsets = [0, 0], sizes = [7, 84], strides = [1, 1]} : vector<8x84xf32> to vector<7x84xf32>
    %c0_321 = arith.constant 0 : index
    %c0_322 = arith.constant 0 : index
    %c0_323 = arith.constant 0 : index
    %c0_324 = arith.constant 0 : index
    %252 = vector.load %arg1[%c0_321, %c0_322, %c0_323, %c0_324] : memref<1x4x8x96xbf16, #tpu.memory_space<vmem>>, vector<1x1x8x96xbf16>
    %253 = vector.shape_cast %252 : vector<1x1x8x96xbf16> to vector<8x96xbf16>
    %c1_325 = arith.constant 1 : index
    %c1_326 = arith.constant 1 : index
    %c0_327 = arith.constant 0 : index
    %c0_328 = arith.constant 0 : index
    %254 = vector.load %arg2[%c1_325, %c1_326, %c0_327, %c0_328] : memref<5x2x96x84xbf16, #tpu.memory_space<vmem>>, vector<1x1x96x84xbf16>
    %255 = vector.shape_cast %254 : vector<1x1x96x84xbf16> to vector<96x84xbf16>
    %cst_329 = arith.constant dense<0.000000e+00> : vector<8x84xf32>
    %256 = tpu.matmul %253, %255, %cst_329 {dimension_numbers = #tpu.dot_dimension_numbers<[1], [0], [0], [1], [0, 0, 1, 1], [], []>} : vector<8x96xbf16>, vector<96x84xbf16>, vector<8x84xf32> -> vector<8x84xf32>
    %257 = vector.extract_strided_slice %256 {offsets = [1, 0], sizes = [7, 84], strides = [1, 1]} : vector<8x84xf32> to vector<7x84xf32>
    %258 = arith.addf %251, %257 : vector<7x84xf32>
    %c0_330 = arith.constant 0 : index
    %c1_331 = arith.constant 1 : index
    %c0_332 = arith.constant 0 : index
    %c0_333 = arith.constant 0 : index
    %259 = vector.load %arg1[%c0_330, %c1_331, %c0_332, %c0_333] : memref<1x4x8x96xbf16, #tpu.memory_space<vmem>>, vector<1x1x8x96xbf16>
    %260 = vector.shape_cast %259 : vector<1x1x8x96xbf16> to vector<8x96xbf16>
    %c2_334 = arith.constant 2 : index
    %c1_335 = arith.constant 1 : index
    %c0_336 = arith.constant 0 : index
    %c0_337 = arith.constant 0 : index
    %261 = vector.load %arg2[%c2_334, %c1_335, %c0_336, %c0_337] : memref<5x2x96x84xbf16, #tpu.memory_space<vmem>>, vector<1x1x96x84xbf16>
    %262 = vector.shape_cast %261 : vector<1x1x96x84xbf16> to vector<96x84xbf16>
    %cst_338 = arith.constant dense<0.000000e+00> : vector<8x84xf32>
    %263 = tpu.matmul %260, %262, %cst_338 {dimension_numbers = #tpu.dot_dimension_numbers<[1], [0], [0], [1], [0, 0, 1, 1], [], []>} : vector<8x96xbf16>, vector<96x84xbf16>, vector<8x84xf32> -> vector<8x84xf32>
    %264 = vector.extract_strided_slice %263 {offsets = [1, 0], sizes = [7, 84], strides = [1, 1]} : vector<8x84xf32> to vector<7x84xf32>
    %265 = arith.addf %258, %264 : vector<7x84xf32>
    %c0_339 = arith.constant 0 : index
    %c2_340 = arith.constant 2 : index
    %c0_341 = arith.constant 0 : index
    %c0_342 = arith.constant 0 : index
    %266 = vector.load %arg1[%c0_339, %c2_340, %c0_341, %c0_342] : memref<1x4x8x96xbf16, #tpu.memory_space<vmem>>, vector<1x1x8x96xbf16>
    %267 = vector.shape_cast %266 : vector<1x1x8x96xbf16> to vector<8x96xbf16>
    %c3_343 = arith.constant 3 : index
    %c1_344 = arith.constant 1 : index
    %c0_345 = arith.constant 0 : index
    %c0_346 = arith.constant 0 : index
    %268 = vector.load %arg2[%c3_343, %c1_344, %c0_345, %c0_346] : memref<5x2x96x84xbf16, #tpu.memory_space<vmem>>, vector<1x1x96x84xbf16>
    %269 = vector.shape_cast %268 : vector<1x1x96x84xbf16> to vector<96x84xbf16>
    %cst_347 = arith.constant dense<0.000000e+00> : vector<8x84xf32>
    %270 = tpu.matmul %267, %269, %cst_347 {dimension_numbers = #tpu.dot_dimension_numbers<[1], [0], [0], [1], [0, 0, 1, 1], [], []>} : vector<8x96xbf16>, vector<96x84xbf16>, vector<8x84xf32> -> vector<8x84xf32>
    %271 = vector.extract_strided_slice %270 {offsets = [1, 0], sizes = [7, 84], strides = [1, 1]} : vector<8x84xf32> to vector<7x84xf32>
    %272 = arith.addf %265, %271 : vector<7x84xf32>
    %c0_348 = arith.constant 0 : index
    %c3_349 = arith.constant 3 : index
    %c0_350 = arith.constant 0 : index
    %c0_351 = arith.constant 0 : index
    %273 = vector.load %arg1[%c0_348, %c3_349, %c0_350, %c0_351] : memref<1x4x8x96xbf16, #tpu.memory_space<vmem>>, vector<1x1x8x96xbf16>
    %274 = vector.shape_cast %273 : vector<1x1x8x96xbf16> to vector<8x96xbf16>
    %c4_352 = arith.constant 4 : index
    %c1_353 = arith.constant 1 : index
    %c0_354 = arith.constant 0 : index
    %c0_355 = arith.constant 0 : index
    %275 = vector.load %arg2[%c4_352, %c1_353, %c0_354, %c0_355] : memref<5x2x96x84xbf16, #tpu.memory_space<vmem>>, vector<1x1x96x84xbf16>
    %276 = vector.shape_cast %275 : vector<1x1x96x84xbf16> to vector<96x84xbf16>
    %cst_356 = arith.constant dense<0.000000e+00> : vector<8x84xf32>
    %277 = tpu.matmul %274, %276, %cst_356 {dimension_numbers = #tpu.dot_dimension_numbers<[1], [0], [0], [1], [0, 0, 1, 1], [], []>} : vector<8x96xbf16>, vector<96x84xbf16>, vector<8x84xf32> -> vector<8x84xf32>
    %278 = vector.extract_strided_slice %277 {offsets = [1, 0], sizes = [7, 84], strides = [1, 1]} : vector<8x84xf32> to vector<7x84xf32>
    %279 = arith.addf %272, %278 : vector<7x84xf32>
    %280 = arith.maximumf %177, %211 : vector<7x84xf32>
    %281 = arith.maximumf %245, %279 : vector<7x84xf32>
    %282 = arith.maximumf %280, %281 : vector<7x84xf32>
    %c0_357 = arith.constant 0 : index
    %c0_358 = arith.constant 0 : index
    %283 = vector.load %arg7[%c0_357, %c0_358] : memref<1x84xf32, #tpu.memory_space<vmem>>, vector<1x84xf32>
    %284 = vector.broadcast %283 : vector<1x84xf32> to vector<7x84xf32>
    %285 = arith.addf %282, %284 : vector<7x84xf32>
    %cst_359 = arith.constant 0.000000e+00 : f32
    %286 = vector.broadcast %cst_359 : f32 to vector<7x84xf32>
    %287 = arith.maximumf %285, %286 : vector<7x84xf32>
    %c0_360 = arith.constant 0 : index
    %c0_361 = arith.constant 0 : index
    %c0_362 = arith.constant 0 : index
    %c0_363 = arith.constant 0 : index
    %288 = vector.load %arg3[%c0_360, %c0_361, %c0_362, %c0_363] : memref<5x2x84x80xbf16, #tpu.memory_space<vmem>>, vector<1x1x84x80xbf16>
    %289 = vector.shape_cast %288 : vector<1x1x84x80xbf16> to vector<84x80xbf16>
    %290 = arith.truncf %143 : vector<7x84xf32> to vector<7x84xbf16>
    %cst_364 = arith.constant dense<0.000000e+00> : vector<7x80xf32>
    %291 = tpu.matmul %290, %289, %cst_364 {dimension_numbers = #tpu.dot_dimension_numbers<[1], [0], [0], [1], [0, 0, 1, 1], [], []>} : vector<7x84xbf16>, vector<84x80xbf16>, vector<7x80xf32> -> vector<7x80xf32>
    %292 = vector.extract_strided_slice %291 {offsets = [0, 0], sizes = [5, 80], strides = [1, 1]} : vector<7x80xf32> to vector<5x80xf32>
    %c1_365 = arith.constant 1 : index
    %c0_366 = arith.constant 0 : index
    %c0_367 = arith.constant 0 : index
    %c0_368 = arith.constant 0 : index
    %293 = vector.load %arg3[%c1_365, %c0_366, %c0_367, %c0_368] : memref<5x2x84x80xbf16, #tpu.memory_space<vmem>>, vector<1x1x84x80xbf16>
    %294 = vector.shape_cast %293 : vector<1x1x84x80xbf16> to vector<84x80xbf16>
    %295 = arith.truncf %287 : vector<7x84xf32> to vector<7x84xbf16>
    %cst_369 = arith.constant dense<0.000000e+00> : vector<7x80xf32>
    %296 = tpu.matmul %295, %294, %cst_369 {dimension_numbers = #tpu.dot_dimension_numbers<[1], [0], [0], [1], [0, 0, 1, 1], [], []>} : vector<7x84xbf16>, vector<84x80xbf16>, vector<7x80xf32> -> vector<7x80xf32>
    %297 = vector.extract_strided_slice %296 {offsets = [0, 0], sizes = [5, 80], strides = [1, 1]} : vector<7x80xf32> to vector<5x80xf32>
    %298 = arith.addf %292, %297 : vector<5x80xf32>
    %c2_370 = arith.constant 2 : index
    %c0_371 = arith.constant 0 : index
    %c0_372 = arith.constant 0 : index
    %c0_373 = arith.constant 0 : index
    %299 = vector.load %arg3[%c2_370, %c0_371, %c0_372, %c0_373] : memref<5x2x84x80xbf16, #tpu.memory_space<vmem>>, vector<1x1x84x80xbf16>
    %300 = vector.shape_cast %299 : vector<1x1x84x80xbf16> to vector<84x80xbf16>
    %301 = arith.truncf %143 : vector<7x84xf32> to vector<7x84xbf16>
    %cst_374 = arith.constant dense<0.000000e+00> : vector<7x80xf32>
    %302 = tpu.matmul %301, %300, %cst_374 {dimension_numbers = #tpu.dot_dimension_numbers<[1], [0], [0], [1], [0, 0, 1, 1], [], []>} : vector<7x84xbf16>, vector<84x80xbf16>, vector<7x80xf32> -> vector<7x80xf32>
    %303 = vector.extract_strided_slice %302 {offsets = [1, 0], sizes = [5, 80], strides = [1, 1]} : vector<7x80xf32> to vector<5x80xf32>
    %304 = arith.addf %298, %303 : vector<5x80xf32>
    %c3_375 = arith.constant 3 : index
    %c0_376 = arith.constant 0 : index
    %c0_377 = arith.constant 0 : index
    %c0_378 = arith.constant 0 : index
    %305 = vector.load %arg3[%c3_375, %c0_376, %c0_377, %c0_378] : memref<5x2x84x80xbf16, #tpu.memory_space<vmem>>, vector<1x1x84x80xbf16>
    %306 = vector.shape_cast %305 : vector<1x1x84x80xbf16> to vector<84x80xbf16>
    %307 = arith.truncf %287 : vector<7x84xf32> to vector<7x84xbf16>
    %cst_379 = arith.constant dense<0.000000e+00> : vector<7x80xf32>
    %308 = tpu.matmul %307, %306, %cst_379 {dimension_numbers = #tpu.dot_dimension_numbers<[1], [0], [0], [1], [0, 0, 1, 1], [], []>} : vector<7x84xbf16>, vector<84x80xbf16>, vector<7x80xf32> -> vector<7x80xf32>
    %309 = vector.extract_strided_slice %308 {offsets = [1, 0], sizes = [5, 80], strides = [1, 1]} : vector<7x80xf32> to vector<5x80xf32>
    %310 = arith.addf %304, %309 : vector<5x80xf32>
    %c4_380 = arith.constant 4 : index
    %c0_381 = arith.constant 0 : index
    %c0_382 = arith.constant 0 : index
    %c0_383 = arith.constant 0 : index
    %311 = vector.load %arg3[%c4_380, %c0_381, %c0_382, %c0_383] : memref<5x2x84x80xbf16, #tpu.memory_space<vmem>>, vector<1x1x84x80xbf16>
    %312 = vector.shape_cast %311 : vector<1x1x84x80xbf16> to vector<84x80xbf16>
    %313 = arith.truncf %143 : vector<7x84xf32> to vector<7x84xbf16>
    %cst_384 = arith.constant dense<0.000000e+00> : vector<7x80xf32>
    %314 = tpu.matmul %313, %312, %cst_384 {dimension_numbers = #tpu.dot_dimension_numbers<[1], [0], [0], [1], [0, 0, 1, 1], [], []>} : vector<7x84xbf16>, vector<84x80xbf16>, vector<7x80xf32> -> vector<7x80xf32>
    %315 = vector.extract_strided_slice %314 {offsets = [2, 0], sizes = [5, 80], strides = [1, 1]} : vector<7x80xf32> to vector<5x80xf32>
    %316 = arith.addf %310, %315 : vector<5x80xf32>
    %c0_385 = arith.constant 0 : index
    %c1_386 = arith.constant 1 : index
    %c0_387 = arith.constant 0 : index
    %c0_388 = arith.constant 0 : index
    %317 = vector.load %arg3[%c0_385, %c1_386, %c0_387, %c0_388] : memref<5x2x84x80xbf16, #tpu.memory_space<vmem>>, vector<1x1x84x80xbf16>
    %318 = vector.shape_cast %317 : vector<1x1x84x80xbf16> to vector<84x80xbf16>
    %319 = arith.truncf %143 : vector<7x84xf32> to vector<7x84xbf16>
    %cst_389 = arith.constant dense<0.000000e+00> : vector<7x80xf32>
    %320 = tpu.matmul %319, %318, %cst_389 {dimension_numbers = #tpu.dot_dimension_numbers<[1], [0], [0], [1], [0, 0, 1, 1], [], []>} : vector<7x84xbf16>, vector<84x80xbf16>, vector<7x80xf32> -> vector<7x80xf32>
    %321 = vector.extract_strided_slice %320 {offsets = [0, 0], sizes = [5, 80], strides = [1, 1]} : vector<7x80xf32> to vector<5x80xf32>
    %c1_390 = arith.constant 1 : index
    %c1_391 = arith.constant 1 : index
    %c0_392 = arith.constant 0 : index
    %c0_393 = arith.constant 0 : index
    %322 = vector.load %arg3[%c1_390, %c1_391, %c0_392, %c0_393] : memref<5x2x84x80xbf16, #tpu.memory_space<vmem>>, vector<1x1x84x80xbf16>
    %323 = vector.shape_cast %322 : vector<1x1x84x80xbf16> to vector<84x80xbf16>
    %324 = arith.truncf %287 : vector<7x84xf32> to vector<7x84xbf16>
    %cst_394 = arith.constant dense<0.000000e+00> : vector<7x80xf32>
    %325 = tpu.matmul %324, %323, %cst_394 {dimension_numbers = #tpu.dot_dimension_numbers<[1], [0], [0], [1], [0, 0, 1, 1], [], []>} : vector<7x84xbf16>, vector<84x80xbf16>, vector<7x80xf32> -> vector<7x80xf32>
    %326 = vector.extract_strided_slice %325 {offsets = [0, 0], sizes = [5, 80], strides = [1, 1]} : vector<7x80xf32> to vector<5x80xf32>
    %327 = arith.addf %321, %326 : vector<5x80xf32>
    %c2_395 = arith.constant 2 : index
    %c1_396 = arith.constant 1 : index
    %c0_397 = arith.constant 0 : index
    %c0_398 = arith.constant 0 : index
    %328 = vector.load %arg3[%c2_395, %c1_396, %c0_397, %c0_398] : memref<5x2x84x80xbf16, #tpu.memory_space<vmem>>, vector<1x1x84x80xbf16>
    %329 = vector.shape_cast %328 : vector<1x1x84x80xbf16> to vector<84x80xbf16>
    %330 = arith.truncf %143 : vector<7x84xf32> to vector<7x84xbf16>
    %cst_399 = arith.constant dense<0.000000e+00> : vector<7x80xf32>
    %331 = tpu.matmul %330, %329, %cst_399 {dimension_numbers = #tpu.dot_dimension_numbers<[1], [0], [0], [1], [0, 0, 1, 1], [], []>} : vector<7x84xbf16>, vector<84x80xbf16>, vector<7x80xf32> -> vector<7x80xf32>
    %332 = vector.extract_strided_slice %331 {offsets = [1, 0], sizes = [5, 80], strides = [1, 1]} : vector<7x80xf32> to vector<5x80xf32>
    %333 = arith.addf %327, %332 : vector<5x80xf32>
    %c3_400 = arith.constant 3 : index
    %c1_401 = arith.constant 1 : index
    %c0_402 = arith.constant 0 : index
    %c0_403 = arith.constant 0 : index
    %334 = vector.load %arg3[%c3_400, %c1_401, %c0_402, %c0_403] : memref<5x2x84x80xbf16, #tpu.memory_space<vmem>>, vector<1x1x84x80xbf16>
    %335 = vector.shape_cast %334 : vector<1x1x84x80xbf16> to vector<84x80xbf16>
    %336 = arith.truncf %287 : vector<7x84xf32> to vector<7x84xbf16>
    %cst_404 = arith.constant dense<0.000000e+00> : vector<7x80xf32>
    %337 = tpu.matmul %336, %335, %cst_404 {dimension_numbers = #tpu.dot_dimension_numbers<[1], [0], [0], [1], [0, 0, 1, 1], [], []>} : vector<7x84xbf16>, vector<84x80xbf16>, vector<7x80xf32> -> vector<7x80xf32>
    %338 = vector.extract_strided_slice %337 {offsets = [1, 0], sizes = [5, 80], strides = [1, 1]} : vector<7x80xf32> to vector<5x80xf32>
    %339 = arith.addf %333, %338 : vector<5x80xf32>
    %c4_405 = arith.constant 4 : index
    %c1_406 = arith.constant 1 : index
    %c0_407 = arith.constant 0 : index
    %c0_408 = arith.constant 0 : index
    %340 = vector.load %arg3[%c4_405, %c1_406, %c0_407, %c0_408] : memref<5x2x84x80xbf16, #tpu.memory_space<vmem>>, vector<1x1x84x80xbf16>
    %341 = vector.shape_cast %340 : vector<1x1x84x80xbf16> to vector<84x80xbf16>
    %342 = arith.truncf %143 : vector<7x84xf32> to vector<7x84xbf16>
    %cst_409 = arith.constant dense<0.000000e+00> : vector<7x80xf32>
    %343 = tpu.matmul %342, %341, %cst_409 {dimension_numbers = #tpu.dot_dimension_numbers<[1], [0], [0], [1], [0, 0, 1, 1], [], []>} : vector<7x84xbf16>, vector<84x80xbf16>, vector<7x80xf32> -> vector<7x80xf32>
    %344 = vector.extract_strided_slice %343 {offsets = [2, 0], sizes = [5, 80], strides = [1, 1]} : vector<7x80xf32> to vector<5x80xf32>
    %345 = arith.addf %339, %344 : vector<5x80xf32>
    %346 = arith.maximumf %316, %345 : vector<5x80xf32>
    %c0_410 = arith.constant 0 : index
    %c0_411 = arith.constant 0 : index
    %c0_412 = arith.constant 0 : index
    %c0_413 = arith.constant 0 : index
    %347 = vector.load %arg3[%c0_410, %c0_411, %c0_412, %c0_413] : memref<5x2x84x80xbf16, #tpu.memory_space<vmem>>, vector<1x1x84x80xbf16>
    %348 = vector.shape_cast %347 : vector<1x1x84x80xbf16> to vector<84x80xbf16>
    %349 = arith.truncf %287 : vector<7x84xf32> to vector<7x84xbf16>
    %cst_414 = arith.constant dense<0.000000e+00> : vector<7x80xf32>
    %350 = tpu.matmul %349, %348, %cst_414 {dimension_numbers = #tpu.dot_dimension_numbers<[1], [0], [0], [1], [0, 0, 1, 1], [], []>} : vector<7x84xbf16>, vector<84x80xbf16>, vector<7x80xf32> -> vector<7x80xf32>
    %351 = vector.extract_strided_slice %350 {offsets = [0, 0], sizes = [5, 80], strides = [1, 1]} : vector<7x80xf32> to vector<5x80xf32>
    %c1_415 = arith.constant 1 : index
    %c0_416 = arith.constant 0 : index
    %c0_417 = arith.constant 0 : index
    %c0_418 = arith.constant 0 : index
    %352 = vector.load %arg3[%c1_415, %c0_416, %c0_417, %c0_418] : memref<5x2x84x80xbf16, #tpu.memory_space<vmem>>, vector<1x1x84x80xbf16>
    %353 = vector.shape_cast %352 : vector<1x1x84x80xbf16> to vector<84x80xbf16>
    %354 = arith.truncf %143 : vector<7x84xf32> to vector<7x84xbf16>
    %cst_419 = arith.constant dense<0.000000e+00> : vector<7x80xf32>
    %355 = tpu.matmul %354, %353, %cst_419 {dimension_numbers = #tpu.dot_dimension_numbers<[1], [0], [0], [1], [0, 0, 1, 1], [], []>} : vector<7x84xbf16>, vector<84x80xbf16>, vector<7x80xf32> -> vector<7x80xf32>
    %356 = vector.extract_strided_slice %355 {offsets = [1, 0], sizes = [5, 80], strides = [1, 1]} : vector<7x80xf32> to vector<5x80xf32>
    %357 = arith.addf %351, %356 : vector<5x80xf32>
    %c2_420 = arith.constant 2 : index
    %c0_421 = arith.constant 0 : index
    %c0_422 = arith.constant 0 : index
    %c0_423 = arith.constant 0 : index
    %358 = vector.load %arg3[%c2_420, %c0_421, %c0_422, %c0_423] : memref<5x2x84x80xbf16, #tpu.memory_space<vmem>>, vector<1x1x84x80xbf16>
    %359 = vector.shape_cast %358 : vector<1x1x84x80xbf16> to vector<84x80xbf16>
    %360 = arith.truncf %287 : vector<7x84xf32> to vector<7x84xbf16>
    %cst_424 = arith.constant dense<0.000000e+00> : vector<7x80xf32>
    %361 = tpu.matmul %360, %359, %cst_424 {dimension_numbers = #tpu.dot_dimension_numbers<[1], [0], [0], [1], [0, 0, 1, 1], [], []>} : vector<7x84xbf16>, vector<84x80xbf16>, vector<7x80xf32> -> vector<7x80xf32>
    %362 = vector.extract_strided_slice %361 {offsets = [1, 0], sizes = [5, 80], strides = [1, 1]} : vector<7x80xf32> to vector<5x80xf32>
    %363 = arith.addf %357, %362 : vector<5x80xf32>
    %c3_425 = arith.constant 3 : index
    %c0_426 = arith.constant 0 : index
    %c0_427 = arith.constant 0 : index
    %c0_428 = arith.constant 0 : index
    %364 = vector.load %arg3[%c3_425, %c0_426, %c0_427, %c0_428] : memref<5x2x84x80xbf16, #tpu.memory_space<vmem>>, vector<1x1x84x80xbf16>
    %365 = vector.shape_cast %364 : vector<1x1x84x80xbf16> to vector<84x80xbf16>
    %366 = arith.truncf %143 : vector<7x84xf32> to vector<7x84xbf16>
    %cst_429 = arith.constant dense<0.000000e+00> : vector<7x80xf32>
    %367 = tpu.matmul %366, %365, %cst_429 {dimension_numbers = #tpu.dot_dimension_numbers<[1], [0], [0], [1], [0, 0, 1, 1], [], []>} : vector<7x84xbf16>, vector<84x80xbf16>, vector<7x80xf32> -> vector<7x80xf32>
    %368 = vector.extract_strided_slice %367 {offsets = [2, 0], sizes = [5, 80], strides = [1, 1]} : vector<7x80xf32> to vector<5x80xf32>
    %369 = arith.addf %363, %368 : vector<5x80xf32>
    %c4_430 = arith.constant 4 : index
    %c0_431 = arith.constant 0 : index
    %c0_432 = arith.constant 0 : index
    %c0_433 = arith.constant 0 : index
    %370 = vector.load %arg3[%c4_430, %c0_431, %c0_432, %c0_433] : memref<5x2x84x80xbf16, #tpu.memory_space<vmem>>, vector<1x1x84x80xbf16>
    %371 = vector.shape_cast %370 : vector<1x1x84x80xbf16> to vector<84x80xbf16>
    %372 = arith.truncf %287 : vector<7x84xf32> to vector<7x84xbf16>
    %cst_434 = arith.constant dense<0.000000e+00> : vector<7x80xf32>
    %373 = tpu.matmul %372, %371, %cst_434 {dimension_numbers = #tpu.dot_dimension_numbers<[1], [0], [0], [1], [0, 0, 1, 1], [], []>} : vector<7x84xbf16>, vector<84x80xbf16>, vector<7x80xf32> -> vector<7x80xf32>
    %374 = vector.extract_strided_slice %373 {offsets = [2, 0], sizes = [5, 80], strides = [1, 1]} : vector<7x80xf32> to vector<5x80xf32>
    %375 = arith.addf %369, %374 : vector<5x80xf32>
    %c0_435 = arith.constant 0 : index
    %c1_436 = arith.constant 1 : index
    %c0_437 = arith.constant 0 : index
    %c0_438 = arith.constant 0 : index
    %376 = vector.load %arg3[%c0_435, %c1_436, %c0_437, %c0_438] : memref<5x2x84x80xbf16, #tpu.memory_space<vmem>>, vector<1x1x84x80xbf16>
    %377 = vector.shape_cast %376 : vector<1x1x84x80xbf16> to vector<84x80xbf16>
    %378 = arith.truncf %287 : vector<7x84xf32> to vector<7x84xbf16>
    %cst_439 = arith.constant dense<0.000000e+00> : vector<7x80xf32>
    %379 = tpu.matmul %378, %377, %cst_439 {dimension_numbers = #tpu.dot_dimension_numbers<[1], [0], [0], [1], [0, 0, 1, 1], [], []>} : vector<7x84xbf16>, vector<84x80xbf16>, vector<7x80xf32> -> vector<7x80xf32>
    %380 = vector.extract_strided_slice %379 {offsets = [0, 0], sizes = [5, 80], strides = [1, 1]} : vector<7x80xf32> to vector<5x80xf32>
    %c1_440 = arith.constant 1 : index
    %c1_441 = arith.constant 1 : index
    %c0_442 = arith.constant 0 : index
    %c0_443 = arith.constant 0 : index
    %381 = vector.load %arg3[%c1_440, %c1_441, %c0_442, %c0_443] : memref<5x2x84x80xbf16, #tpu.memory_space<vmem>>, vector<1x1x84x80xbf16>
    %382 = vector.shape_cast %381 : vector<1x1x84x80xbf16> to vector<84x80xbf16>
    %383 = arith.truncf %143 : vector<7x84xf32> to vector<7x84xbf16>
    %cst_444 = arith.constant dense<0.000000e+00> : vector<7x80xf32>
    %384 = tpu.matmul %383, %382, %cst_444 {dimension_numbers = #tpu.dot_dimension_numbers<[1], [0], [0], [1], [0, 0, 1, 1], [], []>} : vector<7x84xbf16>, vector<84x80xbf16>, vector<7x80xf32> -> vector<7x80xf32>
    %385 = vector.extract_strided_slice %384 {offsets = [1, 0], sizes = [5, 80], strides = [1, 1]} : vector<7x80xf32> to vector<5x80xf32>
    %386 = arith.addf %380, %385 : vector<5x80xf32>
    %c2_445 = arith.constant 2 : index
    %c1_446 = arith.constant 1 : index
    %c0_447 = arith.constant 0 : index
    %c0_448 = arith.constant 0 : index
    %387 = vector.load %arg3[%c2_445, %c1_446, %c0_447, %c0_448] : memref<5x2x84x80xbf16, #tpu.memory_space<vmem>>, vector<1x1x84x80xbf16>
    %388 = vector.shape_cast %387 : vector<1x1x84x80xbf16> to vector<84x80xbf16>
    %389 = arith.truncf %287 : vector<7x84xf32> to vector<7x84xbf16>
    %cst_449 = arith.constant dense<0.000000e+00> : vector<7x80xf32>
    %390 = tpu.matmul %389, %388, %cst_449 {dimension_numbers = #tpu.dot_dimension_numbers<[1], [0], [0], [1], [0, 0, 1, 1], [], []>} : vector<7x84xbf16>, vector<84x80xbf16>, vector<7x80xf32> -> vector<7x80xf32>
    %391 = vector.extract_strided_slice %390 {offsets = [1, 0], sizes = [5, 80], strides = [1, 1]} : vector<7x80xf32> to vector<5x80xf32>
    %392 = arith.addf %386, %391 : vector<5x80xf32>
    %c3_450 = arith.constant 3 : index
    %c1_451 = arith.constant 1 : index
    %c0_452 = arith.constant 0 : index
    %c0_453 = arith.constant 0 : index
    %393 = vector.load %arg3[%c3_450, %c1_451, %c0_452, %c0_453] : memref<5x2x84x80xbf16, #tpu.memory_space<vmem>>, vector<1x1x84x80xbf16>
    %394 = vector.shape_cast %393 : vector<1x1x84x80xbf16> to vector<84x80xbf16>
    %395 = arith.truncf %143 : vector<7x84xf32> to vector<7x84xbf16>
    %cst_454 = arith.constant dense<0.000000e+00> : vector<7x80xf32>
    %396 = tpu.matmul %395, %394, %cst_454 {dimension_numbers = #tpu.dot_dimension_numbers<[1], [0], [0], [1], [0, 0, 1, 1], [], []>} : vector<7x84xbf16>, vector<84x80xbf16>, vector<7x80xf32> -> vector<7x80xf32>
    %397 = vector.extract_strided_slice %396 {offsets = [2, 0], sizes = [5, 80], strides = [1, 1]} : vector<7x80xf32> to vector<5x80xf32>
    %398 = arith.addf %392, %397 : vector<5x80xf32>
    %c4_455 = arith.constant 4 : index
    %c1_456 = arith.constant 1 : index
    %c0_457 = arith.constant 0 : index
    %c0_458 = arith.constant 0 : index
    %399 = vector.load %arg3[%c4_455, %c1_456, %c0_457, %c0_458] : memref<5x2x84x80xbf16, #tpu.memory_space<vmem>>, vector<1x1x84x80xbf16>
    %400 = vector.shape_cast %399 : vector<1x1x84x80xbf16> to vector<84x80xbf16>
    %401 = arith.truncf %287 : vector<7x84xf32> to vector<7x84xbf16>
    %cst_459 = arith.constant dense<0.000000e+00> : vector<7x80xf32>
    %402 = tpu.matmul %401, %400, %cst_459 {dimension_numbers = #tpu.dot_dimension_numbers<[1], [0], [0], [1], [0, 0, 1, 1], [], []>} : vector<7x84xbf16>, vector<84x80xbf16>, vector<7x80xf32> -> vector<7x80xf32>
    %403 = vector.extract_strided_slice %402 {offsets = [2, 0], sizes = [5, 80], strides = [1, 1]} : vector<7x80xf32> to vector<5x80xf32>
    %404 = arith.addf %398, %403 : vector<5x80xf32>
    %405 = arith.maximumf %375, %404 : vector<5x80xf32>
    %406 = arith.maximumf %346, %405 : vector<5x80xf32>
    %c0_460 = arith.constant 0 : index
    %c0_461 = arith.constant 0 : index
    %407 = vector.load %arg8[%c0_460, %c0_461] : memref<1x80xf32, #tpu.memory_space<vmem>>, vector<1x80xf32>
    %408 = vector.broadcast %407 : vector<1x80xf32> to vector<5x80xf32>
    %409 = arith.addf %406, %408 : vector<5x80xf32>
    %cst_462 = arith.constant 0.000000e+00 : f32
    %410 = vector.broadcast %cst_462 : f32 to vector<5x80xf32>
    %411 = arith.maximumf %409, %410 : vector<5x80xf32>
    %c0_463 = arith.constant 0 : index
    %c0_464 = arith.constant 0 : index
    %412 = vector.load %arg9[%c0_463, %c0_464] : memref<1x120xf32, #tpu.memory_space<vmem>>, vector<1x120xf32>
    %413 = vector.extract_strided_slice %411 {offsets = [0, 0], sizes = [1, 80], strides = [1, 1]} : vector<5x80xf32> to vector<1x80xf32>
    %c0_465 = arith.constant 0 : index
    %c0_466 = arith.constant 0 : index
    %c0_467 = arith.constant 0 : index
    %414 = vector.load %arg4[%c0_465, %c0_466, %c0_467] : memref<5x80x120xbf16, #tpu.memory_space<vmem>>, vector<1x80x120xbf16>
    %415 = vector.shape_cast %414 : vector<1x80x120xbf16> to vector<80x120xbf16>
    %416 = arith.truncf %413 : vector<1x80xf32> to vector<1x80xbf16>
    %cst_468 = arith.constant dense<0.000000e+00> : vector<1x120xf32>
    %417 = tpu.matmul %416, %415, %cst_468 {dimension_numbers = #tpu.dot_dimension_numbers<[1], [0], [0], [1], [0, 0, 1, 1], [], []>} : vector<1x80xbf16>, vector<80x120xbf16>, vector<1x120xf32> -> vector<1x120xf32>
    %418 = arith.addf %412, %417 : vector<1x120xf32>
    %419 = vector.extract_strided_slice %411 {offsets = [1, 0], sizes = [1, 80], strides = [1, 1]} : vector<5x80xf32> to vector<1x80xf32>
    %c1_469 = arith.constant 1 : index
    %c0_470 = arith.constant 0 : index
    %c0_471 = arith.constant 0 : index
    %420 = vector.load %arg4[%c1_469, %c0_470, %c0_471] : memref<5x80x120xbf16, #tpu.memory_space<vmem>>, vector<1x80x120xbf16>
    %421 = vector.shape_cast %420 : vector<1x80x120xbf16> to vector<80x120xbf16>
    %422 = arith.truncf %419 : vector<1x80xf32> to vector<1x80xbf16>
    %cst_472 = arith.constant dense<0.000000e+00> : vector<1x120xf32>
    %423 = tpu.matmul %422, %421, %cst_472 {dimension_numbers = #tpu.dot_dimension_numbers<[1], [0], [0], [1], [0, 0, 1, 1], [], []>} : vector<1x80xbf16>, vector<80x120xbf16>, vector<1x120xf32> -> vector<1x120xf32>
    %424 = arith.addf %418, %423 : vector<1x120xf32>
    %425 = vector.extract_strided_slice %411 {offsets = [2, 0], sizes = [1, 80], strides = [1, 1]} : vector<5x80xf32> to vector<1x80xf32>
    %c2_473 = arith.constant 2 : index
    %c0_474 = arith.constant 0 : index
    %c0_475 = arith.constant 0 : index
    %426 = vector.load %arg4[%c2_473, %c0_474, %c0_475] : memref<5x80x120xbf16, #tpu.memory_space<vmem>>, vector<1x80x120xbf16>
    %427 = vector.shape_cast %426 : vector<1x80x120xbf16> to vector<80x120xbf16>
    %428 = arith.truncf %425 : vector<1x80xf32> to vector<1x80xbf16>
    %cst_476 = arith.constant dense<0.000000e+00> : vector<1x120xf32>
    %429 = tpu.matmul %428, %427, %cst_476 {dimension_numbers = #tpu.dot_dimension_numbers<[1], [0], [0], [1], [0, 0, 1, 1], [], []>} : vector<1x80xbf16>, vector<80x120xbf16>, vector<1x120xf32> -> vector<1x120xf32>
    %430 = arith.addf %424, %429 : vector<1x120xf32>
    %431 = vector.extract_strided_slice %411 {offsets = [3, 0], sizes = [1, 80], strides = [1, 1]} : vector<5x80xf32> to vector<1x80xf32>
    %c3_477 = arith.constant 3 : index
    %c0_478 = arith.constant 0 : index
    %c0_479 = arith.constant 0 : index
    %432 = vector.load %arg4[%c3_477, %c0_478, %c0_479] : memref<5x80x120xbf16, #tpu.memory_space<vmem>>, vector<1x80x120xbf16>
    %433 = vector.shape_cast %432 : vector<1x80x120xbf16> to vector<80x120xbf16>
    %434 = arith.truncf %431 : vector<1x80xf32> to vector<1x80xbf16>
    %cst_480 = arith.constant dense<0.000000e+00> : vector<1x120xf32>
    %435 = tpu.matmul %434, %433, %cst_480 {dimension_numbers = #tpu.dot_dimension_numbers<[1], [0], [0], [1], [0, 0, 1, 1], [], []>} : vector<1x80xbf16>, vector<80x120xbf16>, vector<1x120xf32> -> vector<1x120xf32>
    %436 = arith.addf %430, %435 : vector<1x120xf32>
    %437 = vector.extract_strided_slice %411 {offsets = [4, 0], sizes = [1, 80], strides = [1, 1]} : vector<5x80xf32> to vector<1x80xf32>
    %c4_481 = arith.constant 4 : index
    %c0_482 = arith.constant 0 : index
    %c0_483 = arith.constant 0 : index
    %438 = vector.load %arg4[%c4_481, %c0_482, %c0_483] : memref<5x80x120xbf16, #tpu.memory_space<vmem>>, vector<1x80x120xbf16>
    %439 = vector.shape_cast %438 : vector<1x80x120xbf16> to vector<80x120xbf16>
    %440 = arith.truncf %437 : vector<1x80xf32> to vector<1x80xbf16>
    %cst_484 = arith.constant dense<0.000000e+00> : vector<1x120xf32>
    %441 = tpu.matmul %440, %439, %cst_484 {dimension_numbers = #tpu.dot_dimension_numbers<[1], [0], [0], [1], [0, 0, 1, 1], [], []>} : vector<1x80xbf16>, vector<80x120xbf16>, vector<1x120xf32> -> vector<1x120xf32>
    %442 = arith.addf %436, %441 : vector<1x120xf32>
    %cst_485 = arith.constant 0.000000e+00 : f32
    %443 = vector.broadcast %cst_485 : f32 to vector<1x120xf32>
    %444 = arith.maximumf %442, %443 : vector<1x120xf32>
    %c0_486 = arith.constant 0 : index
    %c0_487 = arith.constant 0 : index
    %445 = vector.load %arg5[%c0_486, %c0_487] : memref<120x84xbf16, #tpu.memory_space<vmem>>, vector<120x84xbf16>
    %446 = arith.truncf %444 : vector<1x120xf32> to vector<1x120xbf16>
    %cst_488 = arith.constant dense<0.000000e+00> : vector<1x84xf32>
    %447 = tpu.matmul %446, %445, %cst_488 {dimension_numbers = #tpu.dot_dimension_numbers<[1], [0], [0], [1], [0, 0, 1, 1], [], []>} : vector<1x120xbf16>, vector<120x84xbf16>, vector<1x84xf32> -> vector<1x84xf32>
    %c0_489 = arith.constant 0 : index
    %c0_490 = arith.constant 0 : index
    %448 = vector.load %arg10[%c0_489, %c0_490] : memref<1x84xf32, #tpu.memory_space<vmem>>, vector<1x84xf32>
    %449 = arith.addf %447, %448 : vector<1x84xf32>
    %cst_491 = arith.constant 0.000000e+00 : f32
    %450 = vector.broadcast %cst_491 : f32 to vector<1x84xf32>
    %451 = arith.maximumf %449, %450 : vector<1x84xf32>
    %c0_492 = arith.constant 0 : index
    %c0_493 = arith.constant 0 : index
    %452 = vector.load %arg6[%c0_492, %c0_493] : memref<84x10xbf16, #tpu.memory_space<vmem>>, vector<84x10xbf16>
    %453 = arith.truncf %451 : vector<1x84xf32> to vector<1x84xbf16>
    %cst_494 = arith.constant dense<0.000000e+00> : vector<1x10xf32>
    %454 = tpu.matmul %453, %452, %cst_494 {dimension_numbers = #tpu.dot_dimension_numbers<[1], [0], [0], [1], [0, 0, 1, 1], [], []>} : vector<1x84xbf16>, vector<84x10xbf16>, vector<1x10xf32> -> vector<1x10xf32>
    %c0_495 = arith.constant 0 : index
    %c0_496 = arith.constant 0 : index
    %455 = vector.load %arg11[%c0_495, %c0_496] : memref<1x10xf32, #tpu.memory_space<vmem>>, vector<1x10xf32>
    %456 = arith.addf %454, %455 : vector<1x10xf32>
    %c0_497 = arith.constant 0 : index
    %c0_498 = arith.constant 0 : index
    %c0_499 = arith.constant 0 : index
    %457 = vector.load %arg12[%c0_497, %c0_498, %c0_499] : memref<1x1x10xf32, #tpu.memory_space<vmem>>, vector<1x1x10xf32>
    %458 = vector.shape_cast %457 : vector<1x1x10xf32> to vector<1x10xf32>
    %459 = vector.shape_cast %456 : vector<1x10xf32> to vector<1x1x10xf32>
    tpu.vector_store %arg12[%c0_497, %c0_498, %c0_499], %459 {strides = array<i32>} : memref<1x1x10xf32, #tpu.memory_space<vmem>>, vector<1x1x10xf32>,
    return
  }
  func.func @transform_0(%arg0: i32) -> (i32, i32, i32, i32) {
    %c0_i32 = arith.constant 0 : i32
    %c0_i32_0 = arith.constant 0 : i32
    %c0_i32_1 = arith.constant 0 : i32
    %c0_i32_2 = arith.constant 0 : i32
    return %arg0, %c0_i32, %c0_i32_0, %c0_i32_1 : i32, i32, i32, i32
  }
  func.func @transform_1(%arg0: i32) -> (i32, i32, i32, i32) {
    %c0_i32 = arith.constant 0 : i32
    %c0_i32_0 = arith.constant 0 : i32
    %c0_i32_1 = arith.constant 0 : i32
    %c0_i32_2 = arith.constant 0 : i32
    %c0_i32_3 = arith.constant 0 : i32
    return %c0_i32, %c0_i32_0, %c0_i32_1, %c0_i32_2 : i32, i32, i32, i32
  }
  func.func @transform_2(%arg0: i32) -> (i32, i32, i32, i32) {
    %c0_i32 = arith.constant 0 : i32
    %c0_i32_0 = arith.constant 0 : i32
    %c0_i32_1 = arith.constant 0 : i32
    %c0_i32_2 = arith.constant 0 : i32
    %c0_i32_3 = arith.constant 0 : i32
    return %c0_i32, %c0_i32_0, %c0_i32_1, %c0_i32_2 : i32, i32, i32, i32
  }
  func.func @transform_3(%arg0: i32) -> (i32, i32, i32) {
    %c0_i32 = arith.constant 0 : i32
    %c0_i32_0 = arith.constant 0 : i32
    %c0_i32_1 = arith.constant 0 : i32
    %c0_i32_2 = arith.constant 0 : i32
    return %c0_i32, %c0_i32_0, %c0_i32_1 : i32, i32, i32
  }
  func.func @transform_4(%arg0: i32) -> (i32, i32) {
    %c0_i32 = arith.constant 0 : i32
    %c0_i32_0 = arith.constant 0 : i32
    %c0_i32_1 = arith.constant 0 : i32
    return %c0_i32, %c0_i32_0 : i32, i32
  }
  func.func @transform_5(%arg0: i32) -> (i32, i32) {
    %c0_i32 = arith.constant 0 : i32
    %c0_i32_0 = arith.constant 0 : i32
    %c0_i32_1 = arith.constant 0 : i32
    return %c0_i32, %c0_i32_0 : i32, i32
  }
  func.func @transform_6(%arg0: i32) -> (i32, i32) {
    %c0_i32 = arith.constant 0 : i32
    %c0_i32_0 = arith.constant 0 : i32
    %c0_i32_1 = arith.constant 0 : i32
    return %c0_i32, %c0_i32_0 : i32, i32
  }
  func.func @transform_7(%arg0: i32) -> (i32, i32) {
    %c0_i32 = arith.constant 0 : i32
    %c0_i32_0 = arith.constant 0 : i32
    %c0_i32_1 = arith.constant 0 : i32
    return %c0_i32, %c0_i32_0 : i32, i32
  }
  func.func @transform_8(%arg0: i32) -> (i32, i32) {
    %c0_i32 = arith.constant 0 : i32
    %c0_i32_0 = arith.constant 0 : i32
    %c0_i32_1 = arith.constant 0 : i32
    return %c0_i32, %c0_i32_0 : i32, i32
  }
  func.func @transform_9(%arg0: i32) -> (i32, i32) {
    %c0_i32 = arith.constant 0 : i32
    %c0_i32_0 = arith.constant 0 : i32
    %c0_i32_1 = arith.constant 0 : i32
    return %c0_i32, %c0_i32_0 : i32, i32
  }
  func.func @transform_10(%arg0: i32) -> (i32, i32) {
    %c0_i32 = arith.constant 0 : i32
    %c0_i32_0 = arith.constant 0 : i32
    %c0_i32_1 = arith.constant 0 : i32
    return %c0_i32, %c0_i32_0 : i32, i32
  }
  func.func @transform_11(%arg0: i32) -> (i32, i32, i32) {
    %c0_i32 = arith.constant 0 : i32
    %c0_i32_0 = arith.constant 0 : i32
    %c0_i32_1 = arith.constant 0 : i32
    return %arg0, %c0_i32, %c0_i32_0 : i32, i32, i32
  }
}

</mosaic_0001>

<bundles_post_ra>
// kernel: lenet_forward_pallas.1
= control target key start
LH: loop header
LB: loop body
LE: loop exit
PB: predicated region body
PF: predicated region fallthrough
CT: control target
= control target key end

     0   :  { %s9243_s0 = inlined_call_operand.vmem [shape: bf16[2,4,8,96], index: 0, kind: input, shape index: {}]   ;;  %s9244_s1 = inlined_call_operand.vmem [shape: bf16[5,2,96,84], index: 1, kind: input, shape index: {}]   ;;  %s9245_s2 = inlined_call_operand.vmem [shape: bf16[5,2,84,80], index: 2, kind: input, shape index: {}]   ;;  %s9246_s3 = inlined_call_operand.vmem [shape: bf16[5,80,120], index: 3, kind: input, shape index: {}]   ;;  %s9247_s4 = inlined_call_operand.vmem [shape: bf16[120,84], index: 4, kind: input, shape index: {}]   ;;  %s9248_s5 = inlined_call_operand.vmem [shape: bf16[84,10], index: 5, kind: input, shape index: {}]   ;;  %s9249_s6 = inlined_call_operand.vmem [shape: f32[1,84], index: 6, kind: input, shape index: {}]   ;;  %s9250_s7 = inlined_call_operand.vmem [shape: f32[1,80], index: 7, kind: input, shape index: {}]   ;;  %s9251_s8 = inlined_call_operand.vmem [shape: f32[1,120], index: 8, kind: input, shape index: {}]   ;;  %s9252_s9 = inlined_call_operand.vmem [shape: f32[1,84], index: 9, kind: input, shape index: {}]   ;;  %s9253_s10 = inlined_call_operand.vmem [shape: f32[1,10], index: 10, kind: input, shape index: {}]   ;;  %s9254_s11 = inlined_call_operand.hbm [shape: f32[2,1,10], index: 11, kind: output, shape index: {}]  }
   0x1   :  { %9268 = sst [smem:[#allocation14_spill]] %s9243_s0 }
   0x2   :  { %16 = vsyncpa [#allocation3], 0 }
   0x3   :  { %18 = vsyncpa [#allocation3 + $0x1], 0  ;;  %s7078_s17 = smov 0   ;;  %s7080_s18 = smov 0  }
   0x4   :  { %s7082_s19 = smov 0   ;;  %s7084_s20 = smov 0  }
   0x5 LB: > { %s7099_s21 = sadd.s32 4294967295, %s7013_s20   ;;  %s4669_s22 = sadd.s32 4294967294, %s7013_s20   ;;  %s7013_s20 = sphi %s7084_s20, %s9296_s20   ;;  %s7009_s19 = sphi %s7082_s19, %s9295_s19   ;;  %s7005_s18 = sphi %s7080_s18, %s9294_s18   ;;  %s7001_s17 = sphi %s7078_s17, %s9293_s17  }
   0x6   : > { %s7103_s23 = sadd.s32 1, %s7013_s20   ;;  %s267_s24 = sadd.s32 1, %s7009_s19 }
   0x7   : > { %s264_s25 = ssub.s32 %s7013_s20, %s7103_s23  ;;  %p277_p0 = scmp.ne.s32.totalorder %s7009_s19, %s7005_s18 }
   0x8   : > { %p265_p1 = scmp.eq.s32.totalorder %s264_s25, 0  ;;  %p278_p2 = scmp.eq.s32.totalorder %s7099_s21, 1 }
   0x9   : > { %p283_p3 = scmp.ne.s32.totalorder %s7005_s18, %s7001_s17  ;;  %p284_p4 = scmp.eq.s32.totalorder %s4669_s22, 1 }
   0xa   : > { %s7114_s26 = scalar_select %p265_p1, %s7009_s19, %s267_s24  }
   0xb   : > { %p7116_p5 = por %p278_p2, %p277_p0  ;;  %p7120_p6 = por %p284_p4, %p283_p3 }
   0xc   : > { %p4672_p7 = scmp.ge.s32.totalorder %s7013_s20, 1  ;;  %p340_p8 = scmp.lt.s32.totalorder %s7013_s20, 3 }
   0xe   : > { %p341_p9 = pnand %p4672_p7, %p340_p8 }
  0x10   : > { %344 = sbr.rel (%p341_p9) target bundleno = 1781 (0x6f5), region = 64 }
  0x15   : > { %v6730_v0 = vld [vmem:[%s9244_s1 + $0x28] sm:$0xff]   ;;  %v9262_v1 = vmov 0.0   ;;  %v6732_v3 = vld [vmem:[%s9244_s1 + $0x20] sm:$0xff]   ;;  %vm7016_vm0 = vmmov 0   ;;  %v7154_v5 = vld [vmem:[%s9244_s1 + $0x18] sm:$0xff]   ;;  %p379_p10 = scmp.lt.s32.totalorder %s7099_s21, 1 }
  0x16   : > { %5623 = vmatprep.subr.bf16.mxu0 %v9262_v1  ;;  %5639 = vmatprep.subr.bf16.mxu1 %v9262_v1  ;;  %v7134_v2 = vld [vmem:[%s9244_s1 + $0x88] sm:$0xff]   ;;  %v7146_v4 = vld [vmem:[%s9244_s1 + $0x80] sm:$0xff]   ;;  %v7162_v6 = vld [vmem:[%s9244_s1 + $0x78] sm:$0xff]   ;;  %s9271_s0 = sld [smem:[#allocation14_spill]]  ;;  %vm434_vm1 = vcmask 785408   ;;  %vm2652_vm2 = vcmask 1041408  }
  0x17   : > { %5624 = vmatpush3.bf16.msra.mxu0 %v6730_v0  ;;  %5635 = vmatprep.mubr.msk.bf16.mxu0 %vm7016_vm0, %v9262_v1  ;;  %v7169_v7 = vld [vmem:[%s9244_s1 + $0x10] sm:$0xff]   ;;  %s380_s14 = scalar_select %p379_p10, %s7099_s21, 1  ;;  %v7184_v9 = vld [vmem:[%s9244_s1 + $0x8] sm:$0xff]   ;;  %v7203_v11 = vld [vmem:[%s9244_s1] sm:$0xff]   ;;  %vm2648_vm3 = vcmask 687104   ;;  %vm4004_vm4 = vcmask 654336  }
  0x18   : > { %5640 = vmatpush3.bf16.msra.mxu1 %v7134_v2  ;;  %5625 = vmatprep.subr.bf16.mxu0 %v9262_v1  ;;  %v7177_v8 = vld [vmem:[%s9244_s1 + $0x70] sm:$0xff]   ;;  %v7191_v10 = vld [vmem:[%s9244_s1 + $0x68] sm:$0xff]   ;;  %v7210_v12 = vld [vmem:[%s9244_s1 + $0x60] sm:$0xff]   ;;  %vm4462_vm5 = vcmask 1043456   ;;  %vm4458_vm6 = vcmask 982016   ;;  %s5153_s22 = sshll.u32 %s7099_s21, 4 }
  0x19   : > { %5641 = vmatprep.subr.bf16.mxu1 %v9262_v1  ;;  %5651 = vmatprep.mubr.msk.bf16.mxu1 %vm7016_vm0, %v9262_v1  ;;  %s5156_s25 = sshll.u32 %s380_s14, 4  ;;  %v7223_v15 = vld [vmem:[%s9244_s1 + $0xe8] sm:$0xff]   ;;  %v7241_v17 = vld [vmem:[%s9244_s1 + $0xe0] sm:$0xff]   ;;  %v7259_v19 = vld [vmem:[%s9244_s1 + $0xd8] sm:$0xff]   ;;  %s377_s14 = sand.u32 1, %s7005_s18   ;;  %vm4599_vm7 = vcmask 73728  }
  0x1a   : > { %v7230_v16 = vld [vmem:[%s9244_s1 + $0x148] sm:$0xff]   ;;  %v7248_v18 = vld [vmem:[%s9244_s1 + $0x140] sm:$0xff]   ;;  %v7266_v20 = vld [vmem:[%s9244_s1 + $0x138] sm:$0xff]   ;;  %s378_s24 = scalar_lea.vmem [#allocation2], %s377_s14  ;;  %s9202_s12 = scalar_lea.hbm %s9254_s11, %s5153_s22 }
  0x1b   : > { %5626 = vmatpush3.bf16.msra.mxu0 %v6732_v3  ;;  %v7273_v21 = vld [vmem:[%s9244_s1 + $0xd0] sm:$0xff]   ;;  %v7287_v23 = vld [vmem:[%s9244_s1 + $0xc8] sm:$0xff]   ;;  %v7301_v25 = vld [vmem:[%s9244_s1 + $0xc0] sm:$0xff]   ;;  %s4602_s13 = scalar_lea.sflag [#allocation3], %s377_s14  ;;  %s7017_s16 = smov [#allocation2]  }
  0x1c   : > { %5642 = vmatpush3.bf16.msra.mxu1 %v7146_v4  ;;  %5627 = vmatprep.subr.bf16.mxu0 %v9262_v1  ;;  %s7197_s15 = scalar_lea.vmem %s9271_s0, %s5156_s25  ;;  %v7280_v22 = vld [vmem:[%s9244_s1 + $0x130] sm:$0xff]   ;;  %v7294_v24 = vld [vmem:[%s9244_s1 + $0x128] sm:$0xff]   ;;  %v7308_v26 = vld [vmem:[%s9244_s1 + $0x120] sm:$0xff]   ;;  %s4614_s25 = sshll.u32 %s378_s24, 4  ;;  %s9204_s25 = int_to_ptr.vmem [resolvable:$true] %s4614_s25 }
  0x1d   : > { %5643 = vmatprep.subr.bf16.mxu1 %v9262_v1  ;;  %v7214_v13 = vld [vmem:[%s7197_s15] sm:$0xf]  ;;  %v7217_v14 = vld [vmem:[%s7197_s15 + $0x4] sm:$0xf]  ;;  %v7312_v27 = vld [vmem:[%s7197_s15 + $0x8] sm:$0xf] }
  0x1e   : > { %v7315_v28 = vld [vmem:[%s7197_s15 + $0xc] sm:$0xf]  ;;  %v7328_v30 = vld [vmem:[%s9244_s1 + $0x58] sm:$0xff]   ;;  %v7339_v31 = vld [vmem:[%s9244_s1 + $0x1a0] sm:$0xff]   ;;  %s6953_s21 = scalar_lea.vmem %s9204_s25, 16 }
  0x1f   : > { %5628 = vmatpush3.bf16.msra.mxu0 %v7154_v5  ;;  %v7321_v29 = vld [vmem:[%s9244_s1 + $0x1a8] sm:$0xff]   ;;  %v7346_v32 = vld [vmem:[%s9244_s1 + $0x50] sm:$0xff]   ;;  %v7357_v33 = vld [vmem:[%s9244_s1 + $0x198] sm:$0xff]   ;;  %p6954_p11 = scmp.ne.s32.totalorder %s9204_s25, %s6953_s21 }
  0x20   : > { %5644 = vmatpush3.bf16.msra.mxu1 %v7162_v6  ;;  %5629 = vmatprep.subr.bf16.mxu0 %v9262_v1  ;;  %v7364_v34 = vld [vmem:[%s9244_s1 + $0x48] sm:$0xff]   ;;  %v7371_v35 = vld [vmem:[%s9244_s1 + $0x190] sm:$0xff]   ;;  %v7378_v36 = vld [vmem:[%s9244_s1 + $0x40] sm:$0xff]  }
  0x21   : > { %5645 = vmatprep.subr.bf16.mxu1 %v9262_v1  ;;  %v7384_v37 = vld [vmem:[%s9244_s1 + $0x188] sm:$0xff]   ;;  %v7389_v38 = vld [vmem:[%s9244_s1 + $0x38] sm:$0xff]   ;;  %v7398_v39 = vld [vmem:[%s9244_s1 + $0x180] sm:$0xff]   ;;  %p6955_p12 = pnand %p6954_p11, %p7116_p5 }
  0x22   : > { %v7403_v40 = vld [vmem:[%s9244_s1 + $0x30] sm:$0xff]   ;;  %v7412_v41 = vld [vmem:[%s9244_s1 + $0xb8] sm:$0xff]   ;;  %v7444_v45 = vld [vmem:[%s9244_s1 + $0xa8] sm:$0xff]  }
  0x23   : > { %5630 = vmatpush3.bf16.msra.mxu0 %v7169_v7  ;;  %v7417_v42 = vld [vmem:[%s9244_s1 + $0x118] sm:$0xff]   ;;  %v7426_v43 = vld [vmem:[%s9244_s1 + $0xb0] sm:$0xff]   ;;  %v7451_v46 = vld [vmem:[%s9244_s1 + $0x108] sm:$0xff]   ;;  %p6956_p13 = pneg %p6955_p12 }
  0x24   : > { %5646 = vmatpush3.bf16.msra.mxu1 %v7177_v8  ;;  %5631 = vmatprep.subr.bf16.mxu0 %v9262_v1  ;;  %v7433_v44 = vld [vmem:[%s9244_s1 + $0x110] sm:$0xff]   ;;  %v7462_v47 = vld [vmem:[%s9244_s1 + $0xa0] sm:$0xff]   ;;  %v7476_v49 = vld [vmem:[%s9244_s1 + $0x98] sm:$0xff]  }
  0x25   : > { %5647 = vmatprep.subr.bf16.mxu1 %v9262_v1  ;;  %v7467_v48 = vld [vmem:[%s9244_s1 + $0x100] sm:$0xff]   ;;  %v7481_v50 = vld [vmem:[%s9244_s1 + $0xf8] sm:$0xff]   ;;  %v7490_v51 = vld [vmem:[%s9244_s1 + $0x90] sm:$0xff]  }
  0x26   : > { %v7495_v52 = vld [vmem:[%s9244_s1 + $0xf0] sm:$0xff]   ;;  %v7504_v53 = vld [vmem:[%s9244_s1 + $0x178] sm:$0xff]   ;;  %v7536_v57 = vld [vmem:[%s9244_s1 + $0x168] sm:$0xff]  }
  0x27   : > { %5632 = vmatpush3.bf16.msra.mxu0 %v7184_v9  ;;  %v7509_v54 = vld [vmem:[%s9244_s1 + $0x1d8] sm:$0xff]   ;;  %v7518_v55 = vld [vmem:[%s9244_s1 + $0x170] sm:$0xff]   ;;  %v7543_v58 = vld [vmem:[%s9244_s1 + $0x1c8] sm:$0xff]  }
  0x28   : > { %5648 = vmatpush3.bf16.msra.mxu1 %v7191_v10  ;;  %5633 = vmatprep.subr.bf16.mxu0 %v9262_v1  ;;  %v7525_v56 = vld [vmem:[%s9244_s1 + $0x1d0] sm:$0xff]   ;;  %v7554_v59 = vld [vmem:[%s9244_s1 + $0x160] sm:$0xff]   ;;  %v7568_v61 = vld [vmem:[%s9244_s1 + $0x158] sm:$0xff]  }
  0x29   : > { %5649 = vmatprep.subr.bf16.mxu1 %v9262_v1  ;;  %v7559_v60 = vld [vmem:[%s9244_s1 + $0x1c0] sm:$0xff]   ;;  %v7573_v62 = vld [vmem:[%s9244_s1 + $0x1b8] sm:$0xff]   ;;  %v7582_v63 = vld [vmem:[%s9244_s1 + $0x150] sm:$0xff]  }
  0x2a   : > { %v7587_v0 = vld [vmem:[%s9244_s1 + $0x1b0] sm:$0xff]   ;;  %v7604_v3 = vld [vmem:[%s9244_s1 + $0x28] sm:$0xff]  }
  0x2b   : > { %5634 = vmatpush3.bf16.msra.mxu0 %v7203_v11  ;;  %9272 = vst [vmem:[#allocation5_spill] sm:$0xff] %v7587_v0 }
  0x2c   : > { %5650 = vmatpush3.bf16.msra.mxu1 %v7210_v12  ;;  %5655 = vmatprep.subr.bf16.mxu0 %v9262_v1 }
  0x2d   : > { %5671 = vmatprep.subr.bf16.mxu1 %v9262_v1 }
  0x2e   : > { %5636 = vmatmul.mubr.msk.bf16.vlgmr.msra.gmra.mxu0 %vm434_vm1, %v7214_v13 }
  0x2f   : > { %5652 = vmatmul.mubr.msk.bf16.vlgmr.msra.gmra.mxu1 %vm434_vm1, %v7217_v14  ;;  %5656 = vmatpush3.bf16.msra.mxu0 %v7223_v15 }
  0x30   : > { %5672 = vmatpush3.bf16.msra.mxu1 %v7230_v16  ;;  %5657 = vmatprep.subr.bf16.mxu0 %v9262_v1 }
  0x31   : > { %5673 = vmatprep.subr.bf16.mxu1 %v9262_v1  ;;  %5667 = vmatprep.mubr.msk.bf16.mxu0 %vm7016_vm0, %v9262_v1 }
  0x32   : > { %5683 = vmatprep.mubr.msk.bf16.mxu1 %vm7016_vm0, %v9262_v1 }
  0x33   : > { %5658 = vmatpush3.bf16.msra.mxu0 %v7241_v17 }
  0x34   : > { %5674 = vmatpush3.bf16.msra.mxu1 %v7248_v18  ;;  %5659 = vmatprep.subr.bf16.mxu0 %v9262_v1 }
  0x35   : > { %5675 = vmatprep.subr.bf16.mxu1 %v9262_v1 }
  0x37   : > { %5660 = vmatpush3.bf16.msra.mxu0 %v7259_v19 }
  0x38   : > { %5676 = vmatpush3.bf16.msra.mxu1 %v7266_v20  ;;  %5661 = vmatprep.subr.bf16.mxu0 %v9262_v1 }
  0x39   : > { %5677 = vmatprep.subr.bf16.mxu1 %v9262_v1 }
  0x3b   : > { %5662 = vmatpush3.bf16.msra.mxu0 %v7273_v21 }
  0x3c   : > { %5678 = vmatpush3.bf16.msra.mxu1 %v7280_v22  ;;  %5663 = vmatprep.subr.bf16.mxu0 %v9262_v1 }
  0x3d   : > { %5679 = vmatprep.subr.bf16.mxu1 %v9262_v1 }
  0x3f   : > { %5664 = vmatpush3.bf16.msra.mxu0 %v7287_v23 }
  0x40   : > { %5680 = vmatpush3.bf16.msra.mxu1 %v7294_v24  ;;  %5665 = vmatprep.subr.bf16.mxu0 %v9262_v1 }
  0x41   : > { %5681 = vmatprep.subr.bf16.mxu1 %v9262_v1 }
  0x43   : > { %5666 = vmatpush3.bf16.msra.mxu0 %v7301_v25 }
  0x44   : > { %5682 = vmatpush3.bf16.msra.mxu1 %v7308_v26  ;;  %5687 = vmatprep.subr.bf16.mxu0 %v9262_v1 }
  0x45   : > { %5703 = vmatprep.subr.bf16.mxu1 %v9262_v1 }
  0x46   : > { %5668 = vmatmul.mubr.msk.bf16.vlgmr.msra.gmra.mxu0 %vm434_vm1, %v7312_v27 }
  0x47   : > { %5684 = vmatmul.mubr.msk.bf16.vlgmr.msra.gmra.mxu1 %vm434_vm1, %v7315_v28  ;;  %5688 = vmatpush3.bf16.msra.mxu0 %v7321_v29 }
  0x48   : > { %5704 = vmatpush3.bf16.msra.mxu1 %v7328_v30  ;;  %5689 = vmatprep.subr.bf16.mxu0 %v9262_v1 }
  0x49   : > { %5705 = vmatprep.subr.bf16.mxu1 %v9262_v1  ;;  %5699 = vmatprep.mubr.msk.bf16.mxu0 %vm7016_vm0, %v9262_v1 }
  0x4a   : > { %5715 = vmatprep.mubr.msk.bf16.mxu1 %vm7016_vm0, %v9262_v1 }
  0x4b   : > { %5690 = vmatpush3.bf16.msra.mxu0 %v7339_v31 }
  0x4c   : > { %5706 = vmatpush3.bf16.msra.mxu1 %v7346_v32  ;;  %5691 = vmatprep.subr.bf16.mxu0 %v9262_v1 }
  0x4d   : > { %5707 = vmatprep.subr.bf16.mxu1 %v9262_v1 }
  0x4f   : > { %5692 = vmatpush3.bf16.msra.mxu0 %v7357_v33 }
  0x50   : > { %5708 = vmatpush3.bf16.msra.mxu1 %v7364_v34  ;;  %5693 = vmatprep.subr.bf16.mxu0 %v9262_v1 }
  0x51   : > { %5709 = vmatprep.subr.bf16.mxu1 %v9262_v1 }
  0x53   : > { %5694 = vmatpush3.bf16.msra.mxu0 %v7371_v35 }
  0x54   : > { %5710 = vmatpush3.bf16.msra.mxu1 %v7378_v36  ;;  %5695 = vmatprep.subr.bf16.mxu0 %v9262_v1 }
  0x55   : > { %5711 = vmatprep.subr.bf16.mxu1 %v9262_v1 }
  0x57   : > { %5696 = vmatpush3.bf16.msra.mxu0 %v7384_v37 }
  0x58   : > { %5712 = vmatpush3.bf16.msra.mxu1 %v7389_v38  ;;  %5697 = vmatprep.subr.bf16.mxu0 %v9262_v1 }
  0x59   : > { %5713 = vmatprep.subr.bf16.mxu1 %v9262_v1 }
  0x5b   : > { %5698 = vmatpush3.bf16.msra.mxu0 %v7398_v39 }
  0x5c   : > { %5714 = vmatpush3.bf16.msra.mxu1 %v7403_v40  ;;  %5719 = vmatprep.subr.bf16.mxu0 %v9262_v1 }
  0x5d   : > { %5735 = vmatprep.subr.bf16.mxu1 %v9262_v1 }
  0x5e   : > { %5700 = vmatmul.mubr.msk.bf16.vlgmr.msra.gmra.mxu0 %vm434_vm1, %v7214_v13 }
  0x5f   : > { %5716 = vmatmul.mubr.msk.bf16.vlgmr.msra.gmra.mxu1 %vm434_vm1, %v7214_v13  ;;  %5720 = vmatpush3.bf16.msra.mxu0 %v7412_v41 }
  0x60   : > { %5736 = vmatpush3.bf16.msra.mxu1 %v7417_v42  ;;  %5721 = vmatprep.subr.bf16.mxu0 %v9262_v1 }
  0x61   : > { %5737 = vmatprep.subr.bf16.mxu1 %v9262_v1  ;;  %5731 = vmatprep.mubr.msk.bf16.mxu0 %vm7016_vm0, %v9262_v1 }
  0x62   : > { %5747 = vmatprep.mubr.msk.bf16.mxu1 %vm7016_vm0, %v9262_v1 }
  0x63   : > { %5722 = vmatpush3.bf16.msra.mxu0 %v7426_v43 }
  0x64   : > { %5738 = vmatpush3.bf16.msra.mxu1 %v7433_v44  ;;  %5723 = vmatprep.subr.bf16.mxu0 %v9262_v1 }
  0x65   : > { %5739 = vmatprep.subr.bf16.mxu1 %v9262_v1 }
  0x67   : > { %5724 = vmatpush3.bf16.msra.mxu0 %v7444_v45 }
  0x68   : > { %5740 = vmatpush3.bf16.msra.mxu1 %v7451_v46  ;;  %5725 = vmatprep.subr.bf16.mxu0 %v9262_v1 }
  0x69   : > { %5741 = vmatprep.subr.bf16.mxu1 %v9262_v1 }
  0x6b   : > { %5726 = vmatpush3.bf16.msra.mxu0 %v7462_v47 }
  0x6c   : > { %5742 = vmatpush3.bf16.msra.mxu1 %v7467_v48  ;;  %5727 = vmatprep.subr.bf16.mxu0 %v9262_v1 }
  0x6d   : > { %5743 = vmatprep.subr.bf16.mxu1 %v9262_v1 }
  0x6f   : > { %5728 = vmatpush3.bf16.msra.mxu0 %v7476_v49 }
  0x70   : > { %5744 = vmatpush3.bf16.msra.mxu1 %v7481_v50  ;;  %5729 = vmatprep.subr.bf16.mxu0 %v9262_v1 }
  0x71   : > { %5745 = vmatprep.subr.bf16.mxu1 %v9262_v1 }
  0x73   : > { %5730 = vmatpush3.bf16.msra.mxu0 %v7490_v51 }
  0x74   : > { %5746 = vmatpush3.bf16.msra.mxu1 %v7495_v52  ;;  %5751 = vmatprep.subr.bf16.mxu0 %v9262_v1 }
  0x75   : > { %5767 = vmatprep.subr.bf16.mxu1 %v9262_v1 }
  0x76   : > { %5732 = vmatmul.mubr.msk.bf16.vlgmr.msra.gmra.mxu0 %vm434_vm1, %v7217_v14 }
  0x77   : > { %5748 = vmatmul.mubr.msk.bf16.vlgmr.msra.gmra.mxu1 %vm434_vm1, %v7312_v27  ;;  %5752 = vmatpush3.bf16.msra.mxu0 %v7504_v53 }
  0x78   : > { %5768 = vmatpush3.bf16.msra.mxu1 %v7509_v54  ;;  %5753 = vmatprep.subr.bf16.mxu0 %v9262_v1 }
  0x79   : > { %5769 = vmatprep.subr.bf16.mxu1 %v9262_v1  ;;  %5763 = vmatprep.mubr.msk.bf16.mxu0 %vm7016_vm0, %v9262_v1 }
  0x7a   : > { %5779 = vmatprep.mubr.msk.bf16.mxu1 %vm7016_vm0, %v9262_v1 }
  0x7b   : > { %5754 = vmatpush3.bf16.msra.mxu0 %v7518_v55 }
  0x7c   : > { %5770 = vmatpush3.bf16.msra.mxu1 %v7525_v56  ;;  %5755 = vmatprep.subr.bf16.mxu0 %v9262_v1 }
  0x7d   : > { %5771 = vmatprep.subr.bf16.mxu1 %v9262_v1 }
  0x7f   : > { %5756 = vmatpush3.bf16.msra.mxu0 %v7536_v57 }
  0x80   : > { %5772 = vmatpush3.bf16.msra.mxu1 %v7543_v58  ;;  %5757 = vmatprep.subr.bf16.mxu0 %v9262_v1 }
  0x81   : > { %5773 = vmatprep.subr.bf16.mxu1 %v9262_v1 }
  0x83   : > { %5758 = vmatpush3.bf16.msra.mxu0 %v7554_v59 }
  0x84   : > { %5774 = vmatpush3.bf16.msra.mxu1 %v7559_v60  ;;  %5759 = vmatprep.subr.bf16.mxu0 %v9262_v1 }
  0x85   : > { %5775 = vmatprep.subr.bf16.mxu1 %v9262_v1 }
  0x87   : > { %5760 = vmatpush3.bf16.msra.mxu0 %v7568_v61 }
  0x88   : > { %5776 = vmatpush3.bf16.msra.mxu1 %v7573_v62  ;;  %5761 = vmatprep.subr.bf16.mxu0 %v9262_v1 }
  0x89   : > { %5777 = vmatprep.subr.bf16.mxu1 %v9262_v1 }
  0x8b   : > { %5762 = vmatpush3.bf16.msra.mxu0 %v7582_v63 }
  0x8c   : > { %5778 = vmatpush3.bf16.msra.mxu1 %v7587_v0  ;;  %5783 = vmatprep.subr.bf16.mxu0 %v9262_v1  ;;  %v7617_v0 = vld [vmem:[%s9244_s1 + $0x20] sm:$0xff]  }
  0x8d   : > { %5799 = vmatprep.subr.bf16.mxu1 %v9262_v1 }
  0x8e   : > { %5764 = vmatmul.mubr.msk.bf16.vlgmr.msra.gmra.mxu0 %vm434_vm1, %v7315_v28 }
  0x8f   : > { %5780 = vmatmul.mubr.msk.bf16.vlgmr.msra.gmra.mxu1 %vm434_vm1, %v7214_v13  ;;  %5784 = vmatpush3.bf16.msra.mxu0 %v7604_v3 }
  0x90   : > { %5800 = vmatpush3.bf16.msra.mxu1 %v7134_v2  ;;  %5785 = vmatprep.subr.bf16.mxu0 %v9262_v1  ;;  %v7704_v2 = vld [vmem:[%s7197_s15 + $0x4] sm:$0xf] }
  0x91   : > { %5801 = vmatprep.subr.bf16.mxu1 %v9262_v1  ;;  %5795 = vmatprep.mubr.msk.bf16.mxu0 %vm7016_vm0, %v9262_v1 }
  0x92   : > { %5811 = vmatprep.mubr.msk.bf16.mxu1 %vm7016_vm0, %v9262_v1 }
  0x93   : > { %5786 = vmatpush3.bf16.msra.mxu0 %v7617_v0 }
  0x94   : > { %5802 = vmatpush3.bf16.msra.mxu1 %v7146_v4  ;;  %5787 = vmatprep.subr.bf16.mxu0 %v9262_v1 }
  0x95   : > { %5803 = vmatprep.subr.bf16.mxu1 %v9262_v1 }
  0x97   : > { %5788 = vmatpush3.bf16.msra.mxu0 %v7154_v5 }
  0x98   : > { %5804 = vmatpush3.bf16.msra.mxu1 %v7162_v6  ;;  %5789 = vmatprep.subr.bf16.mxu0 %v9262_v1 }
  0x99   : > { %5805 = vmatprep.subr.bf16.mxu1 %v9262_v1 }
  0x9b   : > { %5790 = vmatpush3.bf16.msra.mxu0 %v7169_v7 }
  0x9c   : > { %5806 = vmatpush3.bf16.msra.mxu1 %v7177_v8  ;;  %5791 = vmatprep.subr.bf16.mxu0 %v9262_v1 }
  0x9d   : > { %5807 = vmatprep.subr.bf16.mxu1 %v9262_v1 }
  0x9f   : > { %5792 = vmatpush3.bf16.msra.mxu0 %v7184_v9 }
  0xa0   : > { %5808 = vmatpush3.bf16.msra.mxu1 %v7191_v10  ;;  %5793 = vmatprep.subr.bf16.mxu0 %v9262_v1 }
  0xa1   : > { %5809 = vmatprep.subr.bf16.mxu1 %v9262_v1 }
  0xa3   : > { %5794 = vmatpush3.bf16.msra.mxu0 %v7203_v11 }
  0xa4   : > { %5810 = vmatpush3.bf16.msra.mxu1 %v7210_v12  ;;  %5815 = vmatprep.subr.bf16.mxu0 %v9262_v1 }
  0xa5   : > { %5831 = vmatprep.subr.bf16.mxu1 %v9262_v1 }
  0xa6   : > { %5796 = vmatmul.mubr.msk.bf16.vlgmr.msra.gmra.mxu0 %vm434_vm1, %v7217_v14 }
  0xa7   : > { %5812 = vmatmul.mubr.msk.bf16.vlgmr.msra.gmra.mxu1 %vm434_vm1, %v7312_v27  ;;  %5816 = vmatpush3.bf16.msra.mxu0 %v7223_v15  ;;  %v7771_v15 = vld [vmem:[%s7197_s15] sm:$0xf] }
  0xa8   : > { %5832 = vmatpush3.bf16.msra.mxu1 %v7230_v16  ;;  %5817 = vmatprep.subr.bf16.mxu0 %v9262_v1 }
  0xa9   : > { %5833 = vmatprep.subr.bf16.mxu1 %v9262_v1  ;;  %5827 = vmatprep.mubr.msk.bf16.mxu0 %vm7016_vm0, %v9262_v1 }
  0xaa   : > { %5843 = vmatprep.mubr.msk.bf16.mxu1 %vm7016_vm0, %v9262_v1 }
  0xab   : > { %5818 = vmatpush3.bf16.msra.mxu0 %v7241_v17 }
  0xac   : > { %5834 = vmatpush3.bf16.msra.mxu1 %v7248_v18  ;;  %5819 = vmatprep.subr.bf16.mxu0 %v9262_v1  ;;  %v7781_v18 = vld [vmem:[%s9244_s1 + $0x88] sm:$0xff]  }
  0xad   : > { %5835 = vmatprep.subr.bf16.mxu1 %v9262_v1 }
  0xaf   : > { %5820 = vmatpush3.bf16.msra.mxu0 %v7259_v19 }
  0xb0   : > { %5836 = vmatpush3.bf16.msra.mxu1 %v7266_v20  ;;  %5821 = vmatprep.subr.bf16.mxu0 %v9262_v1 }
  0xb1   : > { %5837 = vmatprep.subr.bf16.mxu1 %v9262_v1 }
  0xb3   : > { %5822 = vmatpush3.bf16.msra.mxu0 %v7273_v21 }
  0xb4   : > { %5838 = vmatpush3.bf16.msra.mxu1 %v7280_v22  ;;  %5823 = vmatprep.subr.bf16.mxu0 %v9262_v1 }
  0xb5   : > { %5839 = vmatprep.subr.bf16.mxu1 %v9262_v1 }
  0xb7   : > { %5824 = vmatpush3.bf16.msra.mxu0 %v7287_v23 }
  0xb8   : > { %5840 = vmatpush3.bf16.msra.mxu1 %v7294_v24  ;;  %5825 = vmatprep.subr.bf16.mxu0 %v9262_v1  ;;  %v7794_v24 = vld [vmem:[%s9244_s1 + $0x80] sm:$0xff]  }
  0xb9   : > { %5841 = vmatprep.subr.bf16.mxu1 %v9262_v1 }
  0xbb   : > { %5826 = vmatpush3.bf16.msra.mxu0 %v7301_v25 }
  0xbc   : > { %5842 = vmatpush3.bf16.msra.mxu1 %v7308_v26  ;;  %5847 = vmatprep.subr.bf16.mxu0 %v9262_v1 }
  0xbd   : > { %5863 = vmatprep.subr.bf16.mxu1 %v9262_v1 }
  0xbe   : > { %5828 = vmatmul.mubr.msk.bf16.vlgmr.msra.gmra.mxu0 %vm434_vm1, %v7315_v28 }
  0xbf   : > { %5844 = vmatmul.mubr.msk.bf16.vlgmr.msra.gmra.mxu1 %vm434_vm1, %v7214_v13  ;;  %5848 = vmatpush3.bf16.msra.mxu0 %v7321_v29  ;;  %v9273_v13 = vld [vmem:[#allocation5_spill] sm:$0xff]  ;;  %v7816_v29 = vld [vmem:[%s9244_s1 + $0x10] sm:$0xff]  }
  0xc0   : > { %5864 = vmatpush3.bf16.msra.mxu1 %v7328_v30  ;;  %5849 = vmatprep.subr.bf16.mxu0 %v9262_v1  ;;  %v7822_v30 = vld [vmem:[%s9244_s1 + $0x70] sm:$0xff]  }
  0xc1   : > { %5865 = vmatprep.subr.bf16.mxu1 %v9262_v1  ;;  %5859 = vmatprep.mubr.msk.bf16.mxu0 %vm7016_vm0, %v9262_v1 }
  0xc2   : > { %5875 = vmatprep.mubr.msk.bf16.mxu1 %vm7016_vm0, %v9262_v1 }
  0xc3   : > { %5850 = vmatpush3.bf16.msra.mxu0 %v7339_v31  ;;  %v7830_v31 = vld [vmem:[%s9244_s1 + $0x8] sm:$0xff]  }
  0xc4   : > { %5866 = vmatpush3.bf16.msra.mxu1 %v7346_v32  ;;  %5851 = vmatprep.subr.bf16.mxu0 %v9262_v1  ;;  %v7836_v32 = vld [vmem:[%s9244_s1 + $0x68] sm:$0xff]  }
  0xc5   : > { %5867 = vmatprep.subr.bf16.mxu1 %v9262_v1 }
  0xc7   : > { %5852 = vmatpush3.bf16.msra.mxu0 %v7357_v33  ;;  %v7844_v33 = vld [vmem:[%s9244_s1] sm:$0xff]  }
  0xc8   : > { %5868 = vmatpush3.bf16.msra.mxu1 %v7364_v34  ;;  %5853 = vmatprep.subr.bf16.mxu0 %v9262_v1  ;;  %v7850_v34 = vld [vmem:[%s9244_s1 + $0x60] sm:$0xff]  }
  0xc9   : > { %5869 = vmatprep.subr.bf16.mxu1 %v9262_v1 }
  0xcb   : > { %5854 = vmatpush3.bf16.msra.mxu0 %v7371_v35 }
  0xcc   : > { %5870 = vmatpush3.bf16.msra.mxu1 %v7378_v36  ;;  %5855 = vmatprep.subr.bf16.mxu0 %v9262_v1  ;;  %v7856_v36 = vld [vmem:[%s7197_s15 + $0x8] sm:$0xf] }
  0xcd   : > { %5871 = vmatprep.subr.bf16.mxu1 %v9262_v1 }
  0xcf   : > { %5856 = vmatpush3.bf16.msra.mxu0 %v7384_v37 }
  0xd0   : > { %5872 = vmatpush3.bf16.msra.mxu1 %v7389_v38  ;;  %5857 = vmatprep.subr.bf16.mxu0 %v9262_v1 }
  0xd1   : > { %5873 = vmatprep.subr.bf16.mxu1 %v9262_v1 }
  0xd3   : > { %5858 = vmatpush3.bf16.msra.mxu0 %v7398_v39  ;;  %v7861_v39 = vld [vmem:[%s7197_s15 + $0xc] sm:$0xf]  ;;  %s6957_s15 = sshll.u32 %s7017_s16, 4  ;;  %s6958_s15 = int_to_ptr.vmem [resolvable:$false] %s6957_s15 }
  0xd4   : > { %5874 = vmatpush3.bf16.msra.mxu1 %v7403_v40  ;;  %5879 = vmatprep.subr.bf16.mxu0 %v9262_v1  ;;  %v7868_v40 = vld [vmem:[%s9244_s1 + $0xe8] sm:$0xff]   ;;  %s6959_s29 = scalar_lea.vmem %s6958_s15, 32  ;;  %p6960_p0 = scmp.lt.s32.totalorder %s9204_s25, %s6958_s15 }
  0xd5   : > { %5895 = vmatprep.subr.bf16.mxu1 %v9262_v1  ;;  %p6961_p1 = scmp.lt.s32.totalorder %s6959_s29, %s6953_s21 }
  0xd6   : > { %5860 = vmatmul.mubr.msk.bf16.vlgmr.msra.gmra.mxu0 %vm434_vm1, %v7704_v2 }
  0xd7   : > { %5876 = vmatmul.mubr.msk.bf16.vlgmr.msra.gmra.mxu1 %vm434_vm1, %v7704_v2  ;;  %5880 = vmatpush3.bf16.msra.mxu0 %v7412_v41  ;;  %v7874_v41 = vld [vmem:[%s9244_s1 + $0x148] sm:$0xff]   ;;  %p6962_p2 = por %p6961_p1, %p6960_p0 }
  0xd8   : > { %5896 = vmatpush3.bf16.msra.mxu1 %v7417_v42  ;;  %5881 = vmatprep.subr.bf16.mxu0 %v9262_v1 }
  0xd9   : > { %5897 = vmatprep.subr.bf16.mxu1 %v9262_v1  ;;  %5891 = vmatprep.mubr.msk.bf16.mxu0 %vm7016_vm0, %v9262_v1  ;;  %p6963_p3 = pnand %p6962_p2, %p6956_p13 }
  0xda   : > { %5907 = vmatprep.mubr.msk.bf16.mxu1 %vm7016_vm0, %v9262_v1 }
  0xdb   : > { %5882 = vmatpush3.bf16.msra.mxu0 %v7426_v43 }
  0xdc   : > { %5898 = vmatpush3.bf16.msra.mxu1 %v7433_v44  ;;  %5883 = vmatprep.subr.bf16.mxu0 %v9262_v1 }
  0xdd   : > { %5899 = vmatprep.subr.bf16.mxu1 %v9262_v1 }
  0xdf   : > { %5884 = vmatpush3.bf16.msra.mxu0 %v7444_v45 }
  0xe0   : > { %5900 = vmatpush3.bf16.msra.mxu1 %v7451_v46  ;;  %5885 = vmatprep.subr.bf16.mxu0 %v9262_v1 }
  0xe1   : > { %5901 = vmatprep.subr.bf16.mxu1 %v9262_v1 }
  0xe3   : > { %5886 = vmatpush3.bf16.msra.mxu0 %v7462_v47 }
  0xe4   : > { %5902 = vmatpush3.bf16.msra.mxu1 %v7467_v48  ;;  %5887 = vmatprep.subr.bf16.mxu0 %v9262_v1 }
  0xe5   : > { %5903 = vmatprep.subr.bf16.mxu1 %v9262_v1 }
  0xe7   : > { %5888 = vmatpush3.bf16.msra.mxu0 %v7476_v49 }
  0xe8   : > { %5904 = vmatpush3.bf16.msra.mxu1 %v7481_v50  ;;  %5889 = vmatprep.subr.bf16.mxu0 %v9262_v1 }
  0xe9   : > { %5905 = vmatprep.subr.bf16.mxu1 %v9262_v1 }
  0xeb   : > { %5890 = vmatpush3.bf16.msra.mxu0 %v7490_v51 }
  0xec   : > { %5906 = vmatpush3.bf16.msra.mxu1 %v7495_v52  ;;  %5911 = vmatprep.subr.bf16.mxu0 %v9262_v1 }
  0xed   : > { %5927 = vmatprep.subr.bf16.mxu1 %v9262_v1 }
  0xee   : > { %v472_v4 = vpop.f32.mrf.mxu0  ;;  %5892 = vmatmul.mubr.msk.bf16.vlgmr.msra.gmra.mxu0 %vm434_vm1, %v7312_v27  ;;  %v7802_v27 = vld [vmem:[%s9244_s1 + $0x18] sm:$0xff]  }
  0xef   : > { %v566_v5 = vpop.f32.mrf.mxu1  ;;  %5908 = vmatmul.mubr.msk.bf16.vlgmr.msra.gmra.mxu1 %vm434_vm1, %v7315_v28  ;;  %5912 = vmatpush3.bf16.msra.mxu0 %v7504_v53  ;;  %v7808_v28 = vld [vmem:[%s9244_s1 + $0x78] sm:$0xff]  }
  0xf0   : > { %v572_v6 = vadd.f32 %v566_v5, %v472_v4  ;;  %5928 = vmatpush3.bf16.msra.mxu1 %v7509_v54  ;;  %v5637_v7 = vpop.f32.mrf.mxu0  ;;  %5913 = vmatprep.subr.bf16.mxu0 %v9262_v1 }
  0xf1   : > { %v5653_v8 = vpop.f32.mrf.mxu1  ;;  %5929 = vmatprep.subr.bf16.mxu1 %v9262_v1  ;;  %5923 = vmatprep.mubr.msk.bf16.mxu0 %vm7016_vm0, %v9262_v1  ;;  %v7888_v7 = vld [vmem:[%s9244_s1 + $0xe0] sm:$0xff]  }
  0xf2   : > { %v475_v9 = vpop.f32.mrf.mxu0  ;;  %5939 = vmatprep.mubr.msk.bf16.mxu1 %vm7016_vm0, %v9262_v1  ;;  %v7894_v8 = vld [vmem:[%s9244_s1 + $0x140] sm:$0xff]  }
  0xf3   : > { %v569_v10 = vpop.f32.mrf.mxu1  ;;  %5914 = vmatpush3.bf16.msra.mxu0 %v7518_v55 }
  0xf4   : > { %5930 = vmatpush3.bf16.msra.mxu1 %v7525_v56  ;;  %v5638_v11 = vpop.f32.mrf.mxu0  ;;  %5915 = vmatprep.subr.bf16.mxu0 %v9262_v1 }
  0xf5   : > { %v5654_v12 = vpop.f32.mrf.mxu1  ;;  %5931 = vmatprep.subr.bf16.mxu1 %v9262_v1  ;;  %v7902_v11 = vld [vmem:[%s9244_s1 + $0xd8] sm:$0xff]  }
  0xf6   : > { %v7908_v12 = vld [vmem:[%s9244_s1 + $0x138] sm:$0xff]  }
  0xf7   : > { %5916 = vmatpush3.bf16.msra.mxu0 %v7536_v57 }
  0xf8   : > { %5932 = vmatpush3.bf16.msra.mxu1 %v7543_v58  ;;  %5917 = vmatprep.subr.bf16.mxu0 %v9262_v1 }
  0xf9   : > { %5933 = vmatprep.subr.bf16.mxu1 %v9262_v1 }
  0xfb   : > { %5918 = vmatpush3.bf16.msra.mxu0 %v7554_v59 }
  0xfc   : > { %5934 = vmatpush3.bf16.msra.mxu1 %v7559_v60  ;;  %5919 = vmatprep.subr.bf16.mxu0 %v9262_v1 }
  0xfd   : > { %5935 = vmatprep.subr.bf16.mxu1 %v9262_v1 }
  0xff   : > { %5920 = vmatpush3.bf16.msra.mxu0 %v7568_v61 }
 0x100   : > { %5936 = vmatpush3.bf16.msra.mxu1 %v7573_v62  ;;  %5921 = vmatprep.subr.bf16.mxu0 %v9262_v1 }
 0x101   : > { %5937 = vmatprep.subr.bf16.mxu1 %v9262_v1 }
 0x103   : > { %5922 = vmatpush3.bf16.msra.mxu0 %v7582_v63 }
 0x104   : > { %5938 = vmatpush3.bf16.msra.mxu1 %v9273_v13  ;;  %5943 = vmatprep.subr.bf16.mxu0 %v9262_v1 }
 0x105   : > { %5959 = vmatprep.subr.bf16.mxu1 %v9262_v1 }
 0x106   : > { %v661_v14 = vpop.f32.mrf.mxu0  ;;  %5924 = vmatmul.mubr.msk.bf16.vlgmr.msra.gmra.mxu0 %vm434_vm1, %v7771_v15 }
 0x107   : > { %v667_v16 = vadd.f32 %v661_v14, %v572_v6  ;;  %v756_v17 = vpop.f32.mrf.mxu1  ;;  %5940 = vmatmul.mubr.msk.bf16.vlgmr.msra.gmra.mxu1 %vm434_vm1, %v7704_v2  ;;  %5944 = vmatpush3.bf16.msra.mxu0 %v7604_v3  ;;  %v7916_v14 = vld [vmem:[%s9244_s1 + $0xd0] sm:$0xff]  }
 0x108   : > { %5960 = vmatpush3.bf16.msra.mxu1 %v7781_v18  ;;  %v5669_v19 = vpop.f32.mrf.mxu0  ;;  %5945 = vmatprep.subr.bf16.mxu0 %v9262_v1 }
 0x109   : > { %v762_v20 = vadd.f32 %v756_v17, %v667_v16  ;;  %v5685_v21 = vpop.f32.mrf.mxu1  ;;  %5961 = vmatprep.subr.bf16.mxu1 %v9262_v1  ;;  %5955 = vmatprep.mubr.msk.bf16.mxu0 %vm7016_vm0, %v9262_v1  ;;  %v7922_v16 = vld [vmem:[%s9244_s1 + $0x130] sm:$0xff]   ;;  %v7930_v17 = vld [vmem:[%s9244_s1 + $0xc8] sm:$0xff]  }
 0x10a   : > { %v664_v22 = vpop.f32.mrf.mxu0  ;;  %5971 = vmatprep.mubr.msk.bf16.mxu1 %vm7016_vm0, %v9262_v1  ;;  %v7936_v19 = vld [vmem:[%s9244_s1 + $0x128] sm:$0xff]   ;;  %v7950_v21 = vld [vmem:[%s9244_s1 + $0x120] sm:$0xff]  }
 0x10b   : > { %v759_v23 = vpop.f32.mrf.mxu1  ;;  %5946 = vmatpush3.bf16.msra.mxu0 %v7617_v0 }
 0x10c   : > { %5962 = vmatpush3.bf16.msra.mxu1 %v7794_v24  ;;  %v5670_v25 = vpop.f32.mrf.mxu0  ;;  %5947 = vmatprep.subr.bf16.mxu0 %v9262_v1 }
 0x10d   : > { %v5686_v26 = vpop.f32.mrf.mxu1  ;;  %5963 = vmatprep.subr.bf16.mxu1 %v9262_v1 }
 0x10e   : > { %v7962_v26 = vld [vmem:[%s9244_s1 + $0x1a8] sm:$0xff]  }
 0x10f   : > { %5948 = vmatpush3.bf16.msra.mxu0 %v7802_v27 }
 0x110   : > { %5964 = vmatpush3.bf16.msra.mxu1 %v7808_v28  ;;  %5949 = vmatprep.subr.bf16.mxu0 %v9262_v1 }
 0x111   : > { %5965 = vmatprep.subr.bf16.mxu1 %v9262_v1 }
 0x113   : > { %5950 = vmatpush3.bf16.msra.mxu0 %v7816_v29 }
 0x114   : > { %5966 = vmatpush3.bf16.msra.mxu1 %v7822_v30  ;;  %5951 = vmatprep.subr.bf16.mxu0 %v9262_v1 }
 0x115   : > { %5967 = vmatprep.subr.bf16.mxu1 %v9262_v1 }
 0x117   : > { %5952 = vmatpush3.bf16.msra.mxu0 %v7830_v31 }
 0x118   : > { %5968 = vmatpush3.bf16.msra.mxu1 %v7836_v32  ;;  %5953 = vmatprep.subr.bf16.mxu0 %v9262_v1 }
 0x119   : > { %5969 = vmatprep.subr.bf16.mxu1 %v9262_v1 }
 0x11b   : > { %5954 = vmatpush3.bf16.msra.mxu0 %v7844_v33 }
 0x11c   : > { %5970 = vmatpush3.bf16.msra.mxu1 %v7850_v34  ;;  %5975 = vmatprep.subr.bf16.mxu0 %v9262_v1 }
 0x11d   : > { %5991 = vmatprep.subr.bf16.mxu1 %v9262_v1 }
 0x11e   : > { %v846_v35 = vpop.f32.mrf.mxu0  ;;  %5956 = vmatmul.mubr.msk.bf16.vlgmr.msra.gmra.mxu0 %vm434_vm1, %v7856_v36 }
 0x11f   : > { %v853_v37 = vrot.slane %v846_v35, 1  ;;  %v939_v38 = vpop.f32.mrf.mxu1  ;;  %5972 = vmatmul.mubr.msk.bf16.vlgmr.msra.gmra.mxu1 %vm434_vm1, %v7861_v39  ;;  %5976 = vmatpush3.bf16.msra.mxu0 %v7868_v40  ;;  %v7968_v35 = vld [vmem:[%s9244_s1 + $0x58] sm:$0xff]  }
 0x120   : > { %5992 = vmatpush3.bf16.msra.mxu1 %v7874_v41  ;;  %v5701_v42 = vpop.f32.mrf.mxu0  ;;  %5977 = vmatprep.subr.bf16.mxu0 %v9262_v1 }
 0x121   : > { %v7878_v43 = vadd.f32 %v853_v37, %v762_v20  ;;  %v5717_v4 = vpop.f32.mrf.mxu1  ;;  %5993 = vmatprep.subr.bf16.mxu1 %v9262_v1  ;;  %5987 = vmatprep.mubr.msk.bf16.mxu0 %vm7016_vm0, %v9262_v1  ;;  %v7944_v20 = vld [vmem:[%s9244_s1 + $0xc0] sm:$0xff]  }
 0x122   : > { %v849_v5 = vpop.f32.mrf.mxu0  ;;  %6003 = vmatprep.mubr.msk.bf16.mxu1 %vm7016_vm0, %v9262_v1 }
 0x123   : > { %v942_v6 = vpop.f32.mrf.mxu1  ;;  %5978 = vmatpush3.bf16.msra.mxu0 %v7888_v7 }
 0x124   : > { %5994 = vmatpush3.bf16.msra.mxu1 %v7894_v8  ;;  %v5702_v9 = vpop.f32.mrf.mxu0  ;;  %5979 = vmatprep.subr.bf16.mxu0 %v9262_v1  ;;  %v7980_v6 = vld [vmem:[%s9244_s1 + $0x1a0] sm:$0xff]  }
 0x125   : > { %v5718_v10 = vpop.f32.mrf.mxu1  ;;  %5995 = vmatprep.subr.bf16.mxu1 %v9262_v1  ;;  %v7986_v9 = vld [vmem:[%s9244_s1 + $0x50] sm:$0xff]  }
 0x127   : > { %5980 = vmatpush3.bf16.msra.mxu0 %v7902_v11 }
 0x128   : > { %5996 = vmatpush3.bf16.msra.mxu1 %v7908_v12  ;;  %5981 = vmatprep.subr.bf16.mxu0 %v9262_v1 }
 0x129   : > { %5997 = vmatprep.subr.bf16.mxu1 %v9262_v1 }
 0x12b   : > { %5982 = vmatpush3.bf16.msra.mxu0 %v7916_v14 }
 0x12c   : > { %5998 = vmatpush3.bf16.msra.mxu1 %v7922_v16  ;;  %5983 = vmatprep.subr.bf16.mxu0 %v9262_v1 }
 0x12d   : > { %5999 = vmatprep.subr.bf16.mxu1 %v9262_v1 }
 0x12f   : > { %5984 = vmatpush3.bf16.msra.mxu0 %v7930_v17 }
 0x130   : > { %6000 = vmatpush3.bf16.msra.mxu1 %v7936_v19  ;;  %5985 = vmatprep.subr.bf16.mxu0 %v9262_v1 }
 0x131   : > { %6001 = vmatprep.subr.bf16.mxu1 %v9262_v1 }
 0x133   : > { %5986 = vmatpush3.bf16.msra.mxu0 %v7944_v20 }
 0x134   : > { %6002 = vmatpush3.bf16.msra.mxu1 %v7950_v21  ;;  %6007 = vmatprep.subr.bf16.mxu0 %v9262_v1 }
 0x135   : > { %6023 = vmatprep.subr.bf16.mxu1 %v9262_v1 }
 0x136   : > { %v1028_v22 = vpop.f32.mrf.mxu0  ;;  %5988 = vmatmul.mubr.msk.bf16.vlgmr.msra.gmra.mxu0 %vm434_vm1, %v7771_v15 }
 0x137   : > { %v1034_v23 = vadd.f32 %v1028_v22, %v939_v38  ;;  %v1118_v25 = vpop.f32.mrf.mxu1  ;;  %6004 = vmatmul.mubr.msk.bf16.vlgmr.msra.gmra.mxu1 %vm434_vm1, %v7704_v2  ;;  %6008 = vmatpush3.bf16.msra.mxu0 %v7962_v26 }
 0x138   : > { %6024 = vmatpush3.bf16.msra.mxu1 %v7968_v35  ;;  %v5733_v37 = vpop.f32.mrf.mxu0  ;;  %6009 = vmatprep.subr.bf16.mxu0 %v9262_v1 }
 0x139   : > { %v1124_v38 = vadd.f32 %v1118_v25, %v1034_v23  ;;  %v5749_v42 = vpop.f32.mrf.mxu1  ;;  %6025 = vmatprep.subr.bf16.mxu1 %v9262_v1  ;;  %6019 = vmatprep.mubr.msk.bf16.mxu0 %vm7016_vm0, %v9262_v1  ;;  %v7994_v23 = vld [vmem:[%s9244_s1 + $0x198] sm:$0xff]   ;;  %v8000_v25 = vld [vmem:[%s9244_s1 + $0x48] sm:$0xff]   ;;  %v8008_v37 = vld [vmem:[%s9244_s1 + $0x190] sm:$0xff]  }
 0x13a   : > { %v1031_v4 = vpop.f32.mrf.mxu0  ;;  %6035 = vmatprep.mubr.msk.bf16.mxu1 %vm7016_vm0, %v9262_v1  ;;  %9274 = vst [vmem:[#allocation5_spill] sm:$0xff] %v8000_v25  ;;  %9275 = vst [vmem:[#allocation6_spill] sm:$0xff] %v8008_v37  ;;  %v8014_v42 = vld [vmem:[%s9244_s1 + $0x40] sm:$0xff]  }
 0x13b   : > { %v1121_v5 = vpop.f32.mrf.mxu1  ;;  %6010 = vmatpush3.bf16.msra.mxu0 %v7980_v6  ;;  %9276 = vst [vmem:[#allocation7_spill] sm:$0xff] %v8014_v42  ;;  %v8022_v4 = vld [vmem:[%s9244_s1 + $0x188] sm:$0xff]  }
 0x13c   : > { %6026 = vmatpush3.bf16.msra.mxu1 %v7986_v9  ;;  %v5734_v10 = vpop.f32.mrf.mxu0  ;;  %6011 = vmatprep.subr.bf16.mxu0 %v9262_v1  ;;  %9277 = vst [vmem:[#allocation8_spill] sm:$0xff] %v8022_v4  ;;  %v8028_v5 = vld [vmem:[%s9244_s1 + $0x38] sm:$0xff]  }
 0x13d   : > { %v5750_v22 = vpop.f32.mrf.mxu1  ;;  %6027 = vmatprep.subr.bf16.mxu1 %v9262_v1  ;;  %9278 = vst [vmem:[#allocation9_spill] sm:$0xff] %v8028_v5  ;;  %v8036_v10 = vld [vmem:[%s9244_s1 + $0x180] sm:$0xff]  }
 0x13e   : > { %9279 = vst [vmem:[#allocation10_spill] sm:$0xff] %v8036_v10  ;;  %v8042_v22 = vld [vmem:[%s9244_s1 + $0x30] sm:$0xff]  }
 0x13f   : > { %6012 = vmatpush3.bf16.msra.mxu0 %v7994_v23  ;;  %9280 = vst [vmem:[#allocation11_spill] sm:$0xff] %v8042_v22 }
 0x140   : > { %6028 = vmatpush3.bf16.msra.mxu1 %v8000_v25  ;;  %6013 = vmatprep.subr.bf16.mxu0 %v9262_v1 }
 0x141   : > { %6029 = vmatprep.subr.bf16.mxu1 %v9262_v1 }
 0x143   : > { %6014 = vmatpush3.bf16.msra.mxu0 %v8008_v37 }
 0x144   : > { %6030 = vmatpush3.bf16.msra.mxu1 %v8014_v42  ;;  %6015 = vmatprep.subr.bf16.mxu0 %v9262_v1 }
 0x145   : > { %6031 = vmatprep.subr.bf16.mxu1 %v9262_v1 }
 0x147   : > { %6016 = vmatpush3.bf16.msra.mxu0 %v8022_v4 }
 0x148   : > { %6032 = vmatpush3.bf16.msra.mxu1 %v8028_v5  ;;  %6017 = vmatprep.subr.bf16.mxu0 %v9262_v1 }
 0x149   : > { %6033 = vmatprep.subr.bf16.mxu1 %v9262_v1 }
 0x14b   : > { %6018 = vmatpush3.bf16.msra.mxu0 %v8036_v10  ;;  %v8054_v10 = vld [vmem:[%s9244_s1 + $0xb8] sm:$0xff]  }
 0x14c   : > { %6034 = vmatpush3.bf16.msra.mxu1 %v8042_v22  ;;  %6039 = vmatprep.subr.bf16.mxu0 %v9262_v1  ;;  %9281 = vst [vmem:[#allocation12_spill] sm:$0xff] %v8054_v10 }
 0x14d   : > { %6055 = vmatprep.subr.bf16.mxu1 %v9262_v1  ;;  %v8060_v1 = vld [vmem:[%s9244_s1 + $0x118] sm:$0xff]  }
 0x14e   : > { %v1208_v5 = vpop.f32.mrf.mxu0  ;;  %6020 = vmatmul.mubr.msk.bf16.vlgmr.msra.gmra.mxu0 %vm434_vm1, %v7856_v36  ;;  %9282 = vst [vmem:[#allocation13_spill] sm:$0xff] %v8060_v1 }
 0x14f   : > { %v1214_v4 = vadd.f32 %v1208_v5, %v1124_v38  ;;  %v1298_v42 = vpop.f32.mrf.mxu1  ;;  %6036 = vmatmul.mubr.msk.bf16.vlgmr.msra.gmra.mxu1 %vm434_vm1, %v7856_v36  ;;  %6040 = vmatpush3.bf16.msra.mxu0 %v8054_v10  ;;  %v9283_v5 = vmov 0.0  }
 0x150   : > { %v1305_v22 = vrot.slane %v1298_v42, 1  ;;  %6056 = vmatpush3.bf16.msra.mxu1 %v8060_v1  ;;  %v5765_v38 = vpop.f32.mrf.mxu0  ;;  %6041 = vmatprep.subr.bf16.mxu0 %v9283_v5  ;;  %v8074_v1 = vld [vmem:[%s9244_s1 + $0xb0] sm:$0xff]  }
 0x151   : > { %v5781_v37 = vpop.f32.mrf.mxu1  ;;  %6057 = vmatprep.subr.bf16.mxu1 %v9283_v5  ;;  %6051 = vmatprep.mubr.msk.bf16.mxu0 %vm7016_vm0, %v9283_v5 }
 0x152   : > { %v8067_v25 = vadd.f32 %v1305_v22, %v1214_v4  ;;  %v1211_v10 = vpop.f32.mrf.mxu0  ;;  %6067 = vmatprep.mubr.msk.bf16.mxu1 %vm7016_vm0, %v9283_v5 }
 0x153   : > { %v1301_v42 = vpop.f32.mrf.mxu1  ;;  %6042 = vmatpush3.bf16.msra.mxu0 %v8074_v1  ;;  %v9291_v10 = vld [vmem:[#allocation12_spill] sm:$0xff] }
 0x154   : > { %v1728_v37 = vmax.f32 %v7878_v43, %v8067_v25  ;;  %6058 = vmatpush3.bf16.msra.mxu1 %v7433_v44  ;;  %v5766_v38 = vpop.f32.mrf.mxu0  ;;  %6043 = vmatprep.subr.bf16.mxu0 %v9283_v5  ;;  %v6935_v43 = vld [vmem:[%s9244_s1 + $0xa0] sm:$0xff]  }
 0x155   : > { %v5782_v4 = vpop.f32.mrf.mxu1  ;;  %6059 = vmatprep.subr.bf16.mxu1 %v9283_v5  ;;  %v9292_v42 = vld [vmem:[#allocation13_spill] sm:$0xff] }
 0x156   : > { %v6936_v25 = vld [vmem:[%s9244_s1 + $0x100] sm:$0xff]  }
 0x157   : > { %6044 = vmatpush3.bf16.msra.mxu0 %v7444_v45 }
 0x158   : > { %6060 = vmatpush3.bf16.msra.mxu1 %v7451_v46  ;;  %6045 = vmatprep.subr.bf16.mxu0 %v9283_v5 }
 0x159   : > { %6061 = vmatprep.subr.bf16.mxu1 %v9283_v5 }
 0x15b   : > { %6046 = vmatpush3.bf16.msra.mxu0 %v7462_v47 }
 0x15c   : > { %6062 = vmatpush3.bf16.msra.mxu1 %v7467_v48  ;;  %6047 = vmatprep.subr.bf16.mxu0 %v9283_v5 }
 0x15d   : > { %6063 = vmatprep.subr.bf16.mxu1 %v9283_v5 }
 0x15f   : > { %6048 = vmatpush3.bf16.msra.mxu0 %v7476_v49 }
 0x160   : > { %6064 = vmatpush3.bf16.msra.mxu1 %v7481_v50  ;;  %6049 = vmatprep.subr.bf16.mxu0 %v9283_v5 }
 0x161   : > { %6065 = vmatprep.subr.bf16.mxu1 %v9283_v5 }
 0x163   : > { %6050 = vmatpush3.bf16.msra.mxu0 %v7490_v51 }
 0x164   : > { %6066 = vmatpush3.bf16.msra.mxu1 %v7495_v52  ;;  %6071 = vmatprep.subr.bf16.mxu0 %v9283_v5 }
 0x165   : > { %6087 = vmatprep.subr.bf16.mxu1 %v9283_v5 }
 0x166   : > { %v1342_v44 = vpop.f32.mrf.mxu0  ;;  %6052 = vmatmul.mubr.msk.bf16.vlgmr.msra.gmra.mxu0 %vm434_vm1, %v7861_v39 }
 0x167   : > { %v1382_v45 = vpop.f32.mrf.mxu1  ;;  %6068 = vmatmul.mubr.msk.bf16.vlgmr.msra.gmra.mxu1 %vm434_vm1, %v7771_v15  ;;  %6072 = vmatpush3.bf16.msra.mxu0 %v7504_v53 }
 0x168   : > { %v1388_v46 = vadd.f32 %v1382_v45, %v1342_v44  ;;  %6088 = vmatpush3.bf16.msra.mxu1 %v7509_v54  ;;  %v5797_v47 = vpop.f32.mrf.mxu0  ;;  %6073 = vmatprep.subr.bf16.mxu0 %v9283_v5 }
 0x169   : > { %v5813_v48 = vpop.f32.mrf.mxu1  ;;  %6089 = vmatprep.subr.bf16.mxu1 %v9283_v5  ;;  %6083 = vmatprep.mubr.msk.bf16.mxu0 %vm7016_vm0, %v9283_v5 }
 0x16a   : > { %v1345_v49 = vpop.f32.mrf.mxu0  ;;  %6099 = vmatprep.mubr.msk.bf16.mxu1 %vm7016_vm0, %v9283_v5  ;;  %v6932_v48 = vld [vmem:[%s9244_s1 + $0x110] sm:$0xff]  }
 0x16b   : > { %v1385_v50 = vpop.f32.mrf.mxu1  ;;  %6074 = vmatpush3.bf16.msra.mxu0 %v7518_v55 }
 0x16c   : > { %6090 = vmatpush3.bf16.msra.mxu1 %v7525_v56  ;;  %v5798_v51 = vpop.f32.mrf.mxu0  ;;  %6075 = vmatprep.subr.bf16.mxu0 %v9283_v5 }
 0x16d   : > { %v5814_v52 = vpop.f32.mrf.mxu1  ;;  %6091 = vmatprep.subr.bf16.mxu1 %v9283_v5 }
 0x16f   : > { %6076 = vmatpush3.bf16.msra.mxu0 %v7536_v57 }
 0x170   : > { %6092 = vmatpush3.bf16.msra.mxu1 %v7543_v58  ;;  %6077 = vmatprep.subr.bf16.mxu0 %v9283_v5 }
 0x171   : > { %6093 = vmatprep.subr.bf16.mxu1 %v9283_v5 }
 0x173   : > { %6078 = vmatpush3.bf16.msra.mxu0 %v7554_v59 }
 0x174   : > { %6094 = vmatpush3.bf16.msra.mxu1 %v7559_v60  ;;  %6079 = vmatprep.subr.bf16.mxu0 %v9283_v5 }
 0x175   : > { %6095 = vmatprep.subr.bf16.mxu1 %v9283_v5 }
 0x177   : > { %6080 = vmatpush3.bf16.msra.mxu0 %v7568_v61 }
 0x178   : > { %6096 = vmatpush3.bf16.msra.mxu1 %v7573_v62  ;;  %6081 = vmatprep.subr.bf16.mxu0 %v9283_v5 }
 0x179   : > { %6097 = vmatprep.subr.bf16.mxu1 %v9283_v5 }
 0x17b   : > { %6082 = vmatpush3.bf16.msra.mxu0 %v7582_v63 }
 0x17c   : > { %6098 = vmatpush3.bf16.msra.mxu1 %v9273_v13  ;;  %6103 = vmatprep.subr.bf16.mxu0 %v9283_v5 }
 0x17d   : > { %6119 = vmatprep.subr.bf16.mxu1 %v9283_v5 }
 0x17e   : > { %v1423_v53 = vpop.f32.mrf.mxu0  ;;  %6084 = vmatmul.mubr.msk.bf16.vlgmr.msra.gmra.mxu0 %vm434_vm1, %v7704_v2 }
 0x17f   : > { %v1429_v54 = vadd.f32 %v1423_v53, %v1388_v46  ;;  %v1464_v55 = vpop.f32.mrf.mxu1  ;;  %6100 = vmatmul.mubr.msk.bf16.vlgmr.msra.gmra.mxu1 %vm434_vm1, %v7856_v36  ;;  %6104 = vmatpush3.bf16.msra.mxu0 %v7604_v3  ;;  %v6934_v53 = vld [vmem:[%s9244_s1 + $0x108] sm:$0xff]  }
 0x180   : > { %v1471_v56 = vrot.slane %v1464_v55, 1  ;;  %6120 = vmatpush3.bf16.msra.mxu1 %v7781_v18  ;;  %v5829_v57 = vpop.f32.mrf.mxu0  ;;  %6105 = vmatprep.subr.bf16.mxu0 %v9283_v5  ;;  %v6939_v55 = vld [vmem:[%s9244_s1 + $0x90] sm:$0xff]  }
 0x181   : > { %v5845_v58 = vpop.f32.mrf.mxu1  ;;  %6121 = vmatprep.subr.bf16.mxu1 %v9283_v5  ;;  %6115 = vmatprep.mubr.msk.bf16.mxu0 %vm7016_vm0, %v9283_v5 }
 0x182   : > { %v1473_v59 = vadd.f32 %v1471_v56, %v1429_v54  ;;  %v1426_v60 = vpop.f32.mrf.mxu0  ;;  %6131 = vmatprep.mubr.msk.bf16.mxu1 %vm7016_vm0, %v9283_v5  ;;  %v6938_v54 = vld [vmem:[%s9244_s1 + $0xf8] sm:$0xff]   ;;  %v6940_v56 = vld [vmem:[%s9244_s1 + $0xf0] sm:$0xff]  }
 0x183   : > { %v1467_v61 = vpop.f32.mrf.mxu1  ;;  %6106 = vmatpush3.bf16.msra.mxu0 %v7617_v0 }
 0x184   : > { %6122 = vmatpush3.bf16.msra.mxu1 %v7794_v24  ;;  %v5830_v62 = vpop.f32.mrf.mxu0  ;;  %6107 = vmatprep.subr.bf16.mxu0 %v9283_v5  ;;  %v6942_v61 = vld [vmem:[%s9244_s1 + $0x1d8] sm:$0xff]  }
 0x185   : > { %v5846_v63 = vpop.f32.mrf.mxu1  ;;  %6123 = vmatprep.subr.bf16.mxu1 %v9283_v5 }
 0x187   : > { %6108 = vmatpush3.bf16.msra.mxu0 %v7802_v27 }
 0x188   : > { %6124 = vmatpush3.bf16.msra.mxu1 %v7808_v28  ;;  %6109 = vmatprep.subr.bf16.mxu0 %v9283_v5 }
 0x189   : > { %6125 = vmatprep.subr.bf16.mxu1 %v9283_v5 }
 0x18b   : > { %6110 = vmatpush3.bf16.msra.mxu0 %v7816_v29 }
 0x18c   : > { %6126 = vmatpush3.bf16.msra.mxu1 %v7822_v30  ;;  %6111 = vmatprep.subr.bf16.mxu0 %v9283_v5 }
 0x18d   : > { %6127 = vmatprep.subr.bf16.mxu1 %v9283_v5 }
 0x18f   : > { %6112 = vmatpush3.bf16.msra.mxu0 %v7830_v31 }
 0x190   : > { %6128 = vmatpush3.bf16.msra.mxu1 %v7836_v32  ;;  %6113 = vmatprep.subr.bf16.mxu0 %v9283_v5 }
 0x191   : > { %6129 = vmatprep.subr.bf16.mxu1 %v9283_v5 }
 0x193   : > { %6114 = vmatpush3.bf16.msra.mxu0 %v7844_v33 }
 0x194   : > { %6130 = vmatpush3.bf16.msra.mxu1 %v7850_v34  ;;  %6135 = vmatprep.subr.bf16.mxu0 %v9283_v5 }
 0x195   : > { %6151 = vmatprep.subr.bf16.mxu1 %v9283_v5 }
 0x196   : > { %v1508_v0 = vpop.f32.mrf.mxu0  ;;  %6116 = vmatmul.mubr.msk.bf16.vlgmr.msra.gmra.mxu0 %vm434_vm1, %v7861_v39 }
 0x197   : > { %v1515_v3 = vrot.slane %v1508_v0, 1  ;;  %v1552_v13 = vpop.f32.mrf.mxu1  ;;  %6132 = vmatmul.mubr.msk.bf16.vlgmr.msra.gmra.mxu1 %vm434_vm1, %v7771_v15  ;;  %6136 = vmatpush3.bf16.msra.mxu0 %v7868_v40  ;;  %v6943_v0 = vld [vmem:[%s9244_s1 + $0x170] sm:$0xff]  }
 0x198   : > { %6152 = vmatpush3.bf16.msra.mxu1 %v7874_v41  ;;  %v5861_v18 = vpop.f32.mrf.mxu0  ;;  %6137 = vmatprep.subr.bf16.mxu0 %v9283_v5 }
 0x199   : > { %v8169_v24 = vadd.f32 %v1515_v3, %v1473_v59  ;;  %v5877_v27 = vpop.f32.mrf.mxu1  ;;  %6153 = vmatprep.subr.bf16.mxu1 %v9283_v5  ;;  %6147 = vmatprep.mubr.msk.bf16.mxu0 %vm7016_vm0, %v9283_v5  ;;  %v6941_v59 = vld [vmem:[%s9244_s1 + $0x178] sm:$0xff]   ;;  %v6944_v3 = vld [vmem:[%s9244_s1 + $0x1d0] sm:$0xff]  }
 0x19a   : > { %v1511_v28 = vpop.f32.mrf.mxu0  ;;  %6163 = vmatprep.mubr.msk.bf16.mxu1 %vm7016_vm0, %v9283_v5  ;;  %v6946_v27 = vld [vmem:[%s9244_s1 + $0x1c8] sm:$0xff]  }
 0x19b   : > { %v1555_v29 = vpop.f32.mrf.mxu1  ;;  %6138 = vmatpush3.bf16.msra.mxu0 %v7888_v7  ;;  %v6947_v28 = vld [vmem:[%s9244_s1 + $0x160] sm:$0xff]  }
 0x19c   : > { %6154 = vmatpush3.bf16.msra.mxu1 %v7894_v8  ;;  %v5862_v30 = vpop.f32.mrf.mxu0  ;;  %6139 = vmatprep.subr.bf16.mxu0 %v9283_v5  ;;  %v6948_v29 = vld [vmem:[%s9244_s1 + $0x1c0] sm:$0xff]  }
 0x19d   : > { %v5878_v31 = vpop.f32.mrf.mxu1  ;;  %6155 = vmatprep.subr.bf16.mxu1 %v9283_v5  ;;  %v6949_v30 = vld [vmem:[%s9244_s1 + $0x158] sm:$0xff]  }
 0x19e   : > { %v6950_v31 = vld [vmem:[%s9244_s1 + $0x1b8] sm:$0xff]  }
 0x19f   : > { %6140 = vmatpush3.bf16.msra.mxu0 %v7902_v11 }
 0x1a0   : > { %6156 = vmatpush3.bf16.msra.mxu1 %v7908_v12  ;;  %6141 = vmatprep.subr.bf16.mxu0 %v9283_v5 }
 0x1a1   : > { %6157 = vmatprep.subr.bf16.mxu1 %v9283_v5 }
 0x1a3   : > { %6142 = vmatpush3.bf16.msra.mxu0 %v7916_v14 }
 0x1a4   : > { %6158 = vmatpush3.bf16.msra.mxu1 %v7922_v16  ;;  %6143 = vmatprep.subr.bf16.mxu0 %v9283_v5  ;;  %v9284_v16 = vld [vmem:[#allocation5_spill] sm:$0xff] }
 0x1a5   : > { %6159 = vmatprep.subr.bf16.mxu1 %v9283_v5 }
 0x1a7   : > { %6144 = vmatpush3.bf16.msra.mxu0 %v7930_v17  ;;  %v9285_v17 = vld [vmem:[#allocation6_spill] sm:$0xff] }
 0x1a8   : > { %6160 = vmatpush3.bf16.msra.mxu1 %v7936_v19  ;;  %6145 = vmatprep.subr.bf16.mxu0 %v9283_v5  ;;  %v9286_v19 = vld [vmem:[#allocation7_spill] sm:$0xff] }
 0x1a9   : > { %6161 = vmatprep.subr.bf16.mxu1 %v9283_v5 }
 0x1ab   : > { %6146 = vmatpush3.bf16.msra.mxu0 %v7944_v20  ;;  %v9287_v20 = vld [vmem:[#allocation8_spill] sm:$0xff] }
 0x1ac   : > { %6162 = vmatpush3.bf16.msra.mxu1 %v7950_v21  ;;  %6167 = vmatprep.subr.bf16.mxu0 %v9283_v5  ;;  %v9288_v21 = vld [vmem:[#allocation9_spill] sm:$0xff] }
 0x1ad   : > { %6183 = vmatprep.subr.bf16.mxu1 %v9283_v5 }
 0x1ae   : > { %v1592_v32 = vpop.f32.mrf.mxu0  ;;  %6148 = vmatmul.mubr.msk.bf16.vlgmr.msra.gmra.mxu0 %vm434_vm1, %v7704_v2 }
 0x1af   : > { %v1598_v33 = vadd.f32 %v1592_v32, %v1552_v13  ;;  %v1633_v34 = vpop.f32.mrf.mxu1  ;;  %6164 = vmatmul.mubr.msk.bf16.vlgmr.msra.gmra.mxu1 %vm434_vm1, %v7856_v36  ;;  %6168 = vmatpush3.bf16.msra.mxu0 %v7962_v26  ;;  %v9289_v26 = vld [vmem:[#allocation10_spill] sm:$0xff]  ;;  %v6790_v32 = vld [vmem:[%s9245_s2 + $0x28] ss:$0 sps:$4 sm:$0x33]  }
 0x1b0   : > { %6184 = vmatpush3.bf16.msra.mxu1 %v7968_v35  ;;  %v5893_v40 = vpop.f32.mrf.mxu0  ;;  %6169 = vmatprep.subr.bf16.mxu0 %v9283_v5  ;;  %v9290_v35 = vld [vmem:[#allocation11_spill] sm:$0xff] }
 0x1b1   : > { %v1639_v41 = vadd.f32 %v1633_v34, %v1598_v33  ;;  %v5909_v7 = vpop.f32.mrf.mxu1  ;;  %6185 = vmatprep.subr.bf16.mxu1 %v9283_v5  ;;  %6179 = vmatprep.mubr.msk.bf16.mxu0 %vm7016_vm0, %v9283_v5  ;;  %v6951_v33 = vld [vmem:[%s9244_s1 + $0x150] sm:$0xff]   ;;  %v8343_v40 = vsel %vm2652_vm2, %v6790_v32, 0  ;;  %v8511_v32 = vld [vmem:[%s9245_s2 + $0x160] sm:$0xff]  }
 0x1b2   : > { %v1595_v8 = vpop.f32.mrf.mxu0  ;;  %6195 = vmatprep.mubr.msk.bf16.mxu1 %vm7016_vm0, %v9283_v5  ;;  %v6952_v34 = vld [vmem:[%s9244_s1 + $0x1b0] sm:$0xff]  }
 0x1b3   : > { %v1636_v11 = vpop.f32.mrf.mxu1  ;;  %6170 = vmatpush3.bf16.msra.mxu0 %v7980_v6 }
 0x1b4   : > { %6186 = vmatpush3.bf16.msra.mxu1 %v7986_v9  ;;  %v5894_v12 = vpop.f32.mrf.mxu0  ;;  %6171 = vmatprep.subr.bf16.mxu0 %v9283_v5  ;;  %v8354_v11 = vld [vmem:[%s9245_s2 + $0x20] sm:$0xff]  }
 0x1b5   : > { %v5910_v14 = vpop.f32.mrf.mxu1  ;;  %6187 = vmatprep.subr.bf16.mxu1 %v9283_v5 }
 0x1b7   : > { %6172 = vmatpush3.bf16.msra.mxu0 %v7994_v23 }
 0x1b8   : > { %6188 = vmatpush3.bf16.msra.mxu1 %v9284_v16  ;;  %6173 = vmatprep.subr.bf16.mxu0 %v9283_v5 }
 0x1b9   : > { %6189 = vmatprep.subr.bf16.mxu1 %v9283_v5 }
 0x1bb   : > { %6174 = vmatpush3.bf16.msra.mxu0 %v9285_v17 }
 0x1bc   : > { %6190 = vmatpush3.bf16.msra.mxu1 %v9286_v19  ;;  %6175 = vmatprep.subr.bf16.mxu0 %v9283_v5 }
 0x1bd   : > { %6191 = vmatprep.subr.bf16.mxu1 %v9283_v5 }
 0x1bf   : > { %6176 = vmatpush3.bf16.msra.mxu0 %v9287_v20  ;;  %v8365_v20 = vld [vmem:[%s9245_s2 + $0x18] sm:$0xff]  }
 0x1c0   : > { %6192 = vmatpush3.bf16.msra.mxu1 %v9288_v21  ;;  %6177 = vmatprep.subr.bf16.mxu0 %v9283_v5 }
 0x1c1   : > { %6193 = vmatprep.subr.bf16.mxu1 %v9283_v5 }
 0x1c3   : > { %6178 = vmatpush3.bf16.msra.mxu0 %v9289_v26 }
 0x1c4   : > { %6194 = vmatpush3.bf16.msra.mxu1 %v9290_v35  ;;  %6199 = vmatprep.subr.bf16.mxu0 %v9283_v5  ;;  %v8372_v35 = vld [vmem:[%s9245_s2 + $0x10] sm:$0xff]  }
 0x1c5   : > { %6215 = vmatprep.subr.bf16.mxu1 %v9283_v5 }
 0x1c6   : > { %v1674_v6 = vpop.f32.mrf.mxu0  ;;  %6180 = vmatmul.mubr.msk.bf16.vlgmr.msra.gmra.mxu0 %vm434_vm1, %v7861_v39 }
 0x1c7   : > { %v1681_v9 = vrot.slane %v1674_v6, 1  ;;  %v1718_v23 = vpop.f32.mrf.mxu1  ;;  %6196 = vmatmul.mubr.msk.bf16.vlgmr.msra.gmra.mxu1 %vm434_vm1, %v7861_v39  ;;  %6200 = vmatpush3.bf16.msra.mxu0 %v9291_v10  ;;  %v8378_v6 = vld [vmem:[%s9249_s6] ss:$0 sm:$0xff] }
 0x1c8   : > { %v1725_v22 = vrot.slane %v1718_v23, 1  ;;  %6216 = vmatpush3.bf16.msra.mxu1 %v9292_v42  ;;  %v5925_v38 = vpop.f32.mrf.mxu0  ;;  %6201 = vmatprep.subr.bf16.mxu0 %v9283_v5  ;;  %v8393_v10 = vld [vmem:[%s9245_s2] sm:$0xff]   ;;  %v6796_v42 = vld [vmem:[%s9245_s2 + $0xd8] ss:$0 sps:$4 sm:$0x33]  }
 0x1c9   : > { %v1683_v4 = vadd.f32 %v1681_v9, %v1639_v41  ;;  %v5941_v44 = vpop.f32.mrf.mxu1  ;;  %6217 = vmatprep.subr.bf16.mxu1 %v9283_v5  ;;  %6211 = vmatprep.mubr.msk.bf16.mxu0 %vm7016_vm0, %v9283_v5  ;;  %v8384_v9 = vld [vmem:[%s9245_s2 + $0x8] sm:$0xff]  }
 0x1ca   : > { %v1677_v45 = vpop.f32.mrf.mxu0  ;;  %6227 = vmatprep.mubr.msk.bf16.mxu1 %vm7016_vm0, %v9283_v5 }
 0x1cb   : > { %v1727_v46 = vadd.f32 %v1725_v22, %v1683_v4  ;;  %v1721_v47 = vpop.f32.mrf.mxu1  ;;  %6202 = vmatpush3.bf16.msra.mxu0 %v8074_v1  ;;  %v6933_v1 = vld [vmem:[%s9244_s1 + $0xa8] sm:$0xff]   ;;  %v8404_v4 = vsel %vm2652_vm2, %v6796_v42, 0  ;;  %v8560_v42 = vld [vmem:[%s9245_s2 + $0x9c] sm:$0xff]  }
 0x1cc   : > { %6218 = vmatpush3.bf16.msra.mxu1 %v6932_v48  ;;  %v5926_v49 = vpop.f32.mrf.mxu0  ;;  %6203 = vmatprep.subr.bf16.mxu0 %v9283_v5  ;;  %v8412_v47 = vld [vmem:[%s9245_s2 + $0xd0] sm:$0xff]  }
 0x1cd   : > { %v1729_v50 = vmax.f32 %v8169_v24, %v1727_v46  ;;  %v5942_v51 = vpop.f32.mrf.mxu1  ;;  %6219 = vmatprep.subr.bf16.mxu1 %v9283_v5  ;;  %v6945_v24 = vld [vmem:[%s9244_s1 + $0x168] sm:$0xff]  }
 0x1cf   : > { %v8250_v52 = vmax.f32 %v1728_v37, %v1729_v50  ;;  %6204 = vmatpush3.bf16.msra.mxu0 %v6933_v1  ;;  %v6937_v37 = vld [vmem:[%s9244_s1 + $0x98] sm:$0xff]   ;;  %v8423_v1 = vld [vmem:[%s9245_s2 + $0xc8] sm:$0xff]  }
 0x1d0   : > { %6220 = vmatpush3.bf16.msra.mxu1 %v6934_v53  ;;  %6205 = vmatprep.subr.bf16.mxu0 %v9283_v5 }
 0x1d1   : > { %6221 = vmatprep.subr.bf16.mxu1 %v9283_v5  ;;  %v1738_v23 = vadd.f32 %v8378_v6, %v8250_v52 }
 0x1d3   : > { %6206 = vmatpush3.bf16.msra.mxu0 %v6935_v43  ;;  %v1739_v22 = vmax.f32 %v1738_v23, 0.0 }
 0x1d4   : > { %6222 = vmatpush3.bf16.msra.mxu1 %v6936_v25  ;;  %6207 = vmatprep.subr.bf16.mxu0 %v9283_v5  ;;  %v8430_v25 = vld [vmem:[%s9245_s2 + $0xc0] sm:$0xff]  }
 0x1d5   : > { %6223 = vmatprep.subr.bf16.mxu1 %v9283_v5  ;;  %v8400_v38 = vpack.c.bf16 %v1739_v22, %v1739_v22 }
 0x1d7   : > { %6208 = vmatpush3.bf16.msra.mxu0 %v6937_v37  ;;  %v8437_v37 = vld [vmem:[%s9245_s2 + $0xb8] sm:$0xff]  }
 0x1d8   : > { %6224 = vmatpush3.bf16.msra.mxu1 %v6938_v54  ;;  %6209 = vmatprep.subr.bf16.mxu0 %v9283_v5  ;;  %v8444_v54 = vld [vmem:[%s9245_s2 + $0xb0] sm:$0xff]  }
 0x1d9   : > { %6225 = vmatprep.subr.bf16.mxu1 %v9283_v5 }
 0x1db   : > { %6210 = vmatpush3.bf16.msra.mxu0 %v6939_v55  ;;  %v6802_v55 = vld [vmem:[%s9245_s2 + $0x188] ss:$0 sps:$4 sm:$0x33]  }
 0x1dc   : > { %6226 = vmatpush3.bf16.msra.mxu1 %v6940_v56  ;;  %6231 = vmatprep.subr.bf16.mxu0 %v9283_v5  ;;  %v8453_v56 = vsel %vm2652_vm2, %v6802_v55, 0 }
 0x1dd   : > { %6247 = vmatprep.subr.bf16.mxu1 %v9283_v5 }
 0x1de   : > { %v1774_v57 = vpop.f32.mrf.mxu0  ;;  %6212 = vmatmul.mubr.msk.bf16.vlgmr.msra.gmra.mxu0 %vm434_vm1, %v7771_v15 }
 0x1df   : > { %v1814_v58 = vpop.f32.mrf.mxu1  ;;  %6228 = vmatmul.mubr.msk.bf16.vlgmr.msra.gmra.mxu1 %vm434_vm1, %v7704_v2  ;;  %6232 = vmatpush3.bf16.msra.mxu0 %v6941_v59 }
 0x1e0   : > { %v1820_v60 = vadd.f32 %v1814_v58, %v1774_v57  ;;  %6248 = vmatpush3.bf16.msra.mxu1 %v6942_v61  ;;  %v5957_v62 = vpop.f32.mrf.mxu0  ;;  %6233 = vmatprep.subr.bf16.mxu0 %v9283_v5  ;;  %v6808_v57 = vld [vmem:[%s9245_s2 + $0x80] ss:$0 sps:$4 sm:$0x33]  }
 0x1e1   : > { %v5973_v63 = vpop.f32.mrf.mxu1  ;;  %6249 = vmatprep.subr.bf16.mxu1 %v9283_v5  ;;  %6243 = vmatprep.mubr.msk.bf16.mxu0 %vm7016_vm0, %v9283_v5  ;;  %v8464_v61 = vld [vmem:[%s9245_s2 + $0x180] sm:$0xff]   ;;  %v8469_v62 = vsel %vm2652_vm2, %v6808_v57, 0 }
 0x1e2   : > { %v1777_v2 = vpop.f32.mrf.mxu0  ;;  %6259 = vmatprep.mubr.msk.bf16.mxu1 %vm7016_vm0, %v9283_v5 }
 0x1e3   : > { %v1817_v15 = vpop.f32.mrf.mxu1  ;;  %6234 = vmatpush3.bf16.msra.mxu0 %v6943_v0 }
 0x1e4   : > { %6250 = vmatpush3.bf16.msra.mxu1 %v6944_v3  ;;  %v5958_v13 = vpop.f32.mrf.mxu0  ;;  %6235 = vmatprep.subr.bf16.mxu0 %v9283_v5  ;;  %v8476_v15 = vld [vmem:[%s9245_s2 + $0x78] sm:$0xff]  }
 0x1e5   : > { %v5974_v18 = vpop.f32.mrf.mxu1  ;;  %6251 = vmatprep.subr.bf16.mxu1 %v9283_v5 }
 0x1e7   : > { %6236 = vmatpush3.bf16.msra.mxu0 %v6945_v24  ;;  %v8483_v24 = vld [vmem:[%s9245_s2 + $0x178] sm:$0xff]  }
 0x1e8   : > { %6252 = vmatpush3.bf16.msra.mxu1 %v6946_v27  ;;  %6237 = vmatprep.subr.bf16.mxu0 %v9283_v5 }
 0x1e9   : > { %6253 = vmatprep.subr.bf16.mxu1 %v9283_v5 }
 0x1eb   : > { %6238 = vmatpush3.bf16.msra.mxu0 %v6947_v28 }
 0x1ec   : > { %6254 = vmatpush3.bf16.msra.mxu1 %v6948_v29  ;;  %6239 = vmatprep.subr.bf16.mxu0 %v9283_v5  ;;  %v8492_v29 = vld [vmem:[%s9245_s2 + $0x170] sm:$0xff]  }
 0x1ed   : > { %6255 = vmatprep.subr.bf16.mxu1 %v9283_v5 }
 0x1ef   : > { %6240 = vmatpush3.bf16.msra.mxu0 %v6949_v30  ;;  %v8499_v30 = vld [vmem:[%s9245_s2 + $0x168] sm:$0xff]  }
 0x1f0   : > { %6256 = vmatpush3.bf16.msra.mxu1 %v6950_v31  ;;  %6241 = vmatprep.subr.bf16.mxu0 %v9283_v5  ;;  %v8505_v31 = vld [vmem:[%s9245_s2 + $0x70] sm:$0xff]  }
 0x1f1   : > { %6257 = vmatprep.subr.bf16.mxu1 %v9283_v5 }
 0x1f3   : > { %6242 = vmatpush3.bf16.msra.mxu0 %v6951_v33  ;;  %v6809_v33 = vld [vmem:[%s9245_s2 + $0xac] ss:$0 sps:$4 sm:$0x33]  }
 0x1f4   : > { %6258 = vmatpush3.bf16.msra.mxu1 %v6952_v34  ;;  %6263 = vmatprep.subr.bf16.mxu0 %v9283_v5  ;;  %v8522_v34 = vld [vmem:[%s9245_s2 + $0x68] sm:$0xff]  }
 0x1f5   : > { %6279 = vmatprep.subr.bf16.mxu1 %v9283_v5 }
 0x1f6   : > { %v1855_v41 = vpop.f32.mrf.mxu0  ;;  %6244 = vmatmul.mubr.msk.bf16.vlgmr.msra.gmra.mxu0 %vm434_vm1, %v7856_v36 }
 0x1f7   : > { %v1862_v7 = vrot.slane %v1855_v41, 1  ;;  %v1899_v8 = vpop.f32.mrf.mxu1  ;;  %6260 = vmatmul.mubr.msk.bf16.vlgmr.msra.gmra.mxu1 %vm434_vm1, %v7861_v39  ;;  %6264 = vmatpush3.bf16.msra.mxu0 %v8343_v40  ;;  %v8527_v41 = vsel %vm2652_vm2, %v6809_v33, 0 }
 0x1f8   : > { %v1906_v12 = vrot.slane %v1899_v8, 1  ;;  %v5989_v14 = vpop.f32.mrf.mxu0  ;;  %6265 = vmatprep.subr.bf16.mxu0 %v9283_v5  ;;  %6275 = vmatprep.mubr.msk.bf16.mxu0 %vm7016_vm0, %v9283_v5  ;;  %v8536_v8 = vld [vmem:[%s9245_s2 + $0x60] sm:$0xff]  }
 0x1f9   : > { %v1864_v36 = vadd.f32 %v1862_v7, %v1820_v60  ;;  %v6005_v16 = vpop.f32.mrf.mxu1  ;;  %6291 = vmatprep.mubr.msk.bf16.mxu1 %vm7016_vm0, %v9283_v5  ;;  %6280 = vmatpush3.bf16.msra.mxu1 %v8469_v62 }
 0x1fa   : > { %v1858_v39 = vpop.f32.mrf.mxu0  ;;  %6281 = vmatprep.subr.bf16.mxu1 %v9283_v5 }
 0x1fb   : > { %v1908_v17 = vadd.f32 %v1906_v12, %v1864_v36  ;;  %v1902_v19 = vpop.f32.mrf.mxu1  ;;  %6266 = vmatpush3.bf16.msra.mxu0 %v8354_v11  ;;  %v8542_v36 = vld [vmem:[%s9245_s2 + $0xa4] sm:$0xff]  }
 0x1fc   : > { %v5990_v21 = vpop.f32.mrf.mxu0  ;;  %6267 = vmatprep.subr.bf16.mxu0 %v9283_v5 }
 0x1fd   : > { %v6006_v26 = vpop.f32.mrf.mxu1  ;;  %6282 = vmatpush3.bf16.msra.mxu1 %v8476_v15 }
 0x1fe   : > { %6283 = vmatprep.subr.bf16.mxu1 %v9283_v5  ;;  %v8552_v26 = vld [vmem:[%s9245_s2 + $0x58] sm:$0xff]  }
 0x1ff   : > { %6268 = vmatpush3.bf16.msra.mxu0 %v8365_v20 }
 0x200   : > { %6269 = vmatprep.subr.bf16.mxu0 %v9283_v5 }
 0x201   : > { %6284 = vmatpush3.bf16.msra.mxu1 %v8505_v31 }
 0x202   : > { %6285 = vmatprep.subr.bf16.mxu1 %v9283_v5 }
 0x203   : > { %6270 = vmatpush3.bf16.msra.mxu0 %v8372_v35 }
 0x204   : > { %6271 = vmatprep.subr.bf16.mxu0 %v9283_v5 }
 0x205   : > { %6286 = vmatpush3.bf16.msra.mxu1 %v8522_v34 }
 0x206   : > { %6287 = vmatprep.subr.bf16.mxu1 %v9283_v5 }
 0x207   : > { %6272 = vmatpush3.bf16.msra.mxu0 %v8384_v9 }
 0x208   : > { %6273 = vmatprep.subr.bf16.mxu0 %v9283_v5 }
 0x209   : > { %6288 = vmatpush3.bf16.msra.mxu1 %v8536_v8 }
 0x20a   : > { %6289 = vmatprep.subr.bf16.mxu1 %v9283_v5 }
 0x20b   : > { %6274 = vmatpush3.bf16.msra.mxu0 %v8393_v10 }
 0x20c   : > { %6295 = vmatprep.subr.bf16.mxu0 %v9283_v5 }
 0x20d   : > { %6290 = vmatpush3.bf16.msra.mxu1 %v8552_v26 }
 0x20e   : > { %v1943_v44 = vpop.f32.mrf.mxu0  ;;  %6276 = vmatmul.mubr.msk.bf16.vlgmr.msra.gmra.mxu0 %vm2648_vm3, %v8400_v38  ;;  %6311 = vmatprep.subr.bf16.mxu1 %v9283_v5 }
 0x20f   : > { %v1950_v45 = vrot.slane %v1943_v44, 1  ;;  %v1987_v46 = vpop.f32.mrf.mxu1  ;;  %6296 = vmatpush3.bf16.msra.mxu0 %v8404_v4  ;;  %6307 = vmatprep.mubr.msk.bf16.mxu0 %vm7016_vm0, %v9283_v5 }
 0x210   : > { %v6021_v48 = vpop.f32.mrf.mxu0  ;;  %6297 = vmatprep.subr.bf16.mxu0 %v9283_v5 }
 0x211   : > { %v8417_v49 = vadd.f32 %v1950_v45, %v1908_v17  ;;  %v6037_v50 = vpop.f32.mrf.mxu1  ;;  %v8571_v48 = vld [vmem:[%s9245_s2 + $0x94] sm:$0xff]  }
 0x212   : > { %v1946_v51 = vpop.f32.mrf.mxu0  ;;  %v8578_v50 = vld [vmem:[%s9245_s2 + $0x8c] sm:$0xff]  }
 0x213   : > { %v1990_v52 = vpop.f32.mrf.mxu1  ;;  %6298 = vmatpush3.bf16.msra.mxu0 %v8412_v47  ;;  %v8585_v51 = vld [vmem:[%s9245_s2 + $0x84] sm:$0xff]  }
 0x214   : > { %v6022_v53 = vpop.f32.mrf.mxu0  ;;  %6299 = vmatprep.subr.bf16.mxu0 %v9283_v5 }
 0x215   : > { %v6038_v43 = vpop.f32.mrf.mxu1 }
 0x217   : > { %6300 = vmatpush3.bf16.msra.mxu0 %v8423_v1 }
 0x218   : > { %6301 = vmatprep.subr.bf16.mxu0 %v9283_v5 }
 0x21b   : > { %6302 = vmatpush3.bf16.msra.mxu0 %v8430_v25 }
 0x21c   : > { %6303 = vmatprep.subr.bf16.mxu0 %v9283_v5 }
 0x21f   : > { %6304 = vmatpush3.bf16.msra.mxu0 %v8437_v37 }
 0x220   : > { %6305 = vmatprep.subr.bf16.mxu0 %v9283_v5 }
 0x223   : > { %6306 = vmatpush3.bf16.msra.mxu0 %v8444_v54 }
 0x224   : > { %6327 = vmatprep.subr.bf16.mxu0 %v9283_v5 }
 0x226   : > { %v2027_v58 = vpop.f32.mrf.mxu0  ;;  %6308 = vmatmul.mubr.msk.bf16.vlgmr.msra.gmra.mxu0 %vm2648_vm3, %v8400_v38 }
 0x227   : > { %v2033_v59 = vadd.f32 %v2027_v58, %v1987_v46  ;;  %v2068_v60 = vpop.f32.mrf.mxu1  ;;  %6328 = vmatpush3.bf16.msra.mxu0 %v8453_v56  ;;  %6339 = vmatprep.mubr.msk.bf16.mxu0 %vm7016_vm0, %v9283_v5 }
 0x228   : > { %v2075_v63 = vrot.slane %v2068_v60, 1  ;;  %v6053_v2 = vpop.f32.mrf.mxu0  ;;  %6329 = vmatprep.subr.bf16.mxu0 %v9283_v5 }
 0x229   : > { %v6069_v0 = vpop.f32.mrf.mxu1 }
 0x22a   : > { %v2077_v3 = vadd.f32 %v2075_v63, %v2033_v59  ;;  %v2030_v13 = vpop.f32.mrf.mxu0 }
 0x22b   : > { %v2071_v18 = vpop.f32.mrf.mxu1  ;;  %6330 = vmatpush3.bf16.msra.mxu0 %v8464_v61 }
 0x22c   : > { %v6054_v27 = vpop.f32.mrf.mxu0  ;;  %6331 = vmatprep.subr.bf16.mxu0 %v9283_v5 }
 0x22d   : > { %v6070_v28 = vpop.f32.mrf.mxu1 }
 0x22f   : > { %6332 = vmatpush3.bf16.msra.mxu0 %v8483_v24 }
 0x230   : > { %6333 = vmatprep.subr.bf16.mxu0 %v9283_v5 }
 0x233   : > { %6334 = vmatpush3.bf16.msra.mxu0 %v8492_v29 }
 0x234   : > { %6335 = vmatprep.subr.bf16.mxu0 %v9283_v5 }
 0x237   : > { %6336 = vmatpush3.bf16.msra.mxu0 %v8499_v30 }
 0x238   : > { %6337 = vmatprep.subr.bf16.mxu0 %v9283_v5 }
 0x23b   : > { %6338 = vmatpush3.bf16.msra.mxu0 %v8511_v32 }
 0x23c   : > { %6359 = vmatprep.subr.bf16.mxu0 %v9283_v5 }
 0x23e   : > { %v2112_v7 = vpop.f32.mrf.mxu0  ;;  %6340 = vmatmul.mubr.msk.bf16.vlgmr.msra.gmra.mxu0 %vm2648_vm3, %v8400_v38 }
 0x23f   : > { %v2119_v12 = vrot.slane %v2112_v7, 1  ;;  %v2156_v14 = vpop.f32.mrf.mxu1  ;;  %6360 = vmatpush3.bf16.msra.mxu0 %v8527_v41  ;;  %6371 = vmatprep.mubr.msk.bf16.mxu0 %vm7016_vm0, %v9283_v5 }
 0x240   : > { %v2163_v16 = vrot.slane %v2156_v14, 1  ;;  %v6085_v39 = vpop.f32.mrf.mxu0  ;;  %6361 = vmatprep.subr.bf16.mxu0 %v9283_v5 }
 0x241   : > { %v2121_v17 = vadd.f32 %v2119_v12, %v2077_v3  ;;  %v6101_v19 = vpop.f32.mrf.mxu1 }
 0x242   : > { %v2115_v21 = vpop.f32.mrf.mxu0 }
 0x243   : > { %v8554_v23 = vadd.f32 %v2163_v16, %v2121_v17  ;;  %v2159_v22 = vpop.f32.mrf.mxu1  ;;  %6362 = vmatpush3.bf16.msra.mxu0 %v8542_v36 }
 0x244   : > { %v6086_v44 = vpop.f32.mrf.mxu0  ;;  %6363 = vmatprep.subr.bf16.mxu0 %v9283_v5 }
 0x245   : > { %v2598_v45 = vmax.f32 %v8417_v49, %v8554_v23  ;;  %v6102_v46 = vpop.f32.mrf.mxu1  ;;  %v8622_v49 = vld [vmem:[%s9245_s2 + $0x154] sm:$0xff]   ;;  %v8635_v23 = vld [vmem:[%s9245_s2 + $0x120] sm:$0xff]  }
 0x247   : > { %6364 = vmatpush3.bf16.msra.mxu0 %v8560_v42 }
 0x248   : > { %6365 = vmatprep.subr.bf16.mxu0 %v9283_v5 }
 0x24b   : > { %6366 = vmatpush3.bf16.msra.mxu0 %v8571_v48 }
 0x24c   : > { %6367 = vmatprep.subr.bf16.mxu0 %v9283_v5 }
 0x24f   : > { %6368 = vmatpush3.bf16.msra.mxu0 %v8578_v50 }
 0x250   : > { %6369 = vmatprep.subr.bf16.mxu0 %v9283_v5 }
 0x253   : > { %6370 = vmatpush3.bf16.msra.mxu0 %v8585_v51 }
 0x254   : > { %6391 = vmatprep.subr.bf16.mxu0 %v9283_v5 }
 0x256   : > { %v2200_v52 = vpop.f32.mrf.mxu0 }
 0x257   : > { %v2240_v53 = vpop.f32.mrf.mxu1 }
 0x258   : > { %v2247_v43 = vrot.slane %v2240_v53, 1  ;;  %v6117_v55 = vpop.f32.mrf.mxu0 }
 0x259   : > { %v6133_v57 = vpop.f32.mrf.mxu1 }
 0x25a   : > { %v2249_v58 = vadd.f32 %v2247_v43, %v2200_v52  ;;  %v2203_v59 = vpop.f32.mrf.mxu0 }
 0x25b   : > { %v2243_v60 = vpop.f32.mrf.mxu1 }
 0x25c   : > { %v6118_v63 = vpop.f32.mrf.mxu0 }
 0x25d   : > { %v6134_v2 = vpop.f32.mrf.mxu1 }
 0x26e   : > { %v2284_v0 = vpop.f32.mrf.mxu0 }
 0x26f   : > { %v2291_v3 = vrot.slane %v2284_v0, 1  ;;  %v2328_v13 = vpop.f32.mrf.mxu1 }
 0x270   : > { %v2335_v18 = vrot.slane %v2328_v13, 1  ;;  %v6149_v27 = vpop.f32.mrf.mxu0 }
 0x271   : > { %v2293_v28 = vadd.f32 %v2291_v3, %v2249_v58  ;;  %v6165_v33 = vpop.f32.mrf.mxu1 }
 0x272   : > { %v2287_v7 = vpop.f32.mrf.mxu0 }
 0x273   : > { %v2337_v12 = vadd.f32 %v2335_v18, %v2293_v28  ;;  %v2331_v14 = vpop.f32.mrf.mxu1 }
 0x274   : > { %v6150_v16 = vpop.f32.mrf.mxu0 }
 0x275   : > { %v6166_v39 = vpop.f32.mrf.mxu1 }
 0x286   : > { %v2372_v17 = vpop.f32.mrf.mxu0 }
 0x287   : > { %v2416_v19 = vpop.f32.mrf.mxu1  ;;  %v2379_v27 = vrot.slane %v2372_v17, 1 }
 0x288   : > { %v6181_v21 = vpop.f32.mrf.mxu0 }
 0x289   : > { %v6197_v22 = vpop.f32.mrf.mxu1 }
 0x28a   : > { %v2375_v44 = vpop.f32.mrf.mxu0 }
 0x28b   : > { %v2419_v46 = vpop.f32.mrf.mxu1  ;;  %v2381_v44 = vadd.f32 %v2379_v27, %v2337_v12 }
 0x28c   : > { %v6182_v52 = vpop.f32.mrf.mxu0 }
 0x28d   : > { %v6198_v53 = vpop.f32.mrf.mxu1 }
 0x29e   : > { %v2456_v43 = vpop.f32.mrf.mxu0 }
 0x29f   : > { %v2500_v55 = vpop.f32.mrf.mxu1  ;;  %v2463_v0 = vrot.slane %v2456_v43, 1  ;;  %v6820_v43 = vld [vmem:[%s9245_s2 + $0x130] ss:$0 sps:$4 sm:$0x33]  }
 0x2a0   : > { %v6213_v57 = vpop.f32.mrf.mxu0  ;;  %v2507_v13 = vrot.slane %v2500_v55, 1  ;;  %v6821_v55 = vld [vmem:[%s9245_s2 + $0x15c] ss:$0 sps:$4 sm:$0x33]  }
 0x2a1   : > { %v6229_v59 = vpop.f32.mrf.mxu1  ;;  %v2465_v3 = vadd.f32 %v2463_v0, %v2416_v19 }
 0x2a2   : > { %v2459_v60 = vpop.f32.mrf.mxu0 }
 0x2a3   : > { %v2503_v58 = vpop.f32.mrf.mxu1  ;;  %v2509_v28 = vadd.f32 %v2507_v13, %v2465_v3  ;;  %v8651_v3 = vld [vmem:[%s9245_s2 + $0x118] sm:$0xff]   ;;  %v8656_v13 = vld [vmem:[%s9245_s2 + $0x144] sm:$0xff]  }
 0x2a4   : > { %v6214_v63 = vpop.f32.mrf.mxu0  ;;  %v8603_v58 = vsel %vm2652_vm2, %v6820_v43, 0  ;;  %v8814_v43 = vld [vmem:[%s9245_s2 + $0xdc] sm:$0xff]  }
 0x2a5   : > { %v6230_v2 = vpop.f32.mrf.mxu1  ;;  %v8606_v63 = vsel %vm2652_vm2, %v6821_v55, 0  ;;  %v8859_v55 = vld [vmem:[%s9245_s2 + $0x19c] sm:$0xff]  }
 0x2b6   : > { %v2544_v18 = vpop.f32.mrf.mxu0 }
 0x2b7   : > { %v2551_v33 = vrot.slane %v2544_v18, 1  ;;  %v2588_v7 = vpop.f32.mrf.mxu1 }
 0x2b8   : > { %v2595_v14 = vrot.slane %v2588_v7, 1  ;;  %v6245_v16 = vpop.f32.mrf.mxu0  ;;  %v8679_v7 = vld [vmem:[%s9245_s2 + $0x108] sm:$0xff]  }
 0x2b9   : > { %v2553_v39 = vadd.f32 %v2551_v33, %v2509_v28  ;;  %v6261_v21 = vpop.f32.mrf.mxu1  ;;  %v8665_v28 = vld [vmem:[%s9245_s2 + $0x110] sm:$0xff]   ;;  %v8670_v33 = vld [vmem:[%s9245_s2 + $0x13c] sm:$0xff]  }
 0x2ba   : > { %v2547_v22 = vpop.f32.mrf.mxu0  ;;  %v6832_v16 = vld [vmem:[%s9245_s2 + $0x54] ss:$0 sps:$4 sm:$0x33]   ;;  %v8707_v21 = vld [vmem:[%s9245_s2 + $0x4c] sm:$0xff]  }
 0x2bb   : > { %v2597_v46 = vadd.f32 %v2595_v14, %v2553_v39  ;;  %v2591_v52 = vpop.f32.mrf.mxu1  ;;  %v8684_v14 = vld [vmem:[%s9245_s2 + $0x134] sm:$0xff]   ;;  %v8696_v39 = vsel %vm2652_vm2, %v6832_v16, 0 }
 0x2bc   : > { %v6246_v53 = vpop.f32.mrf.mxu0 }
 0x2bd   : > { %v2599_v57 = vmax.f32 %v2381_v44, %v2597_v46  ;;  %v6262_v59 = vpop.f32.mrf.mxu1  ;;  %v8749_v53 = vld [vmem:[%s9245_s2 + $0x2c] sm:$0xff]  }
 0x2bf   : > { %v2600_v19 = vmax.f32 %v2598_v45, %v2599_v57  ;;  %v8640_v45 = vld [vmem:[%s9245_s2 + $0x14c] sm:$0xff]  }
 0x2c1   : > { %v2601_v17 = vadd.f32 %v8378_v6, %v2600_v19  ;;  %v8617_v6 = vld [vmem:[%s9245_s2 + $0x128] sm:$0xff]  }
 0x2c3   : > { %v2602_v12 = vmax.f32 %v2601_v17, 0.0 }
 0x2c5   : > { %v8600_v60 = vpack.c.bf16 %v2602_v12, %v2602_v12 }
 0x2c7   : > { %6292 = vmatmul.mubr.msk.bf16.vlgmr.msra.gmra.mxu1 %vm2648_vm3, %v8600_v60  ;;  %6372 = vmatmul.mubr.msk.bf16.vlgmr.msra.gmra.mxu0 %vm2648_vm3, %v8600_v60 }
 0x2c8   : > { %6312 = vmatpush3.bf16.msra.mxu1 %v8603_v58  ;;  %6392 = vmatpush3.bf16.msra.mxu0 %v8606_v63 }
 0x2c9   : > { %6313 = vmatprep.subr.bf16.mxu1 %v9283_v5  ;;  %6393 = vmatprep.subr.bf16.mxu0 %v9283_v5 }
 0x2ca   : > { %6323 = vmatprep.mubr.msk.bf16.mxu1 %vm7016_vm0, %v9283_v5  ;;  %6403 = vmatprep.mubr.msk.bf16.mxu0 %vm7016_vm0, %v9283_v5 }
 0x2cc   : > { %6314 = vmatpush3.bf16.msra.mxu1 %v8617_v6  ;;  %6394 = vmatpush3.bf16.msra.mxu0 %v8622_v49 }
 0x2cd   : > { %6315 = vmatprep.subr.bf16.mxu1 %v9283_v5  ;;  %6395 = vmatprep.subr.bf16.mxu0 %v9283_v5 }
 0x2ce   : > { %v8644_v2 = vpop.f32.mrf.mxu0 }
 0x2d0   : > { %6316 = vmatpush3.bf16.msra.mxu1 %v8635_v23  ;;  %6396 = vmatpush3.bf16.msra.mxu0 %v8640_v45  ;;  %v6277_v0 = vpop.f32.mrf.mxu0 }
 0x2d1   : > { %6317 = vmatprep.subr.bf16.mxu1 %v9283_v5  ;;  %6397 = vmatprep.subr.bf16.mxu0 %v9283_v5 }
 0x2d2   : > { %v2693_v18 = vpop.f32.mrf.mxu0 }
 0x2d4   : > { %6318 = vmatpush3.bf16.msra.mxu1 %v8651_v3  ;;  %6398 = vmatpush3.bf16.msra.mxu0 %v8656_v13  ;;  %v6278_v27 = vpop.f32.mrf.mxu0 }
 0x2d5   : > { %6319 = vmatprep.subr.bf16.mxu1 %v9283_v5  ;;  %6399 = vmatprep.subr.bf16.mxu0 %v9283_v5 }
 0x2d8   : > { %6320 = vmatpush3.bf16.msra.mxu1 %v8665_v28  ;;  %6400 = vmatpush3.bf16.msra.mxu0 %v8670_v33 }
 0x2d9   : > { %6321 = vmatprep.subr.bf16.mxu1 %v9283_v5  ;;  %6401 = vmatprep.subr.bf16.mxu0 %v9283_v5 }
 0x2dc   : > { %6322 = vmatpush3.bf16.msra.mxu1 %v8679_v7  ;;  %6402 = vmatpush3.bf16.msra.mxu0 %v8684_v14 }
 0x2dd   : > { %6343 = vmatprep.subr.bf16.mxu1 %v9283_v5  ;;  %6423 = vmatprep.subr.bf16.mxu0 %v9283_v5 }
 0x2df   : > { %6324 = vmatmul.mubr.msk.bf16.vlgmr.msra.gmra.mxu1 %vm2648_vm3, %v8600_v60  ;;  %6404 = vmatmul.mubr.msk.bf16.vlgmr.msra.gmra.mxu0 %vm2648_vm3, %v8600_v60 }
 0x2e0   : > { %6344 = vmatpush3.bf16.msra.mxu1 %v8696_v39  ;;  %6424 = vmatpush3.bf16.msra.mxu0 %v8343_v40  ;;  %v8720_v40 = vld [vmem:[%s9245_s2 + $0x44] sm:$0xff]  }
 0x2e1   : > { %6345 = vmatprep.subr.bf16.mxu1 %v9283_v5  ;;  %6425 = vmatprep.subr.bf16.mxu0 %v9283_v5 }
 0x2e2   : > { %6355 = vmatprep.mubr.msk.bf16.mxu1 %vm7016_vm0, %v9283_v5  ;;  %6435 = vmatprep.mubr.msk.bf16.mxu0 %vm7016_vm0, %v9283_v5 }
 0x2e4   : > { %6346 = vmatpush3.bf16.msra.mxu1 %v8707_v21  ;;  %6426 = vmatpush3.bf16.msra.mxu0 %v8354_v11  ;;  %v8731_v11 = vld [vmem:[%s9245_s2 + $0x3c] sm:$0xff]  }
 0x2e5   : > { %6347 = vmatprep.subr.bf16.mxu1 %v9283_v5  ;;  %6427 = vmatprep.subr.bf16.mxu0 %v9283_v5 }
 0x2e6   : > { %v8724_v22 = vpop.f32.mrf.mxu0 }
 0x2e8   : > { %6348 = vmatpush3.bf16.msra.mxu1 %v8720_v40  ;;  %6428 = vmatpush3.bf16.msra.mxu0 %v8365_v20  ;;  %v6309_v44 = vpop.f32.mrf.mxu0  ;;  %v8740_v20 = vld [vmem:[%s9245_s2 + $0x34] sm:$0xff]  }
 0x2e9   : > { %6349 = vmatprep.subr.bf16.mxu1 %v9283_v5  ;;  %6429 = vmatprep.subr.bf16.mxu0 %v9283_v5 }
 0x2ea   : > { %v2874_v46 = vpop.f32.mrf.mxu0 }
 0x2ec   : > { %6350 = vmatpush3.bf16.msra.mxu1 %v8731_v11  ;;  %6430 = vmatpush3.bf16.msra.mxu0 %v8372_v35  ;;  %v6310_v52 = vpop.f32.mrf.mxu0  ;;  %v6838_v35 = vld [vmem:[%s9245_s2 + $0x104] ss:$0 sps:$4 sm:$0x33]  }
 0x2ed   : > { %6351 = vmatprep.subr.bf16.mxu1 %v9283_v5  ;;  %6431 = vmatprep.subr.bf16.mxu0 %v9283_v5 }
 0x2f0   : > { %6352 = vmatpush3.bf16.msra.mxu1 %v8740_v20  ;;  %6432 = vmatpush3.bf16.msra.mxu0 %v8384_v9  ;;  %v8761_v9 = vsel %vm2652_vm2, %v6838_v35, 0 }
 0x2f1   : > { %6353 = vmatprep.subr.bf16.mxu1 %v9283_v5  ;;  %6433 = vmatprep.subr.bf16.mxu0 %v9283_v5 }
 0x2f4   : > { %6354 = vmatpush3.bf16.msra.mxu1 %v8749_v53  ;;  %6434 = vmatpush3.bf16.msra.mxu0 %v8393_v10  ;;  %v8772_v10 = vld [vmem:[%s9245_s2 + $0xfc] sm:$0xff]  }
 0x2f5   : > { %6375 = vmatprep.subr.bf16.mxu1 %v9283_v5  ;;  %6455 = vmatprep.subr.bf16.mxu0 %v9283_v5 }
 0x2f7   : > { %6356 = vmatmul.mubr.msk.bf16.vlgmr.msra.gmra.mxu1 %vm2648_vm3, %v8400_v38  ;;  %6436 = vmatmul.mubr.msk.bf16.vlgmr.msra.gmra.mxu0 %vm2648_vm3, %v8600_v60 }
 0x2f8   : > { %6376 = vmatpush3.bf16.msra.mxu1 %v8761_v9  ;;  %6456 = vmatpush3.bf16.msra.mxu0 %v8404_v4  ;;  %v8785_v4 = vld [vmem:[%s9245_s2 + $0xf4] sm:$0xff]  }
 0x2f9   : > { %6377 = vmatprep.subr.bf16.mxu1 %v9283_v5  ;;  %6457 = vmatprep.subr.bf16.mxu0 %v9283_v5 }
 0x2fa   : > { %6387 = vmatprep.mubr.msk.bf16.mxu1 %vm7016_vm0, %v9283_v5  ;;  %6467 = vmatprep.mubr.msk.bf16.mxu0 %vm7016_vm0, %v9283_v5 }
 0x2fc   : > { %6378 = vmatpush3.bf16.msra.mxu1 %v8772_v10  ;;  %6458 = vmatpush3.bf16.msra.mxu0 %v8412_v47  ;;  %v8796_v47 = vld [vmem:[%s9245_s2 + $0xec] sm:$0xff]  }
 0x2fd   : > { %6379 = vmatprep.subr.bf16.mxu1 %v9283_v5  ;;  %6459 = vmatprep.subr.bf16.mxu0 %v9283_v5 }
 0x2fe   : > { %v8789_v57 = vpop.f32.mrf.mxu0 }
 0x2ff   : > { %v3062_v12 = vrot.slane %v8789_v57, 2  ;;  %v6855_v57 = vld [vmem:[%s9246_s3 + $0x38] sm:$0xff]  }
 0x300   : > { %6380 = vmatpush3.bf16.msra.mxu1 %v8785_v4  ;;  %6460 = vmatpush3.bf16.msra.mxu0 %v8423_v1  ;;  %v6341_v59 = vpop.f32.mrf.mxu0  ;;  %v8805_v1 = vld [vmem:[%s9245_s2 + $0xe4] sm:$0xff]  }
 0x301   : > { %6381 = vmatprep.subr.bf16.mxu1 %v9283_v5  ;;  %6461 = vmatprep.subr.bf16.mxu0 %v9283_v5  ;;  %v6856_v59 = vld [vmem:[%s9246_s3 + $0x8] sm:$0xff]  }
 0x302   : > { %v3058_v19 = vpop.f32.mrf.mxu0 }
 0x304   : > { %6382 = vmatpush3.bf16.msra.mxu1 %v8796_v47  ;;  %6462 = vmatpush3.bf16.msra.mxu0 %v8430_v25  ;;  %v6342_v17 = vpop.f32.mrf.mxu0  ;;  %v6844_v25 = vld [vmem:[%s9245_s2 + $0x1b4] ss:$0 sps:$4 sm:$0x33]  }
 0x305   : > { %6383 = vmatprep.subr.bf16.mxu1 %v9283_v5  ;;  %6463 = vmatprep.subr.bf16.mxu0 %v9283_v5 }
 0x308   : > { %6384 = vmatpush3.bf16.msra.mxu1 %v8805_v1  ;;  %6464 = vmatpush3.bf16.msra.mxu0 %v8437_v37  ;;  %v8826_v37 = vsel %vm2652_vm2, %v6844_v25, 0 }
 0x309   : > { %6385 = vmatprep.subr.bf16.mxu1 %v9283_v5  ;;  %6465 = vmatprep.subr.bf16.mxu0 %v9283_v5 }
 0x30c   : > { %6386 = vmatpush3.bf16.msra.mxu1 %v8814_v43  ;;  %6466 = vmatpush3.bf16.msra.mxu0 %v8444_v54  ;;  %v8837_v54 = vld [vmem:[%s9245_s2 + $0x1ac] sm:$0xff]  }
 0x30d   : > { %6407 = vmatprep.subr.bf16.mxu1 %v9283_v5  ;;  %6487 = vmatprep.subr.bf16.mxu0 %v9283_v5 }
 0x30f   : > { %6388 = vmatmul.mubr.msk.bf16.vlgmr.msra.gmra.mxu1 %vm2648_vm3, %v8400_v38  ;;  %6468 = vmatmul.mubr.msk.bf16.vlgmr.msra.gmra.mxu0 %vm2648_vm3, %v8600_v60 }
 0x310   : > { %6408 = vmatpush3.bf16.msra.mxu1 %v8826_v37  ;;  %6488 = vmatpush3.bf16.msra.mxu0 %v8453_v56  ;;  %v8850_v56 = vld [vmem:[%s9245_s2 + $0x1a4] sm:$0xff]  }
 0x311   : > { %6409 = vmatprep.subr.bf16.mxu1 %v9283_v5  ;;  %6489 = vmatprep.subr.bf16.mxu0 %v9283_v5 }
 0x312   : > { %6419 = vmatprep.mubr.msk.bf16.mxu1 %vm7016_vm0, %v9283_v5  ;;  %6499 = vmatprep.mubr.msk.bf16.mxu0 %vm7016_vm0, %v9283_v5 }
 0x314   : > { %6410 = vmatpush3.bf16.msra.mxu1 %v8837_v54  ;;  %6490 = vmatpush3.bf16.msra.mxu0 %v8464_v61  ;;  %v8868_v61 = vld [vmem:[%s9245_s2 + $0x194] sm:$0xff]  }
 0x315   : > { %6411 = vmatprep.subr.bf16.mxu1 %v9283_v5  ;;  %6491 = vmatprep.subr.bf16.mxu0 %v9283_v5 }
 0x318   : > { %6412 = vmatpush3.bf16.msra.mxu1 %v8850_v56  ;;  %6492 = vmatpush3.bf16.msra.mxu0 %v8483_v24  ;;  %v8877_v24 = vld [vmem:[%s9245_s2 + $0x18c] sm:$0xff]  }
 0x319   : > { %6413 = vmatprep.subr.bf16.mxu1 %v9283_v5  ;;  %6493 = vmatprep.subr.bf16.mxu0 %v9283_v5 }
 0x31c   : > { %6414 = vmatpush3.bf16.msra.mxu1 %v8859_v55  ;;  %6494 = vmatpush3.bf16.msra.mxu0 %v8492_v29 }
 0x31d   : > { %6415 = vmatprep.subr.bf16.mxu1 %v9283_v5  ;;  %6495 = vmatprep.subr.bf16.mxu0 %v9283_v5 }
 0x320   : > { %6416 = vmatpush3.bf16.msra.mxu1 %v8868_v61  ;;  %6496 = vmatpush3.bf16.msra.mxu0 %v8499_v30 }
 0x321   : > { %6417 = vmatprep.subr.bf16.mxu1 %v9283_v5  ;;  %6497 = vmatprep.subr.bf16.mxu0 %v9283_v5 }
 0x324   : > { %6418 = vmatpush3.bf16.msra.mxu1 %v8877_v24  ;;  %6498 = vmatpush3.bf16.msra.mxu0 %v8511_v32 }
 0x325   : > { %6439 = vmatprep.subr.bf16.mxu1 %v9283_v5  ;;  %6519 = vmatprep.subr.bf16.mxu0 %v9283_v5 }
 0x327   : > { %6420 = vmatmul.mubr.msk.bf16.vlgmr.msra.gmra.mxu1 %vm2648_vm3, %v8400_v38  ;;  %6500 = vmatmul.mubr.msk.bf16.vlgmr.msra.gmra.mxu0 %vm2648_vm3, %v8600_v60 }
 0x328   : > { %6440 = vmatpush3.bf16.msra.mxu1 %v8469_v62  ;;  %6520 = vmatpush3.bf16.msra.mxu0 %v8527_v41 }
 0x329   : > { %6441 = vmatprep.subr.bf16.mxu1 %v9283_v5  ;;  %6521 = vmatprep.subr.bf16.mxu0 %v9283_v5 }
 0x32a   : > { %6451 = vmatprep.mubr.msk.bf16.mxu1 %vm7016_vm0, %v9283_v5  ;;  %6531 = vmatprep.mubr.msk.bf16.mxu0 %vm7016_vm0, %v9283_v5 }
 0x32c   : > { %6442 = vmatpush3.bf16.msra.mxu1 %v8476_v15  ;;  %6522 = vmatpush3.bf16.msra.mxu0 %v8542_v36  ;;  %v2878_v15 = vrot.slane %v8724_v22, 1 }
 0x32d   : > { %6443 = vmatprep.subr.bf16.mxu1 %v9283_v5  ;;  %6523 = vmatprep.subr.bf16.mxu0 %v9283_v5 }
 0x330   : > { %6444 = vmatpush3.bf16.msra.mxu1 %v8505_v31  ;;  %6524 = vmatpush3.bf16.msra.mxu0 %v8560_v42 }
 0x331   : > { %6445 = vmatprep.subr.bf16.mxu1 %v9283_v5  ;;  %6525 = vmatprep.subr.bf16.mxu0 %v9283_v5 }
 0x334   : > { %6446 = vmatpush3.bf16.msra.mxu1 %v8522_v34  ;;  %6526 = vmatpush3.bf16.msra.mxu0 %v8571_v48 }
 0x335   : > { %6447 = vmatprep.subr.bf16.mxu1 %v9283_v5  ;;  %6527 = vmatprep.subr.bf16.mxu0 %v9283_v5 }
 0x338   : > { %6448 = vmatpush3.bf16.msra.mxu1 %v8536_v8  ;;  %6528 = vmatpush3.bf16.msra.mxu0 %v8578_v50 }
 0x339   : > { %6449 = vmatprep.subr.bf16.mxu1 %v9283_v5  ;;  %6529 = vmatprep.subr.bf16.mxu0 %v9283_v5 }
 0x33c   : > { %6450 = vmatpush3.bf16.msra.mxu1 %v8552_v26  ;;  %6530 = vmatpush3.bf16.msra.mxu0 %v8585_v51 }
 0x33d   : > { %6471 = vmatprep.subr.bf16.mxu1 %v9283_v5  ;;  %6551 = vmatprep.subr.bf16.mxu0 %v9283_v5 }
 0x33f   : > { %6452 = vmatmul.mubr.msk.bf16.vlgmr.msra.gmra.mxu1 %vm2648_vm3, %v8400_v38  ;;  %6532 = vmatmul.mubr.msk.bf16.vlgmr.msra.gmra.mxu0 %vm2648_vm3, %v8400_v38 }
 0x340   : > { %6472 = vmatpush3.bf16.msra.mxu1 %v8603_v58  ;;  %6552 = vmatpush3.bf16.msra.mxu0 %v8606_v63 }
 0x341   : > { %6473 = vmatprep.subr.bf16.mxu1 %v9283_v5  ;;  %6553 = vmatprep.subr.bf16.mxu0 %v9283_v5 }
 0x342   : > { %6483 = vmatprep.mubr.msk.bf16.mxu1 %vm7016_vm0, %v9283_v5  ;;  %6563 = vmatprep.mubr.msk.bf16.mxu0 %vm7016_vm0, %v9283_v5 }
 0x344   : > { %6474 = vmatpush3.bf16.msra.mxu1 %v8617_v6  ;;  %6554 = vmatpush3.bf16.msra.mxu0 %v8622_v49 }
 0x345   : > { %6475 = vmatprep.subr.bf16.mxu1 %v9283_v5  ;;  %6555 = vmatprep.subr.bf16.mxu0 %v9283_v5 }
 0x348   : > { %6476 = vmatpush3.bf16.msra.mxu1 %v8635_v23  ;;  %6556 = vmatpush3.bf16.msra.mxu0 %v8640_v45 }
 0x349   : > { %6477 = vmatprep.subr.bf16.mxu1 %v9283_v5  ;;  %6557 = vmatprep.subr.bf16.mxu0 %v9283_v5 }
 0x34c   : > { %6478 = vmatpush3.bf16.msra.mxu1 %v8651_v3  ;;  %6558 = vmatpush3.bf16.msra.mxu0 %v8656_v13 }
 0x34d   : > { %6479 = vmatprep.subr.bf16.mxu1 %v9283_v5  ;;  %6559 = vmatprep.subr.bf16.mxu0 %v9283_v5 }
 0x350   : > { %6480 = vmatpush3.bf16.msra.mxu1 %v8665_v28  ;;  %6560 = vmatpush3.bf16.msra.mxu0 %v8670_v33 }
 0x351   : > { %6481 = vmatprep.subr.bf16.mxu1 %v9283_v5  ;;  %6561 = vmatprep.subr.bf16.mxu0 %v9283_v5 }
 0x354   : > { %6482 = vmatpush3.bf16.msra.mxu1 %v8679_v7  ;;  %6562 = vmatpush3.bf16.msra.mxu0 %v8684_v14  ;;  %v6850_v7 = vld [vmem:[%s9246_s3 + $0x20] sm:$0xff]   ;;  %v6851_v14 = vld [vmem:[%s9246_s3 + $0x48] sm:$0xff]  }
 0x355   : > { %6503 = vmatprep.subr.bf16.mxu1 %v9283_v5  ;;  %6583 = vmatprep.subr.bf16.mxu0 %v9283_v5 }
 0x357   : > { %6484 = vmatmul.mubr.msk.bf16.vlgmr.msra.gmra.mxu1 %vm2648_vm3, %v8400_v38  ;;  %6564 = vmatmul.mubr.msk.bf16.vlgmr.msra.gmra.mxu0 %vm2648_vm3, %v8400_v38 }
 0x358   : > { %6504 = vmatpush3.bf16.msra.mxu1 %v8696_v39  ;;  %6515 = vmatprep.mubr.msk.bf16.mxu1 %vm7016_vm0, %v9283_v5 }
 0x359   : > { %6505 = vmatprep.subr.bf16.mxu1 %v9283_v5  ;;  %6593 = vmatprep.mubr.msk.bf16.mxu0 %vm7016_vm0, %v9283_v5 }
 0x35a   : > { %6584 = vmatpush3.bf16.msra.mxu0 %v6850_v7 }
 0x35b   : > { %6585 = vmatprep.subr.bf16.mxu0 %v9283_v5 }
 0x35c   : > { %6506 = vmatpush3.bf16.msra.mxu1 %v8707_v21  ;;  %v6852_v21 = vld [vmem:[%s9246_s3 + $0x18] sm:$0xff]  }
 0x35d   : > { %6507 = vmatprep.subr.bf16.mxu1 %v9283_v5 }
 0x35e   : > { %6586 = vmatpush3.bf16.msra.mxu0 %v6852_v21 }
 0x35f   : > { %6587 = vmatprep.subr.bf16.mxu0 %v9283_v5 }
 0x360   : > { %6508 = vmatpush3.bf16.msra.mxu1 %v8720_v40 }
 0x361   : > { %6509 = vmatprep.subr.bf16.mxu1 %v9283_v5 }
 0x364   : > { %6510 = vmatpush3.bf16.msra.mxu1 %v8731_v11 }
 0x365   : > { %6511 = vmatprep.subr.bf16.mxu1 %v9283_v5 }
 0x368   : > { %6512 = vmatpush3.bf16.msra.mxu1 %v8740_v20 }
 0x369   : > { %6513 = vmatprep.subr.bf16.mxu1 %v9283_v5 }
 0x36c   : > { %6514 = vmatpush3.bf16.msra.mxu1 %v8749_v53 }
 0x36d   : > { %6535 = vmatprep.subr.bf16.mxu1 %v9283_v5 }
 0x36f   : > { %6516 = vmatmul.mubr.msk.bf16.vlgmr.msra.gmra.mxu1 %vm2648_vm3, %v8600_v60 }
 0x370   : > { %6536 = vmatpush3.bf16.msra.mxu1 %v8761_v9  ;;  %6547 = vmatprep.mubr.msk.bf16.mxu1 %vm7016_vm0, %v9283_v5 }
 0x371   : > { %6537 = vmatprep.subr.bf16.mxu1 %v9283_v5 }
 0x374   : > { %6538 = vmatpush3.bf16.msra.mxu1 %v8772_v10  ;;  %v6853_v10 = vld [vmem:[%s9246_s3 + $0x40] sm:$0xff]  }
 0x375   : > { %6539 = vmatprep.subr.bf16.mxu1 %v9283_v5 }
 0x378   : > { %6540 = vmatpush3.bf16.msra.mxu1 %v8785_v4  ;;  %v6854_v4 = vld [vmem:[%s9246_s3 + $0x10] sm:$0xff]  }
 0x379   : > { %6541 = vmatprep.subr.bf16.mxu1 %v9283_v5  ;;  %6588 = vmatpush3.bf16.msra.mxu0 %v6854_v4 }
 0x37a   : > { %6589 = vmatprep.subr.bf16.mxu0 %v9283_v5 }
 0x37c   : > { %6542 = vmatpush3.bf16.msra.mxu1 %v8796_v47  ;;  %v6857_v47 = vld [vmem:[%s9246_s3 + $0x30] sm:$0xff]  }
 0x37d   : > { %6543 = vmatprep.subr.bf16.mxu1 %v9283_v5  ;;  %6590 = vmatpush3.bf16.msra.mxu0 %v6856_v59 }
 0x37e   : > { %6591 = vmatprep.subr.bf16.mxu0 %v9283_v5 }
 0x380   : > { %6544 = vmatpush3.bf16.msra.mxu1 %v8805_v1 }
 0x381   : > { %6545 = vmatprep.subr.bf16.mxu1 %v9283_v5 }
 0x384   : > { %6546 = vmatpush3.bf16.msra.mxu1 %v8814_v43  ;;  %v6858_v43 = vld [vmem:[%s9246_s3] sm:$0xff]  }
 0x385   : > { %6567 = vmatprep.subr.bf16.mxu1 %v9283_v5  ;;  %6592 = vmatpush3.bf16.msra.mxu0 %v6858_v43  ;;  %v6862_v43 = vld [vmem:[%s9246_s3 + $0x68] sm:$0xff]  }
 0x386   : > { %6611 = vmatprep.subr.bf16.mxu0 %v9283_v5 }
 0x387   : > { %6548 = vmatmul.mubr.msk.bf16.vlgmr.msra.gmra.mxu1 %vm2648_vm3, %v8600_v60  ;;  %v2782_v38 = vpop.f32.mrf.mxu1  ;;  %v3235_v62 = vpop.f32.mrf.mxu0 }
 0x388   : > { %v2788_v29 = vadd.f32 %v2782_v38, %v8644_v2  ;;  %6568 = vmatpush3.bf16.msra.mxu1 %v8826_v37  ;;  %6579 = vmatprep.mubr.msk.bf16.mxu1 %vm7016_vm0, %v9283_v5 }
 0x389   : > { %v6293_v30 = vpop.f32.mrf.mxu1  ;;  %v6373_v31 = vpop.f32.mrf.mxu0  ;;  %6569 = vmatprep.subr.bf16.mxu1 %v9283_v5 }
 0x38a   : > { %v2880_v32 = vadd.f32 %v2878_v15, %v2788_v29 }
 0x38b   : > { %v2785_v34 = vpop.f32.mrf.mxu1  ;;  %v3238_v41 = vpop.f32.mrf.mxu0 }
 0x38c   : > { %6570 = vmatpush3.bf16.msra.mxu1 %v8837_v54 }
 0x38d   : > { %v6294_v8 = vpop.f32.mrf.mxu1  ;;  %v6374_v36 = vpop.f32.mrf.mxu0  ;;  %6571 = vmatprep.subr.bf16.mxu1 %v9283_v5 }
 0x390   : > { %6572 = vmatpush3.bf16.msra.mxu1 %v8850_v56  ;;  %v6859_v56 = vld [vmem:[%s9246_s3 + $0x28] sm:$0xff]  }
 0x391   : > { %6573 = vmatprep.subr.bf16.mxu1 %v9283_v5 }
 0x394   : > { %6574 = vmatpush3.bf16.msra.mxu1 %v8859_v55 }
 0x395   : > { %6575 = vmatprep.subr.bf16.mxu1 %v9283_v5 }
 0x398   : > { %6576 = vmatpush3.bf16.msra.mxu1 %v8868_v61 }
 0x399   : > { %6577 = vmatprep.subr.bf16.mxu1 %v9283_v5 }
 0x39c   : > { %6578 = vmatpush3.bf16.msra.mxu1 %v8877_v24 }
 0x39d   : > { %6597 = vmatprep.subr.bf16.mxu1 %v9283_v5 }
 0x39f   : > { %v2963_v26 = vpop.f32.mrf.mxu1  ;;  %v3416_v42 = vpop.f32.mrf.mxu0  ;;  %6580 = vmatmul.mubr.msk.bf16.vlgmr.msra.gmra.mxu1 %vm2648_vm3, %v8600_v60 }
 0x3a0   : > { %v2970_v48 = vrot.slane %v2963_v26, 1  ;;  %6607 = vmatprep.mubr.msk.bf16.mxu1 %vm7016_vm0, %v9283_v5  ;;  %6598 = vmatpush3.bf16.msra.mxu1 %v6851_v14  ;;  %v3423_v11 = vrot.slane %v3416_v42, 1 }
 0x3a1   : > { %v6325_v50 = vpop.f32.mrf.mxu1  ;;  %v6405_v51 = vpop.f32.mrf.mxu0  ;;  %6599 = vmatprep.subr.bf16.mxu1 %v9283_v5 }
 0x3a2   : > { %v2972_v58 = vadd.f32 %v2970_v48, %v2880_v32 }
 0x3a3   : > { %v2966_v63 = vpop.f32.mrf.mxu1  ;;  %v3419_v6 = vpop.f32.mrf.mxu0 }
 0x3a4   : > { %v9008_v49 = vadd.f32 %v3062_v12, %v2972_v58  ;;  %6600 = vmatpush3.bf16.msra.mxu1 %v6853_v10 }
 0x3a5   : > { %v6326_v23 = vpop.f32.mrf.mxu1  ;;  %v6406_v45 = vpop.f32.mrf.mxu0  ;;  %6601 = vmatprep.subr.bf16.mxu1 %v9283_v5 }
 0x3a8   : > { %6602 = vmatpush3.bf16.msra.mxu1 %v6855_v57 }
 0x3a9   : > { %6603 = vmatprep.subr.bf16.mxu1 %v9283_v5 }
 0x3ac   : > { %6604 = vmatpush3.bf16.msra.mxu1 %v6857_v47  ;;  %v6860_v47 = vld [vmem:[%s9246_s3 + $0x70] sm:$0xff]  }
 0x3ad   : > { %6605 = vmatprep.subr.bf16.mxu1 %v9283_v5 }
 0x3b0   : > { %6606 = vmatpush3.bf16.msra.mxu1 %v6859_v56  ;;  %v6866_v56 = vld [vmem:[%s9246_s3 + $0x58] sm:$0xff]  }
 0x3b1   : > { %6625 = vmatprep.subr.bf16.mxu1 %v9283_v5 }
 0x3b7   : > { %v3147_v2 = vpop.f32.mrf.mxu1  ;;  %v9010_v0 = vpop.f32.mrf.mxu0 }
 0x3b8   : > { %v3241_v3 = vadd.f32 %v3235_v62, %v3147_v2 }
 0x3b9   : > { %v6357_v60 = vpop.f32.mrf.mxu1  ;;  %v6437_v13 = vpop.f32.mrf.mxu0 }
 0x3bb   : > { %v3150_v18 = vpop.f32.mrf.mxu1  ;;  %v3556_v27 = vpop.f32.mrf.mxu0 }
 0x3bd   : > { %v6358_v28 = vpop.f32.mrf.mxu1  ;;  %v6438_v33 = vpop.f32.mrf.mxu0 }
 0x3cf   : > { %v3324_v16 = vpop.f32.mrf.mxu1  ;;  %v3637_v39 = vpop.f32.mrf.mxu0 }
 0x3d0   : > { %v3331_v40 = vrot.slane %v3324_v16, 1  ;;  %v3644_v34 = vrot.slane %v3637_v39, 1 }
 0x3d1   : > { %v6389_v22 = vpop.f32.mrf.mxu1  ;;  %v6469_v44 = vpop.f32.mrf.mxu0 }
 0x3d2   : > { %v3333_v46 = vadd.f32 %v3331_v40, %v3241_v3 }
 0x3d3   : > { %v3327_v52 = vpop.f32.mrf.mxu1  ;;  %v3640_v20 = vpop.f32.mrf.mxu0 }
 0x3d4   : > { %v3425_v53 = vadd.f32 %v3423_v11, %v3333_v46 }
 0x3d5   : > { %v6390_v35 = vpop.f32.mrf.mxu1  ;;  %v6470_v9 = vpop.f32.mrf.mxu0 }
 0x3d6   : > { %v5066_v9 = vld [vmem:[%s9250_s7] ss:$0 sm:$0xff] }
 0x3e7   : > { %v3508_v19 = vpop.f32.mrf.mxu1  ;;  %v3725_v17 = vpop.f32.mrf.mxu0 }
 0x3e8   : > { %v3515_v1 = vrot.slane %v3508_v19, 2  ;;  %v3732_v6 = vrot.slane %v3725_v17, 2  ;;  %v6861_v17 = vld [vmem:[%s9246_s3 + $0x98] sm:$0xff]  }
 0x3e9   : > { %v6421_v25 = vpop.f32.mrf.mxu1  ;;  %v6501_v37 = vpop.f32.mrf.mxu0 }
 0x3ea   : > { %v3517_v54 = vadd.f32 %v3515_v1, %v3425_v53  ;;  %v6863_v25 = vld [vmem:[%s9246_s3 + $0x90] sm:$0xff]   ;;  %v6864_v37 = vld [vmem:[%s9246_s3 + $0x60] sm:$0xff]  }
 0x3eb   : > { %v3511_v55 = vpop.f32.mrf.mxu1  ;;  %v3728_v61 = vpop.f32.mrf.mxu0 }
 0x3ec   : > { %v3518_v24 = vmax.f32 %v9008_v49, %v3517_v54  ;;  %v6865_v54 = vld [vmem:[%s9246_s3 + $0x88] sm:$0xff]   ;;  %v6867_v55 = vld [vmem:[%s9246_s3 + $0x80] sm:$0xff]   ;;  %v6868_v61 = vld [vmem:[%s9246_s3 + $0x50] sm:$0xff]  }
 0x3ed   : > { %v6422_v38 = vpop.f32.mrf.mxu1  ;;  %v6502_v62 = vpop.f32.mrf.mxu0 }
 0x3ee   : > { %v6870_v38 = vld [vmem:[%s9246_s3 + $0xc0] sm:$0xff]  }
 0x3ff   : > { %v3593_v15 = vpop.f32.mrf.mxu1  ;;  %v3809_v29 = vpop.f32.mrf.mxu0 }
 0x400   : > { %v3600_v30 = vrot.slane %v3593_v15, 1  ;;  %v3816_v28 = vrot.slane %v3809_v29, 1  ;;  %v6871_v29 = vld [vmem:[%s9246_s3 + $0xb8] sm:$0xff]  }
 0x401   : > { %v6453_v31 = vpop.f32.mrf.mxu1  ;;  %v6533_v32 = vpop.f32.mrf.mxu0 }
 0x402   : > { %v3602_v41 = vadd.f32 %v3600_v30, %v9010_v0  ;;  %v6872_v30 = vld [vmem:[%s9246_s3 + $0xb0] sm:$0xff]   ;;  %v6873_v31 = vld [vmem:[%s9246_s3 + $0xa8] sm:$0xff]   ;;  %v6874_v32 = vld [vmem:[%s9246_s3 + $0xa0] sm:$0xff]  }
 0x403   : > { %v3596_v8 = vpop.f32.mrf.mxu1  ;;  %v3812_v36 = vpop.f32.mrf.mxu0 }
 0x404   : > { %v3646_v26 = vadd.f32 %v3644_v34, %v3602_v41  ;;  %v6875_v41 = vld [vmem:[%s9247_s4 + $0x38] ss:$0 sps:$4 sm:$0xff]   ;;  %v6876_v36 = vld [vmem:[%s9247_s4 + $0x30] sm:$0xff]  }
 0x405   : > { %v6454_v42 = vpop.f32.mrf.mxu1  ;;  %v6534_v48 = vpop.f32.mrf.mxu0  ;;  %v4464_v8 = vsel %vm4462_vm5, %v6875_v41, 0 }
 0x406   : > { %v6878_v42 = vld [vmem:[%s9247_s4 + $0x20] sm:$0xff]   ;;  %v6879_v48 = vld [vmem:[%s9247_s4 + $0x18] sm:$0xff]  }
 0x417   : > { %v3681_v50 = vpop.f32.mrf.mxu1  ;;  %v3897_v51 = vpop.f32.mrf.mxu0 }
 0x418   : > { %v3688_v12 = vrot.slane %v3681_v50, 2  ;;  %v3904_v39 = vrot.slane %v3897_v51, 2  ;;  %v6880_v50 = vld [vmem:[%s9247_s4 + $0x10] sm:$0xff]   ;;  %v6881_v51 = vld [vmem:[%s9247_s4 + $0x8] sm:$0xff]  }
 0x419   : > { %v6485_v58 = vpop.f32.mrf.mxu1  ;;  %v6565_v63 = vpop.f32.mrf.mxu0 }
 0x41a   : > { %v3690_v49 = vadd.f32 %v3688_v12, %v3646_v26  ;;  %v6877_v26 = vld [vmem:[%s9247_s4 + $0x28] sm:$0xff]   ;;  %v6882_v12 = vld [vmem:[%s9247_s4] sm:$0xff]  }
 0x41b   : > { %v3684_v23 = vpop.f32.mrf.mxu1  ;;  %v3900_v45 = vpop.f32.mrf.mxu0  ;;  %v6883_v58 = vld [vmem:[%s9248_s5 + $0x28] ss:$0 sps:$4 sm:$0x33]  }
 0x41c   : > { %v3734_v2 = vadd.f32 %v3732_v6, %v3690_v49  ;;  %v4557_v63 = vsel %vm2652_vm2, %v6883_v58, 0  ;;  %v6884_v6 = vld [vmem:[%s9248_s5 + $0x20] sm:$0xff]   ;;  %v6885_v49 = vld [vmem:[%s9248_s5 + $0x18] sm:$0xff]   ;;  %v6886_v23 = vld [vmem:[%s9248_s5 + $0x10] sm:$0xff]  }
 0x41d   : > { %v6486_v3 = vpop.f32.mrf.mxu1  ;;  %v6566_v60 = vpop.f32.mrf.mxu0 }
 0x42f   : > { %v3769_v13 = vpop.f32.mrf.mxu1 }
 0x430   : > { %v3818_v7 = vadd.f32 %v3816_v28, %v3769_v13 }
 0x431   : > { %v6517_v18 = vpop.f32.mrf.mxu1 }
 0x433   : > { %v3772_v0 = vpop.f32.mrf.mxu1 }
 0x435   : > { %v6518_v27 = vpop.f32.mrf.mxu1 }
 0x447   : > { %v3853_v33 = vpop.f32.mrf.mxu1 }
 0x448   : > { %v3860_v14 = vrot.slane %v3853_v33, 1 }
 0x449   : > { %v6549_v16 = vpop.f32.mrf.mxu1 }
 0x44a   : > { %v3862_v21 = vadd.f32 %v3860_v14, %v3818_v7 }
 0x44b   : > { %v3856_v40 = vpop.f32.mrf.mxu1 }
 0x44c   : > { %v3906_v22 = vadd.f32 %v3904_v39, %v3862_v21  ;;  %v3962_v39 = vld [vmem:[%s9251_s8] sm:$0x1] }
 0x44d   : > { %v6550_v44 = vpop.f32.mrf.mxu1 }
 0x45f   : > { %v3941_v11 = vpop.f32.mrf.mxu1 }
 0x460   : > { %v3948_v46 = vrot.slane %v3941_v11, 2 }
 0x461   : > { %v6581_v52 = vpop.f32.mrf.mxu1 }
 0x462   : > { %v3950_v20 = vadd.f32 %v3948_v46, %v3906_v22 }
 0x463   : > { %v3944_v53 = vpop.f32.mrf.mxu1 }
 0x464   : > { %v3951_v35 = vmax.f32 %v3734_v2, %v3950_v20 }
 0x465   : > { %v6582_v10 = vpop.f32.mrf.mxu1 }
 0x466   : > { %v3952_v4 = vmax.f32 %v3518_v24, %v3951_v35  ;;  %v6869_v24 = vld [vmem:[%s9246_s3 + $0x78] sm:$0xff]  }
 0x468   : > { %v3960_v57 = vadd.f32 %v5066_v9, %v3952_v4 }
 0x46a   : > { %v3961_v59 = vmax.f32 %v3960_v57, 0.0 }
 0x46c   : > { %v3973_v19 = vpack.c.bf16 %v3961_v59, %v3961_v59  ;;  %v6887_v59 = vld [vmem:[%s9248_s5 + $0x8] sm:$0xff]  }
 0x46e   : > { %6594 = vmatmul.mubr.msk.bf16.vlgmr.msra.gmra.mxu0 %vm4004_vm4, %v3973_v19  ;;  %v4060_v1 = vshrl.u32 %v3973_v19, 16  ;;  %v4148_v62 = vrot.slane %v3973_v19, 1  ;;  %v4320_v34 = vrot.slane %v3973_v19, 2  ;;  %v4412_v19 = vld [vmem:[%s9252_s9] sm:$0x1] }
 0x46f   : > { %6612 = vmatpush3.bf16.msra.mxu0 %v6860_v47  ;;  %6621 = vmatprep.mubr.msk.bf16.mxu0 %vm7016_vm0, %v9283_v5  ;;  %v6888_v47 = vld [vmem:[%s9248_s5] sm:$0xff]  }
 0x470   : > { %6608 = vmatmul.mubr.msk.bf16.vlgmr.msra.gmra.mxu1 %vm4004_vm4, %v4060_v1  ;;  %6613 = vmatprep.subr.bf16.mxu0 %v9283_v5  ;;  %v4234_v15 = vrot.slane %v4060_v1, 1 }
 0x471   : > { %6626 = vmatpush3.bf16.msra.mxu1 %v6861_v17  ;;  %6635 = vmatprep.mubr.msk.bf16.mxu1 %vm7016_vm0, %v9283_v5 }
 0x472   : > { %6627 = vmatprep.subr.bf16.mxu1 %v9283_v5 }
 0x473   : > { %6614 = vmatpush3.bf16.msra.mxu0 %v6862_v43 }
 0x474   : > { %6615 = vmatprep.subr.bf16.mxu0 %v9283_v5 }
 0x475   : > { %6628 = vmatpush3.bf16.msra.mxu1 %v6863_v25 }
 0x476   : > { %6629 = vmatprep.subr.bf16.mxu1 %v9283_v5 }
 0x477   : > { %6616 = vmatpush3.bf16.msra.mxu0 %v6864_v37 }
 0x478   : > { %6617 = vmatprep.subr.bf16.mxu0 %v9283_v5 }
 0x479   : > { %6630 = vmatpush3.bf16.msra.mxu1 %v6865_v54 }
 0x47a   : > { %6631 = vmatprep.subr.bf16.mxu1 %v9283_v5 }
 0x47b   : > { %6618 = vmatpush3.bf16.msra.mxu0 %v6866_v56 }
 0x47c   : > { %6619 = vmatprep.subr.bf16.mxu0 %v9283_v5 }
 0x47d   : > { %6632 = vmatpush3.bf16.msra.mxu1 %v6867_v55 }
 0x47e   : > { %6633 = vmatprep.subr.bf16.mxu1 %v9283_v5 }
 0x47f   : > { %6620 = vmatpush3.bf16.msra.mxu0 %v6868_v61 }
 0x480   : > { %6639 = vmatprep.subr.bf16.mxu0 %v9283_v5 }
 0x481   : > { %6634 = vmatpush3.bf16.msra.mxu1 %v6869_v24 }
 0x482   : > { %6622 = vmatmul.mubr.msk.bf16.vlgmr.msra.gmra.mxu0 %vm4004_vm4, %v4148_v62  ;;  %6653 = vmatprep.subr.bf16.mxu1 %v9283_v5 }
 0x483   : > { %6640 = vmatpush3.bf16.msra.mxu0 %v6870_v38  ;;  %6649 = vmatprep.mubr.msk.bf16.mxu0 %vm7016_vm0, %v9283_v5 }
 0x484   : > { %6636 = vmatmul.mubr.msk.bf16.vlgmr.msra.gmra.mxu1 %vm4004_vm4, %v4234_v15  ;;  %6641 = vmatprep.subr.bf16.mxu0 %v9283_v5 }
 0x485   : > { %6669 = vmatprep.mubr.msk.bf16.mxu1 %vm7016_vm0, %v9283_v5  ;;  %6654 = vmatpush3.bf16.msra.mxu1 %v4464_v8 }
 0x486   : > { %6655 = vmatprep.subr.bf16.mxu1 %v9283_v5 }
 0x487   : > { %6642 = vmatpush3.bf16.msra.mxu0 %v6871_v29 }
 0x488   : > { %6643 = vmatprep.subr.bf16.mxu0 %v9283_v5 }
 0x489   : > { %6656 = vmatpush3.bf16.msra.mxu1 %v6876_v36 }
 0x48a   : > { %6657 = vmatprep.subr.bf16.mxu1 %v9283_v5 }
 0x48b   : > { %6644 = vmatpush3.bf16.msra.mxu0 %v6872_v30 }
 0x48c   : > { %6645 = vmatprep.subr.bf16.mxu0 %v9283_v5 }
 0x48d   : > { %6658 = vmatpush3.bf16.msra.mxu1 %v6877_v26 }
 0x48e   : > { %6659 = vmatprep.subr.bf16.mxu1 %v9283_v5 }
 0x48f   : > { %6646 = vmatpush3.bf16.msra.mxu0 %v6873_v31 }
 0x490   : > { %6647 = vmatprep.subr.bf16.mxu0 %v9283_v5 }
 0x491   : > { %6660 = vmatpush3.bf16.msra.mxu1 %v6878_v42 }
 0x492   : > { %6661 = vmatprep.subr.bf16.mxu1 %v9283_v5 }
 0x493   : > { %6648 = vmatpush3.bf16.msra.mxu0 %v6874_v32 }
 0x494   : > { %6673 = vmatprep.subr.bf16.mxu0 %v9283_v5 }
 0x495   : > { %6662 = vmatpush3.bf16.msra.mxu1 %v6879_v48 }
 0x496   : > { %6650 = vmatmul.mubr.msk.bf16.vlgmr.msra.gmra.mxu0 %vm4004_vm4, %v4320_v34  ;;  %6663 = vmatprep.subr.bf16.mxu1 %v9283_v5 }
 0x497   : > { %6685 = vmatprep.mubr.msk.bf16.mxu0 %vm7016_vm0, %v9283_v5  ;;  %6674 = vmatpush3.bf16.msra.mxu0 %v4557_v63 }
 0x498   : > { %6675 = vmatprep.subr.bf16.mxu0 %v9283_v5 }
 0x499   : > { %6664 = vmatpush3.bf16.msra.mxu1 %v6880_v50 }
 0x49a   : > { %6665 = vmatprep.subr.bf16.mxu1 %v9283_v5 }
 0x49b   : > { %6676 = vmatpush3.bf16.msra.mxu0 %v6884_v6 }
 0x49c   : > { %6677 = vmatprep.subr.bf16.mxu0 %v9283_v5 }
 0x49d   : > { %6666 = vmatpush3.bf16.msra.mxu1 %v6881_v51 }
 0x49e   : > { %6667 = vmatprep.subr.bf16.mxu1 %v9283_v5 }
 0x49f   : > { %6678 = vmatpush3.bf16.msra.mxu0 %v6885_v49 }
 0x4a0   : > { %6679 = vmatprep.subr.bf16.mxu0 %v9283_v5 }
 0x4a1   : > { %6668 = vmatpush3.bf16.msra.mxu1 %v6882_v12 }
 0x4a3   : > { %6680 = vmatpush3.bf16.msra.mxu0 %v6886_v23 }
 0x4a4   : > { %6681 = vmatprep.subr.bf16.mxu0 %v9283_v5 }
 0x4a7   : > { %6682 = vmatpush3.bf16.msra.mxu0 %v6887_v59 }
 0x4a8   : > { %6683 = vmatprep.subr.bf16.mxu0 %v9283_v5  ;;  %v4519_v5 = vld [vmem:[%s9253_s10] sm:$0x1] }
 0x4ab   : > { %6684 = vmatpush3.bf16.msra.mxu0 %v6888_v47 }
 0x52e   : > { %v4042_v45 = vpop.f32.mrf.mxu0 }
 0x52f   : > { %v4048_v44 = vadd.f32 %v4042_v45, %v3962_v39 }
 0x530   : > { %v6595_v2 = vpop.f32.mrf.mxu0  ;;  %v4129_v3 = vpop.f32.mrf.mxu1 }
 0x531   : > { %v4135_v11 = vadd.f32 %v4129_v3, %v4048_v44 }
 0x532   : > { %v4045_v60 = vpop.f32.mrf.mxu0  ;;  %v6609_v13 = vpop.f32.mrf.mxu1 }
 0x534   : > { %v6596_v18 = vpop.f32.mrf.mxu0  ;;  %v4132_v0 = vpop.f32.mrf.mxu1 }
 0x536   : > { %v6610_v27 = vpop.f32.mrf.mxu1 }
 0x542   : > { %v4216_v28 = vpop.f32.mrf.mxu0 }
 0x543   : > { %v4222_v46 = vadd.f32 %v4216_v28, %v4135_v11 }
 0x544   : > { %v6623_v33 = vpop.f32.mrf.mxu0  ;;  %v4302_v7 = vpop.f32.mrf.mxu1 }
 0x545   : > { %v4308_v52 = vadd.f32 %v4302_v7, %v4222_v46 }
 0x546   : > { %v4219_v14 = vpop.f32.mrf.mxu0  ;;  %v6637_v16 = vpop.f32.mrf.mxu1 }
 0x548   : > { %v6624_v21 = vpop.f32.mrf.mxu0  ;;  %v4305_v40 = vpop.f32.mrf.mxu1 }
 0x54a   : > { %v6638_v22 = vpop.f32.mrf.mxu1 }
 0x556   : > { %v4388_v20 = vpop.f32.mrf.mxu0 }
 0x557   : > { %v4394_v53 = vadd.f32 %v4388_v20, %v4308_v52 }
 0x558   : > { %v6651_v35 = vpop.f32.mrf.mxu0 }
 0x559   : > { %v4395_v9 = vmax.f32 %v4394_v53, 0.0 }
 0x55a   : > { %v4391_v10 = vpop.f32.mrf.mxu0 }
 0x55b   : > { %v4411_v4 = vpack.c.bf16 %v4395_v9, %v4395_v9 }
 0x55c   : > { %v6652_v57 = vpop.f32.mrf.mxu0 }
 0x55d   : > { %6670 = vmatmul.mubr.msk.bf16.vlgmr.msra.gmra.mxu1 %vm4458_vm6, %v4411_v4 }
 0x61d   : > { %v4500_v17 = vpop.f32.mrf.mxu1 }
 0x61e   : > { %v4501_v1 = vadd.f32 %v4500_v17, %v4412_v19 }
 0x61f   : > { %v6671_v43 = vpop.f32.mrf.mxu1 }
 0x620   : > { %v4506_v25 = vmax.f32 %v4501_v1, 0.0 }
 0x621   : > { %v4503_v37 = vpop.f32.mrf.mxu1 }
 0x622   : > { %v4518_v54 = vpack.c.bf16 %v4506_v25, %v4506_v25 }
 0x623   : > { %v6672_v56 = vpop.f32.mrf.mxu1 }
 0x624   : > { %6686 = vmatmul.mubr.msk.bf16.vlgmr.msra.gmra.mxu0 %vm2648_vm3, %v4518_v54 }
 0x6e4   : > { %v4593_v55 = vpop.f32.mrf.mxu0 }
 0x6e5   : > { %v4594_v61 = vadd.f32 %v4593_v55, %v4519_v5 }
 0x6e6   : > { %v6687_v24 = vpop.f32.mrf.mxu0 }
 0x6e7   : > { %4600 = vst.msk [vmem:[%s378_s24] sm:$0x1] %vm4599_vm7, %v4594_v61 }
 0x6e8   : > { %v4596_v38 = vpop.f32.mrf.mxu0 }
 0x6e9   : > { %6966 = shalt.err (!%p6963_p3)
}
 0x6ea   : > { %s6967_s22 = scalar_lea.hbm %s9202_s12, 16  ;;  %s6971_s30 = scalar_lea.hbm %s9254_s11, 32 }
 0x6eb   : > { %p6968_p4 = scmp.ne.s32.totalorder %s9202_s12, %s6967_s22  ;;  %p6972_p9 = scmp.lt.s32.totalorder %s9202_s12, %s9254_s11 }
 0x6ec   : > { %p6973_p10 = scmp.lt.s32.totalorder %s6971_s30, %s6967_s22 }
 0x6ed   : > { %p6969_p7 = pnand %p6968_p4, %p7116_p5 }
 0x6ee   : > { %p6974_p11 = por %p6973_p10, %p6972_p9 }
 0x6ef   : > { %p6970_p8 = pneg %p6969_p7 }
 0x6f1   : > { %p6975_p12 = pnand %p6974_p11, %p6970_p8 }
 0x6f3   : > { %6978 = shalt.err (!%p6975_p12)
}
 0x6f4   : > { %6689 = dma.vmem_to_hbm [thread:$0]  (%p7116_p5), %s9204_s25, 16, %s9202_s12, %s4602_s13   ;;  %v6688_v62 = vpop.f32.mrf.mxu0 }
 0x6f5 PF: > { %p6695_p13 = scmp.ge.s32.totalorder %s7013_s20, 2  ;;  %s4626_s21 = sand.u32 1, %s7001_s17  }
 0x6f6   : > { %s4627_s0 = scalar_lea.sflag [#allocation3], %s4626_s21 }
 0x6f7   : > { %p6692_p0 = pnand %p6695_p13, %p7120_p6 }
 0x6f9   : > { %p6693_p1 = pneg %p6692_p0 }
 0x6fb   : > { %6996 = dma.done.wait (%p6693_p1), %s4627_s0, 16  }
 0x6fc   : > { %6998 = vsyncadd (%p6693_p1), %s4627_s0, 4294967280  ;;  %p21_p2 = scmp.ge.s32.totalorder %s7103_s23, 4   ;;  %s9293_s17 = smov %s7005_s18 }
 0x6fd   : > { %s9294_s18 = smov %s7009_s19  ;;  %s9295_s19 = smov %s7114_s26 }
 0x6fe   : > { %s9296_s20 = smov %s7103_s23  ;;  %23 = sbr.rel (!%p21_p2) target bundleno = 5 (0x5), region = 124 }
 0x703   :  { %4631 = vsyncpa [#allocation3], 1 }
 0x704   :  { %4633 = vsyncpa [#allocation3 + $0x1], 1 }

</bundles_post_ra>
